<compile_context>
chip_gen: v6e
topology: v6e:2x2x1
jax: 0.10.0
libtpu: 0.0.40
codegen_flags: <defaults>
</compile_context>

<pallas_src>
import jax
import jax.numpy as jnp
from jax import lax
from jax.experimental import pallas as pl
from jax.experimental.pallas import tpu as pltpu

# ----------------------------------------------------------------------------
# Model hyperparameters (PyTorch CNN3D1 defaults)
# ----------------------------------------------------------------------------
T_DIM, IMG_X, IMG_Y = 10, 4, 4            # input (B, 3, 10, 4, 4)
C_IN, CH1 = 3, 8
DO, HO, WO = T_DIM - 2, IMG_X - 2, IMG_Y - 2   # valid 3x3x3 conv -> (8, 2, 2)
S = DO * HO * WO                          # 32 output positions per sample
K_RAW = C_IN * 3 * 3 * 3                  # 81 patch features
K_PAD = 128                               # one full lane tile per patch row
FC_DIM = CH1 * S                          # 256
FC_HIDDEN = 64
BN_EPS = 1e-5


# ----------------------------------------------------------------------------
# The single fused Pallas kernel
# ----------------------------------------------------------------------------
def _cnn3d1_kernel(x3_ref, wrep_ref, shift_ref, w1p_ref, b1_ref, o_ref):
    """Fused conv1(+folded BN) + ReLU -> flatten -> fc1 + ReLU.

    x3:    (S, B, K_PAD)        im2col patches, position-major
    wrep:  (S, K_PAD, CH1)      conv weight (BN scale folded), replicated per s
    shift: (1, 1, CH1)          conv bias + BN shift
    w1p:   (S, CH1, FC_HIDDEN)  fc1 weight, rows permuted from c*S+s order
    b1:    (1, FC_HIDDEN)       fc1 bias
    o:     (B, FC_HIDDEN)
    """
    # conv + BN + ReLU at every output position: (S, B, CH1)
    g = jnp.einsum('sbk,skc->sbc', x3_ref[...], wrep_ref[...],
                   preferred_element_type=jnp.float32)
    g = jnp.maximum(g + shift_ref[...], 0.0)
    # fc1 as a per-position batched matmul, then reduce over positions.
    t = jnp.einsum('sbc,sco->sbo', g, w1p_ref[...],
                   preferred_element_type=jnp.float32)        # (S, B, 64)
    y = jnp.sum(t, axis=0) + b1_ref[...]                      # (B, 64)
    o_ref[...] = jnp.maximum(y, 0.0).astype(o_ref.dtype)


def _fused_forward_call(x3, wrep, shift, w1p, b1):
    _, B, _ = x3.shape
    flops = 2 * S * B * K_PAD * CH1 + 2 * S * B * CH1 * FC_HIDDEN
    bytes_accessed = 4 * (x3.size + wrep.size + shift.size + w1p.size + b1.size
                          + B * FC_HIDDEN)
    vmem_spec = pl.BlockSpec(memory_space=pltpu.MemorySpace.VMEM)
    return pl.pallas_call(
        _cnn3d1_kernel,
        out_shape=jax.ShapeDtypeStruct((B, FC_HIDDEN), jnp.float32),
        in_specs=[vmem_spec] * 5,
        out_specs=vmem_spec,
        cost_estimate=pl.CostEstimate(flops=flops, transcendentals=0,
                                      bytes_accessed=bytes_accessed),
    )(x3, wrep, shift, w1p, b1)


# ----------------------------------------------------------------------------
# JAX glue: im2col prologue (single tiny fused XLA op under jit)
# ----------------------------------------------------------------------------
def _im2col(x):
    """x:(B,C,D,H,W) -> (S, B, K_PAD).  k ordered (c_in, kd, kh, kw) to match
    PyTorch conv weight.reshape(C_out, -1); s ordered (d, h, w)."""
    B = x.shape[0]
    pats = []
    for dd in range(3):
        for hh in range(3):
            for ww in range(3):
                pats.append(x[:, :, dd:dd + DO, hh:hh + HO, ww:ww + WO])
    p = jnp.stack(pats, axis=2)                   # (B, C, 27, DO, HO, WO)
    p = jnp.transpose(p, (3, 4, 5, 0, 1, 2))      # (DO, HO, WO, B, C, 27)
    cols = p.reshape(S, B, K_RAW)                 # (S, B, 81)
    return jnp.pad(cols, ((0, 0), (0, 0), (0, K_PAD - K_RAW)))


@jax.jit
def cnn3d1_forward(prep, x):
    x3 = _im2col(x)
    return _fused_forward_call(x3, prep["wrep"], prep["shift"],
                               prep["w1p"], prep["b1"])


# ----------------------------------------------------------------------------
# Parameter setup: done ONCE, outside the per-call path
# ----------------------------------------------------------------------------
def init_params(key):
    ks = jax.random.split(key, 8)
    s = 0.1
    return {
        "conv1_w": s * jax.random.normal(ks[0], (CH1, C_IN, 3, 3, 3), jnp.float32),
        "conv1_b": s * jax.random.normal(ks[1], (CH1,), jnp.float32),
        "bn1_gamma": 1.0 + s * jax.random.normal(ks[2], (CH1,), jnp.float32),
        "bn1_beta": s * jax.random.normal(ks[3], (CH1,), jnp.float32),
        "bn1_mean": s * jax.random.normal(ks[4], (CH1,), jnp.float32),
        "bn1_var": 1.0 + jnp.abs(s * jax.random.normal(ks[5], (CH1,), jnp.float32)),
        "fc1_w": s * jax.random.normal(ks[6], (FC_HIDDEN, FC_DIM), jnp.float32),
        "fc1_b": s * jax.random.normal(ks[7], (FC_HIDDEN,), jnp.float32),
    }


def prepare_params(params):
    """Fold eval-mode BatchNorm into the conv weight, pad K to a lane tile,
    replicate the compact conv weight per output position, and re-lay-out the
    fc1 weight from PyTorch's c*S+s flatten order to (S, CH1, FC_HIDDEN)."""
    inv_std = 1.0 / jnp.sqrt(params["bn1_var"] + BN_EPS)
    scale = params["bn1_gamma"] * inv_std                                   # (CH1,)
    shift = (params["conv1_b"] - params["bn1_mean"]) * scale + params["bn1_beta"]

    # conv weight (CH1, C_IN, 3,3,3) -> (K_PAD, CH1) with BN scale folded.
    wc = (params["conv1_w"] * scale[:, None, None, None, None]).reshape(CH1, K_RAW).T
    wc = jnp.pad(wc, ((0, K_PAD - K_RAW), (0, 0)))                          # (128, 8)
    wrep = jnp.tile(wc[None, :, :], (S, 1, 1))                              # (32,128,8)

    # fc1 weight (64, 256), column j = c*S + s  ->  w1p[s, c, o]
    w1p = params["fc1_w"].reshape(FC_HIDDEN, CH1, S).transpose(2, 1, 0)     # (32,8,64)

    return {
        "wrep": wrep,                               # (32, 128, 8)   128 KiB
        "shift": shift.reshape(1, 1, CH1),          # (1, 1, 8)
        "w1p": w1p,                                 # (32, 8, 64)    64 KiB
        "b1": params["fc1_b"].reshape(1, FC_HIDDEN),
    }


# ----------------------------------------------------------------------------
# Pure-JAX reference (eval-mode semantics of the PyTorch module)
# ----------------------------------------------------------------------------
def reference_forward(params, x):
    y = lax.conv_general_dilated(
        x, params["conv1_w"], window_strides=(1, 1, 1), padding="VALID",
        dimension_numbers=("NCDHW", "OIDHW", "NCDHW"),
        precision=lax.Precision.HIGHEST)
    y = y + params["conv1_b"][None, :, None, None, None]
    inv_std = 1.0 / jnp.sqrt(params["bn1_var"] + BN_EPS)
    g = (params["bn1_gamma"] * inv_std)[None, :, None, None, None]
    y = (y - params["bn1_mean"][None, :, None, None, None]) * g \
        + params["bn1_beta"][None, :, None, None, None]
    y = jnp.maximum(y, 0.0)                      # ReLU; Dropout3d = identity (eval)
    y = y.reshape(x.shape[0], -1)                # PyTorch x.view(B, -1)
    y = jnp.dot(y, params["fc1_w"].T, precision=lax.Precision.HIGHEST) + params["fc1_b"]
    return jnp.maximum(y, 0.0)


if __name__ == "__main__":
    key = jax.random.PRNGKey(0)
    k_param, k_x = jax.random.split(key)
    params = init_params(k_param)
    prep = prepare_params(params)

    # Input (B, C, D, H, W) = (2, 3, 10, 4, 4): CNN3D1 defaults (t_dim=10, 4x4 taxels)
    x = jax.random.normal(k_x, (2, C_IN, T_DIM, IMG_X, IMG_Y), jnp.float32)

    out = cnn3d1_forward(prep, x)
    out = jax.block_until_ready(out)
    assert out.shape == (2, FC_HIDDEN), out.shape

    ref = reference_forward(params, x)
    max_err = float(jnp.max(jnp.abs(out - ref)))
    assert jnp.allclose(out, ref, rtol=1e-4, atol=1e-4), f"max abs err {max_err}"

    print("KERNEL_OK")
</pallas_src>

<mosaic_0001>
module attributes {stable_mosaic.version = 11 : i64} {
  func.func @_cnn3d1_kernel(%arg0: memref<32x2x128xf32, #tpu.memory_space<vmem>>, %arg1: memref<32x128x8xf32, #tpu.memory_space<vmem>>, %arg2: memref<1x1x8xf32, #tpu.memory_space<vmem>>, %arg3: memref<32x8x64xf32, #tpu.memory_space<vmem>>, %arg4: memref<1x64xf32, #tpu.memory_space<vmem>>, %arg5: memref<2x64xf32, #tpu.memory_space<vmem>>) attributes {dimension_semantics = [], scalar_prefetch = 0 : i64, scratch_operands = 0 : i64, tpu.core_type = #tpu.core_type<tc>} {
    %c0 = arith.constant 0 : index
    %c0_0 = arith.constant 0 : index
    %c0_1 = arith.constant 0 : index
    %0 = vector.load %arg0[%c0, %c0_0, %c0_1] : memref<32x2x128xf32, #tpu.memory_space<vmem>>, vector<32x2x128xf32>
    %c0_2 = arith.constant 0 : index
    %c0_3 = arith.constant 0 : index
    %c0_4 = arith.constant 0 : index
    %1 = vector.load %arg1[%c0_2, %c0_3, %c0_4] : memref<32x128x8xf32, #tpu.memory_space<vmem>>, vector<32x128x8xf32>
    "tpu.trace_start"() <{level = 10 : i32, message = "sbk,skc->sbc"}> : () -> ()
    %cst = arith.constant dense<0.000000e+00> : vector<32x2x8xf32>
    %2 = tpu.matmul %0, %1, %cst {dimension_numbers = #tpu.dot_dimension_numbers<[2], [1], [1], [2], [0, 0, 0, 1, 1, 2], [0], [0]>} : vector<32x2x128xf32>, vector<32x128x8xf32>, vector<32x2x8xf32> -> vector<32x2x8xf32>
    "tpu.trace_stop"() : () -> ()
    %c0_5 = arith.constant 0 : index
    %c0_6 = arith.constant 0 : index
    %c0_7 = arith.constant 0 : index
    %3 = vector.load %arg2[%c0_5, %c0_6, %c0_7] : memref<1x1x8xf32, #tpu.memory_space<vmem>>, vector<1x1x8xf32>
    %4 = vector.broadcast %3 : vector<1x1x8xf32> to vector<32x2x8xf32>
    %5 = arith.addf %2, %4 : vector<32x2x8xf32>
    %cst_8 = arith.constant 0.000000e+00 : f32
    %6 = vector.broadcast %cst_8 : f32 to vector<32x2x8xf32>
    %7 = arith.maximumf %5, %6 : vector<32x2x8xf32>
    %c0_9 = arith.constant 0 : index
    %c0_10 = arith.constant 0 : index
    %c0_11 = arith.constant 0 : index
    %8 = vector.load %arg3[%c0_9, %c0_10, %c0_11] : memref<32x8x64xf32, #tpu.memory_space<vmem>>, vector<32x8x64xf32>
    "tpu.trace_start"() <{level = 10 : i32, message = "sbc,sco->sbo"}> : () -> ()
    %cst_12 = arith.constant dense<0.000000e+00> : vector<32x2x64xf32>
    %9 = tpu.matmul %7, %8, %cst_12 {dimension_numbers = #tpu.dot_dimension_numbers<[2], [1], [1], [2], [0, 0, 0, 1, 1, 2], [0], [0]>} : vector<32x2x8xf32>, vector<32x8x64xf32>, vector<32x2x64xf32> -> vector<32x2x64xf32>
    "tpu.trace_stop"() : () -> ()
    %cst_13 = arith.constant dense<0.000000e+00> : vector<2x64xf32>
    %10 = vector.multi_reduction <add>, %9, %cst_13 [0] : vector<32x2x64xf32> to vector<2x64xf32>
    %c0_14 = arith.constant 0 : index
    %c0_15 = arith.constant 0 : index
    %11 = vector.load %arg4[%c0_14, %c0_15] : memref<1x64xf32, #tpu.memory_space<vmem>>, vector<1x64xf32>
    %12 = vector.broadcast %11 : vector<1x64xf32> to vector<2x64xf32>
    %13 = arith.addf %10, %12 : vector<2x64xf32>
    %cst_16 = arith.constant 0.000000e+00 : f32
    %14 = vector.broadcast %cst_16 : f32 to vector<2x64xf32>
    %15 = arith.maximumf %13, %14 : vector<2x64xf32>
    %c0_17 = arith.constant 0 : index
    %c0_18 = arith.constant 0 : index
    %16 = vector.load %arg5[%c0_17, %c0_18] : memref<2x64xf32, #tpu.memory_space<vmem>>, vector<2x64xf32>
    tpu.vector_store %arg5[%c0_17, %c0_18], %15 {strides = array<i32>} : memref<2x64xf32, #tpu.memory_space<vmem>>, vector<2x64xf32>,
    return
  }
}

</mosaic_0001>

<bundles_post_ra>
// kernel: cnn3d1_forward.1
= control target key start
LH: loop header
LB: loop body
LE: loop exit
PB: predicated region body
PF: predicated region fallthrough
CT: control target
= control target key end

     0   :  { %v7248_v2 = vmov 0.0   ;;  %vm7249_vm0 = vmmov 0   ;;  %s9849_s0 = inlined_call_operand.vmem [shape: f32[32,2,128], index: 0, kind: input, shape index: {}]   ;;  %s9850_s1 = inlined_call_operand.vmem [shape: f32[32,128,8], index: 1, kind: input, shape index: {}]   ;;  %s9851_s2 = inlined_call_operand.vmem [shape: f32[1,1,8], index: 2, kind: input, shape index: {}]   ;;  %s9852_s3 = inlined_call_operand.vmem [shape: f32[32,8,64], index: 3, kind: input, shape index: {}]   ;;  %s9853_s4 = inlined_call_operand.vmem [shape: f32[1,64], index: 4, kind: input, shape index: {}]   ;;  %s9854_s5 = inlined_call_operand.hbm [shape: f32[2,64], index: 5, kind: output, shape index: {}]  }
   0x1   :  { %v68_v0 = vld [vmem:[%s9850_s1 + $0x78] sm:$0xff]  ;;  %5943 = vmatprep.subr.mxu0 %v7248_v2  ;;  %5978 = vmatprep.subr.mxu1 %v7248_v2  ;;  %v67_v3 = vld [vmem:[%s9850_s1 + $0x70] sm:$0xff]  ;;  %v66_v5 = vld [vmem:[%s9850_s1 + $0x68] sm:$0xff] }
   0x2   :  { %v84_v1 = vld [vmem:[%s9850_s1 + $0xf8] sm:$0xff]  ;;  %v83_v4 = vld [vmem:[%s9850_s1 + $0xf0] sm:$0xff]  ;;  %5944 = vmatpush3.msra.mxu0 %v68_v0  ;;  %v82_v6 = vld [vmem:[%s9850_s1 + $0xe8] sm:$0xff]  ;;  %5975 = vmatprep.mubr.msk.f32.mxu0 %vm7249_vm0, %v7248_v2 }
   0x3   :  { %5979 = vmatpush3.msra.mxu1 %v84_v1  ;;  %5945 = vmatprep.subr.mxu0 %v7248_v2  ;;  %v65_v7 = vld [vmem:[%s9850_s1 + $0x60] sm:$0xff]  ;;  %v64_v9 = vld [vmem:[%s9850_s1 + $0x58] sm:$0xff]  ;;  %v63_v11 = vld [vmem:[%s9850_s1 + $0x50] sm:$0xff] }
   0x4   :  { %5980 = vmatprep.subr.mxu1 %v7248_v2  ;;  %5946 = vmatpush3.msra.mxu0 %v67_v3  ;;  %v81_v8 = vld [vmem:[%s9850_s1 + $0xe0] sm:$0xff]  ;;  %v80_v10 = vld [vmem:[%s9850_s1 + $0xd8] sm:$0xff]  ;;  %v79_v12 = vld [vmem:[%s9850_s1 + $0xd0] sm:$0xff] }
   0x5   :  { %5981 = vmatpush3.msra.mxu1 %v83_v4  ;;  %5947 = vmatprep.subr.mxu0 %v7248_v2  ;;  %v62_v13 = vld [vmem:[%s9850_s1 + $0x48] sm:$0xff]  ;;  %v61_v15 = vld [vmem:[%s9850_s1 + $0x40] sm:$0xff]  ;;  %v60_v17 = vld [vmem:[%s9850_s1 + $0x38] sm:$0xff] }
   0x6   :  { %5982 = vmatprep.subr.mxu1 %v7248_v2  ;;  %5948 = vmatpush3.msra.mxu0 %v66_v5  ;;  %v78_v14 = vld [vmem:[%s9850_s1 + $0xc8] sm:$0xff]  ;;  %v77_v16 = vld [vmem:[%s9850_s1 + $0xc0] sm:$0xff]  ;;  %v76_v18 = vld [vmem:[%s9850_s1 + $0xb8] sm:$0xff] }
   0x7   :  { %5983 = vmatpush3.msra.mxu1 %v82_v6  ;;  %5949 = vmatprep.subr.mxu0 %v7248_v2  ;;  %v59_v19 = vld [vmem:[%s9850_s1 + $0x30] sm:$0xff]  ;;  %v58_v21 = vld [vmem:[%s9850_s1 + $0x28] sm:$0xff]  ;;  %v57_v23 = vld [vmem:[%s9850_s1 + $0x20] sm:$0xff] }
   0x8   :  { %5984 = vmatprep.subr.mxu1 %v7248_v2  ;;  %5950 = vmatpush3.msra.mxu0 %v65_v7  ;;  %v75_v20 = vld [vmem:[%s9850_s1 + $0xb0] sm:$0xff]  ;;  %v74_v22 = vld [vmem:[%s9850_s1 + $0xa8] sm:$0xff]  ;;  %v73_v24 = vld [vmem:[%s9850_s1 + $0xa0] sm:$0xff] }
   0x9   :  { %5985 = vmatpush3.msra.mxu1 %v81_v8  ;;  %5951 = vmatprep.subr.mxu0 %v7248_v2  ;;  %v56_v25 = vld [vmem:[%s9850_s1 + $0x18] sm:$0xff]  ;;  %v55_v27 = vld [vmem:[%s9850_s1 + $0x10] sm:$0xff]  ;;  %v54_v29 = vld [vmem:[%s9850_s1 + $0x8] sm:$0xff] }
   0xa   :  { %5986 = vmatprep.subr.mxu1 %v7248_v2  ;;  %5952 = vmatpush3.msra.mxu0 %v64_v9  ;;  %v72_v26 = vld [vmem:[%s9850_s1 + $0x98] sm:$0xff]  ;;  %v71_v28 = vld [vmem:[%s9850_s1 + $0x90] sm:$0xff]  ;;  %v70_v30 = vld [vmem:[%s9850_s1 + $0x88] sm:$0xff] }
   0xb   :  { %5987 = vmatpush3.msra.mxu1 %v80_v10  ;;  %5953 = vmatprep.subr.mxu0 %v7248_v2  ;;  %v53_v31 = vld [vmem:[%s9850_s1] sm:$0xff]  ;;  %v100_v35 = vld [vmem:[%s9850_s1 + $0x178] sm:$0xff]  ;;  %v99_v37 = vld [vmem:[%s9850_s1 + $0x170] sm:$0xff] }
   0xc   :  { %5988 = vmatprep.subr.mxu1 %v7248_v2  ;;  %5954 = vmatpush3.msra.mxu0 %v63_v11  ;;  %v69_v32 = vld [vmem:[%s9850_s1 + $0x80] sm:$0xff]  ;;  %v116_v36 = vld [vmem:[%s9850_s1 + $0x1f8] sm:$0xff]  ;;  %v115_v38 = vld [vmem:[%s9850_s1 + $0x1f0] sm:$0xff] }
   0xd   :  { %5989 = vmatpush3.msra.mxu1 %v79_v12  ;;  %5955 = vmatprep.subr.mxu0 %v7248_v2  ;;  %v21_v33 = vld [vmem:[%s9849_s0] sm:$0x3]  ;;  %v22_v34 = vld [vmem:[%s9849_s0 + $0x2] sm:$0x3]  ;;  %v98_v39 = vld [vmem:[%s9850_s1 + $0x168] sm:$0xff] }
   0xe   :  { %5990 = vmatprep.subr.mxu1 %v7248_v2  ;;  %5956 = vmatpush3.msra.mxu0 %v62_v13  ;;  %v114_v40 = vld [vmem:[%s9850_s1 + $0x1e8] sm:$0xff]  ;;  %v97_v41 = vld [vmem:[%s9850_s1 + $0x160] sm:$0xff]  ;;  %v96_v43 = vld [vmem:[%s9850_s1 + $0x158] sm:$0xff] }
   0xf   :  { %5991 = vmatpush3.msra.mxu1 %v78_v14  ;;  %5957 = vmatprep.subr.mxu0 %v7248_v2  ;;  %v113_v42 = vld [vmem:[%s9850_s1 + $0x1e0] sm:$0xff]  ;;  %v112_v44 = vld [vmem:[%s9850_s1 + $0x1d8] sm:$0xff]  ;;  %v95_v45 = vld [vmem:[%s9850_s1 + $0x150] sm:$0xff] }
  0x10   :  { %5992 = vmatprep.subr.mxu1 %v7248_v2  ;;  %5958 = vmatpush3.msra.mxu0 %v61_v15  ;;  %v111_v46 = vld [vmem:[%s9850_s1 + $0x1d0] sm:$0xff]  ;;  %v94_v47 = vld [vmem:[%s9850_s1 + $0x148] sm:$0xff]  ;;  %v93_v49 = vld [vmem:[%s9850_s1 + $0x140] sm:$0xff] }
  0x11   :  { %5993 = vmatpush3.msra.mxu1 %v77_v16  ;;  %5959 = vmatprep.subr.mxu0 %v7248_v2  ;;  %v110_v48 = vld [vmem:[%s9850_s1 + $0x1c8] sm:$0xff]  ;;  %v109_v50 = vld [vmem:[%s9850_s1 + $0x1c0] sm:$0xff]  ;;  %v92_v51 = vld [vmem:[%s9850_s1 + $0x138] sm:$0xff] }
  0x12   :  { %5994 = vmatprep.subr.mxu1 %v7248_v2  ;;  %5960 = vmatpush3.msra.mxu0 %v60_v17  ;;  %v108_v52 = vld [vmem:[%s9850_s1 + $0x1b8] sm:$0xff]  ;;  %v91_v53 = vld [vmem:[%s9850_s1 + $0x130] sm:$0xff]  ;;  %v90_v55 = vld [vmem:[%s9850_s1 + $0x128] sm:$0xff] }
  0x13   :  { %5995 = vmatpush3.msra.mxu1 %v76_v18  ;;  %5961 = vmatprep.subr.mxu0 %v7248_v2  ;;  %v107_v54 = vld [vmem:[%s9850_s1 + $0x1b0] sm:$0xff]  ;;  %v106_v56 = vld [vmem:[%s9850_s1 + $0x1a8] sm:$0xff]  ;;  %v89_v57 = vld [vmem:[%s9850_s1 + $0x120] sm:$0xff] }
  0x14   :  { %5996 = vmatprep.subr.mxu1 %v7248_v2  ;;  %5962 = vmatpush3.msra.mxu0 %v59_v19  ;;  %v105_v58 = vld [vmem:[%s9850_s1 + $0x1a0] sm:$0xff]  ;;  %v88_v59 = vld [vmem:[%s9850_s1 + $0x118] sm:$0xff]  ;;  %v87_v61 = vld [vmem:[%s9850_s1 + $0x110] sm:$0xff] }
  0x15   :  { %5997 = vmatpush3.msra.mxu1 %v75_v20  ;;  %5963 = vmatprep.subr.mxu0 %v7248_v2  ;;  %v104_v60 = vld [vmem:[%s9850_s1 + $0x198] sm:$0xff]  ;;  %v103_v62 = vld [vmem:[%s9850_s1 + $0x190] sm:$0xff]  ;;  %v86_v63 = vld [vmem:[%s9850_s1 + $0x108] sm:$0xff] }
  0x16   :  { %5998 = vmatprep.subr.mxu1 %v7248_v2  ;;  %5964 = vmatpush3.msra.mxu0 %v58_v21  ;;  %v102_v0 = vld [vmem:[%s9850_s1 + $0x188] sm:$0xff]  ;;  %v85_v1 = vld [vmem:[%s9850_s1 + $0x100] sm:$0xff] }
  0x17   :  { %5999 = vmatpush3.msra.mxu1 %v74_v22  ;;  %5965 = vmatprep.subr.mxu0 %v7248_v2  ;;  %v101_v3 = vld [vmem:[%s9850_s1 + $0x180] sm:$0xff] }
  0x18   :  { %6000 = vmatprep.subr.mxu1 %v7248_v2  ;;  %5966 = vmatpush3.msra.mxu0 %v57_v23  ;;  %v23_v4 = vld [vmem:[%s9849_s0 + $0x4] sm:$0x3] }
  0x19   :  { %6001 = vmatpush3.msra.mxu1 %v73_v24  ;;  %5967 = vmatprep.subr.mxu0 %v7248_v2 }
  0x1a   :  { %6002 = vmatprep.subr.mxu1 %v7248_v2  ;;  %5968 = vmatpush3.msra.mxu0 %v56_v25 }
  0x1b   :  { %6003 = vmatpush3.msra.mxu1 %v72_v26  ;;  %5969 = vmatprep.subr.mxu0 %v7248_v2 }
  0x1c   :  { %6004 = vmatprep.subr.mxu1 %v7248_v2  ;;  %5970 = vmatpush3.msra.mxu0 %v55_v27 }
  0x1d   :  { %6005 = vmatpush3.msra.mxu1 %v71_v28  ;;  %5971 = vmatprep.subr.mxu0 %v7248_v2 }
  0x1e   :  { %6006 = vmatprep.subr.mxu1 %v7248_v2  ;;  %5972 = vmatpush3.msra.mxu0 %v54_v29 }
  0x1f   :  { %6007 = vmatpush3.msra.mxu1 %v70_v30  ;;  %5973 = vmatprep.subr.mxu0 %v7248_v2 }
  0x20   :  { %6008 = vmatprep.subr.mxu1 %v7248_v2  ;;  %5974 = vmatpush3.msra.mxu0 %v53_v31 }
  0x21   :  { %6009 = vmatpush3.msra.mxu1 %v69_v32  ;;  %5976 = vmatmul.mubr.f32.vlgmr.msra.gmra.mxu0 %v21_v33 }
  0x22   :  { %6010 = vmatprep.mubr.msk.f32.mxu1 %vm7249_vm0, %v7248_v2  ;;  %6013 = vmatprep.subr.mxu0 %v7248_v2 }
  0x23   :  { %6048 = vmatprep.subr.mxu1 %v7248_v2  ;;  %6011 = vmatmul.mubr.f32.vlgmr.msra.gmra.mxu1 %v22_v34 }
  0x24   :  { %6014 = vmatpush3.msra.mxu0 %v100_v35  ;;  %6049 = vmatpush3.msra.mxu1 %v116_v36 }
  0x25   :  { %6015 = vmatprep.subr.mxu0 %v7248_v2  ;;  %6050 = vmatprep.subr.mxu1 %v7248_v2 }
  0x26   :  { %6016 = vmatpush3.msra.mxu0 %v99_v37  ;;  %6051 = vmatpush3.msra.mxu1 %v115_v38 }
  0x27   :  { %6017 = vmatprep.subr.mxu0 %v7248_v2  ;;  %6052 = vmatprep.subr.mxu1 %v7248_v2 }
  0x28   :  { %6018 = vmatpush3.msra.mxu0 %v98_v39  ;;  %6053 = vmatpush3.msra.mxu1 %v114_v40 }
  0x29   :  { %6019 = vmatprep.subr.mxu0 %v7248_v2  ;;  %6054 = vmatprep.subr.mxu1 %v7248_v2 }
  0x2a   :  { %6020 = vmatpush3.msra.mxu0 %v97_v41  ;;  %6055 = vmatpush3.msra.mxu1 %v113_v42 }
  0x2b   :  { %6021 = vmatprep.subr.mxu0 %v7248_v2  ;;  %6056 = vmatprep.subr.mxu1 %v7248_v2 }
  0x2c   :  { %6022 = vmatpush3.msra.mxu0 %v96_v43  ;;  %6057 = vmatpush3.msra.mxu1 %v112_v44 }
  0x2d   :  { %6023 = vmatprep.subr.mxu0 %v7248_v2  ;;  %6058 = vmatprep.subr.mxu1 %v7248_v2 }
  0x2e   :  { %6024 = vmatpush3.msra.mxu0 %v95_v45  ;;  %6059 = vmatpush3.msra.mxu1 %v111_v46 }
  0x2f   :  { %6025 = vmatprep.subr.mxu0 %v7248_v2  ;;  %6060 = vmatprep.subr.mxu1 %v7248_v2 }
  0x30   :  { %6026 = vmatpush3.msra.mxu0 %v94_v47  ;;  %6061 = vmatpush3.msra.mxu1 %v110_v48 }
  0x31   :  { %6027 = vmatprep.subr.mxu0 %v7248_v2  ;;  %6062 = vmatprep.subr.mxu1 %v7248_v2 }
  0x32   :  { %6028 = vmatpush3.msra.mxu0 %v93_v49  ;;  %6063 = vmatpush3.msra.mxu1 %v109_v50 }
  0x33   :  { %6029 = vmatprep.subr.mxu0 %v7248_v2  ;;  %6064 = vmatprep.subr.mxu1 %v7248_v2 }
  0x34   :  { %6030 = vmatpush3.msra.mxu0 %v92_v51  ;;  %6065 = vmatpush3.msra.mxu1 %v108_v52 }
  0x35   :  { %6031 = vmatprep.subr.mxu0 %v7248_v2  ;;  %6066 = vmatprep.subr.mxu1 %v7248_v2 }
  0x36   :  { %6032 = vmatpush3.msra.mxu0 %v91_v53  ;;  %6067 = vmatpush3.msra.mxu1 %v107_v54 }
  0x37   :  { %6033 = vmatprep.subr.mxu0 %v7248_v2  ;;  %6068 = vmatprep.subr.mxu1 %v7248_v2 }
  0x38   :  { %6034 = vmatpush3.msra.mxu0 %v90_v55  ;;  %6069 = vmatpush3.msra.mxu1 %v106_v56 }
  0x39   :  { %6035 = vmatprep.subr.mxu0 %v7248_v2  ;;  %6070 = vmatprep.subr.mxu1 %v7248_v2 }
  0x3a   :  { %6036 = vmatpush3.msra.mxu0 %v89_v57  ;;  %6071 = vmatpush3.msra.mxu1 %v105_v58 }
  0x3b   :  { %6037 = vmatprep.subr.mxu0 %v7248_v2  ;;  %6072 = vmatprep.subr.mxu1 %v7248_v2 }
  0x3c   :  { %6038 = vmatpush3.msra.mxu0 %v88_v59  ;;  %6073 = vmatpush3.msra.mxu1 %v104_v60 }
  0x3d   :  { %6039 = vmatprep.subr.mxu0 %v7248_v2  ;;  %6074 = vmatprep.subr.mxu1 %v7248_v2 }
  0x3e   :  { %6040 = vmatpush3.msra.mxu0 %v87_v61  ;;  %6075 = vmatpush3.msra.mxu1 %v103_v62 }
  0x3f   :  { %6041 = vmatprep.subr.mxu0 %v7248_v2  ;;  %6076 = vmatprep.subr.mxu1 %v7248_v2 }
  0x40   :  { %6042 = vmatpush3.msra.mxu0 %v86_v63  ;;  %6077 = vmatpush3.msra.mxu1 %v102_v0 }
  0x41   :  { %10 = vsyncpa [#allocation3], 0  ;;  %6043 = vmatprep.subr.mxu0 %v7248_v2  ;;  %6078 = vmatprep.subr.mxu1 %v7248_v2  ;;  %v24_v5 = vld [vmem:[%s9849_s0 + $0x6] sm:$0x3]  ;;  %v132_v6 = vld [vmem:[%s9850_s1 + $0x278] sm:$0xff]  ;;  %vm2876_vm1 = vcmask 64512  }
  0x42   :  { %6044 = vmatpush3.msra.mxu0 %v85_v1  ;;  %6045 = vmatprep.mubr.msk.f32.mxu0 %vm7249_vm0, %v7248_v2  ;;  %v148_v7 = vld [vmem:[%s9850_s1 + $0x2f8] sm:$0xff]  ;;  %v131_v8 = vld [vmem:[%s9850_s1 + $0x270] sm:$0xff]  ;;  %v130_v10 = vld [vmem:[%s9850_s1 + $0x268] sm:$0xff]  ;;  %vm5213_vm2 = vcmask 517120   ;;  %s7250_s14 = smov [#allocation2]  }
  0x43   :  { %6079 = vmatpush3.msra.mxu1 %v101_v3  ;;  %6046 = vmatmul.mubr.f32.vlgmr.msra.gmra.mxu0 %v23_v4  ;;  %v147_v9 = vld [vmem:[%s9850_s1 + $0x2f0] sm:$0xff]  ;;  %v146_v11 = vld [vmem:[%s9850_s1 + $0x2e8] sm:$0xff]  ;;  %v129_v12 = vld [vmem:[%s9850_s1 + $0x260] sm:$0xff]  ;;  %s5293_s15 = sshll.u32 %s7250_s14, 4  ;;  %s5294_s15 = int_to_ptr.vmem [resolvable:$true] %s5293_s15 }
  0x44   :  { %6080 = vmatprep.mubr.msk.f32.mxu1 %vm7249_vm0, %v7248_v2  ;;  %6083 = vmatprep.subr.mxu0 %v7248_v2  ;;  %v145_v13 = vld [vmem:[%s9850_s1 + $0x2e0] sm:$0xff]  ;;  %v128_v14 = vld [vmem:[%s9850_s1 + $0x258] sm:$0xff]  ;;  %v127_v16 = vld [vmem:[%s9850_s1 + $0x250] sm:$0xff]  ;;  %s7226_s16 = scalar_lea.vmem %s5294_s15, 32  ;;  %p7231_p1 = scmp.lt.s32.totalorder %s5294_s15, %s5294_s15 }
  0x45   :  { %6118 = vmatprep.subr.mxu1 %v7248_v2  ;;  %6081 = vmatmul.mubr.f32.vlgmr.msra.gmra.mxu1 %v24_v5  ;;  %v144_v15 = vld [vmem:[%s9850_s1 + $0x2d8] sm:$0xff]  ;;  %v143_v17 = vld [vmem:[%s9850_s1 + $0x2d0] sm:$0xff]  ;;  %v126_v18 = vld [vmem:[%s9850_s1 + $0x248] sm:$0xff]  ;;  %p7227_p0 = scmp.ne.s32.totalorder %s5294_s15, %s7226_s16  ;;  %p7232_p2 = scmp.lt.s32.totalorder %s7226_s16, %s7226_s16 }
  0x46   :  { %6084 = vmatpush3.msra.mxu0 %v132_v6  ;;  %6119 = vmatpush3.msra.mxu1 %v148_v7  ;;  %v142_v19 = vld [vmem:[%s9850_s1 + $0x2c8] sm:$0xff]  ;;  %v125_v20 = vld [vmem:[%s9850_s1 + $0x240] sm:$0xff]  ;;  %v124_v22 = vld [vmem:[%s9850_s1 + $0x238] sm:$0xff] }
  0x47   :  { %6085 = vmatprep.subr.mxu0 %v7248_v2  ;;  %6120 = vmatprep.subr.mxu1 %v7248_v2  ;;  %v141_v21 = vld [vmem:[%s9850_s1 + $0x2c0] sm:$0xff]  ;;  %v140_v23 = vld [vmem:[%s9850_s1 + $0x2b8] sm:$0xff]  ;;  %v123_v24 = vld [vmem:[%s9850_s1 + $0x230] sm:$0xff]  ;;  %p7233_p3 = por %p7232_p2, %p7231_p1 }
  0x48   :  { %6086 = vmatpush3.msra.mxu0 %v131_v8  ;;  %6121 = vmatpush3.msra.mxu1 %v147_v9  ;;  %v139_v25 = vld [vmem:[%s9850_s1 + $0x2b0] sm:$0xff]  ;;  %v122_v26 = vld [vmem:[%s9850_s1 + $0x228] sm:$0xff]  ;;  %v121_v28 = vld [vmem:[%s9850_s1 + $0x220] sm:$0xff] }
  0x49   :  { %6087 = vmatprep.subr.mxu0 %v7248_v2  ;;  %6122 = vmatprep.subr.mxu1 %v7248_v2  ;;  %v138_v27 = vld [vmem:[%s9850_s1 + $0x2a8] sm:$0xff]  ;;  %v137_v29 = vld [vmem:[%s9850_s1 + $0x2a0] sm:$0xff]  ;;  %v120_v30 = vld [vmem:[%s9850_s1 + $0x218] sm:$0xff]  ;;  %p7234_p4 = pnand %p7233_p3, %p7227_p0 }
  0x4a   :  { %6088 = vmatpush3.msra.mxu0 %v130_v10  ;;  %6123 = vmatpush3.msra.mxu1 %v146_v11  ;;  %v136_v31 = vld [vmem:[%s9850_s1 + $0x298] sm:$0xff]  ;;  %v119_v32 = vld [vmem:[%s9850_s1 + $0x210] sm:$0xff]  ;;  %v118_v34 = vld [vmem:[%s9850_s1 + $0x208] sm:$0xff] }
  0x4b   :  { %6089 = vmatprep.subr.mxu0 %v7248_v2  ;;  %6124 = vmatprep.subr.mxu1 %v7248_v2  ;;  %v135_v33 = vld [vmem:[%s9850_s1 + $0x290] sm:$0xff]  ;;  %v134_v35 = vld [vmem:[%s9850_s1 + $0x288] sm:$0xff]  ;;  %v117_v36 = vld [vmem:[%s9850_s1 + $0x200] sm:$0xff] }
  0x4c   :  { %6090 = vmatpush3.msra.mxu0 %v129_v12  ;;  %6125 = vmatpush3.msra.mxu1 %v145_v13  ;;  %v133_v37 = vld [vmem:[%s9850_s1 + $0x280] sm:$0xff]  ;;  %v25_v38 = vld [vmem:[%s9849_s0 + $0x8] sm:$0x3]  ;;  %v26_v39 = vld [vmem:[%s9849_s0 + $0xa] sm:$0x3] }
  0x4d   :  { %6091 = vmatprep.subr.mxu0 %v7248_v2  ;;  %6126 = vmatprep.subr.mxu1 %v7248_v2  ;;  %v164_v40 = vld [vmem:[%s9850_s1 + $0x378] sm:$0xff]  ;;  %v163_v42 = vld [vmem:[%s9850_s1 + $0x370] sm:$0xff]  ;;  %v162_v44 = vld [vmem:[%s9850_s1 + $0x368] sm:$0xff] }
  0x4e   :  { %6092 = vmatpush3.msra.mxu0 %v128_v14  ;;  %6127 = vmatpush3.msra.mxu1 %v144_v15  ;;  %v180_v41 = vld [vmem:[%s9850_s1 + $0x3f8] sm:$0xff]  ;;  %v179_v43 = vld [vmem:[%s9850_s1 + $0x3f0] sm:$0xff]  ;;  %v178_v45 = vld [vmem:[%s9850_s1 + $0x3e8] sm:$0xff] }
  0x4f   :  { %6093 = vmatprep.subr.mxu0 %v7248_v2  ;;  %6128 = vmatprep.subr.mxu1 %v7248_v2  ;;  %v161_v46 = vld [vmem:[%s9850_s1 + $0x360] sm:$0xff]  ;;  %v160_v48 = vld [vmem:[%s9850_s1 + $0x358] sm:$0xff]  ;;  %v159_v50 = vld [vmem:[%s9850_s1 + $0x350] sm:$0xff] }
  0x50   :  { %6094 = vmatpush3.msra.mxu0 %v127_v16  ;;  %6129 = vmatpush3.msra.mxu1 %v143_v17  ;;  %v177_v47 = vld [vmem:[%s9850_s1 + $0x3e0] sm:$0xff]  ;;  %v176_v49 = vld [vmem:[%s9850_s1 + $0x3d8] sm:$0xff]  ;;  %v175_v51 = vld [vmem:[%s9850_s1 + $0x3d0] sm:$0xff] }
  0x51   :  { %6095 = vmatprep.subr.mxu0 %v7248_v2  ;;  %6130 = vmatprep.subr.mxu1 %v7248_v2  ;;  %v158_v52 = vld [vmem:[%s9850_s1 + $0x348] sm:$0xff]  ;;  %v157_v54 = vld [vmem:[%s9850_s1 + $0x340] sm:$0xff]  ;;  %v156_v56 = vld [vmem:[%s9850_s1 + $0x338] sm:$0xff] }
  0x52   :  { %6096 = vmatpush3.msra.mxu0 %v126_v18  ;;  %6131 = vmatpush3.msra.mxu1 %v142_v19  ;;  %v174_v53 = vld [vmem:[%s9850_s1 + $0x3c8] sm:$0xff]  ;;  %v173_v55 = vld [vmem:[%s9850_s1 + $0x3c0] sm:$0xff]  ;;  %v172_v57 = vld [vmem:[%s9850_s1 + $0x3b8] sm:$0xff] }
  0x53   :  { %6097 = vmatprep.subr.mxu0 %v7248_v2  ;;  %6132 = vmatprep.subr.mxu1 %v7248_v2  ;;  %v155_v58 = vld [vmem:[%s9850_s1 + $0x330] sm:$0xff]  ;;  %v154_v60 = vld [vmem:[%s9850_s1 + $0x328] sm:$0xff]  ;;  %v153_v62 = vld [vmem:[%s9850_s1 + $0x320] sm:$0xff] }
  0x54   :  { %6098 = vmatpush3.msra.mxu0 %v125_v20  ;;  %6133 = vmatpush3.msra.mxu1 %v141_v21  ;;  %v171_v59 = vld [vmem:[%s9850_s1 + $0x3b0] sm:$0xff]  ;;  %v170_v61 = vld [vmem:[%s9850_s1 + $0x3a8] sm:$0xff]  ;;  %v169_v63 = vld [vmem:[%s9850_s1 + $0x3a0] sm:$0xff] }
  0x55   :  { %6099 = vmatprep.subr.mxu0 %v7248_v2  ;;  %6134 = vmatprep.subr.mxu1 %v7248_v2  ;;  %v152_v0 = vld [vmem:[%s9850_s1 + $0x318] sm:$0xff]  ;;  %v151_v3 = vld [vmem:[%s9850_s1 + $0x310] sm:$0xff]  ;;  %v150_v5 = vld [vmem:[%s9850_s1 + $0x308] sm:$0xff] }
  0x56   :  { %6100 = vmatpush3.msra.mxu0 %v124_v22  ;;  %6135 = vmatpush3.msra.mxu1 %v140_v23  ;;  %v168_v1 = vld [vmem:[%s9850_s1 + $0x398] sm:$0xff]  ;;  %v167_v4 = vld [vmem:[%s9850_s1 + $0x390] sm:$0xff]  ;;  %v166_v6 = vld [vmem:[%s9850_s1 + $0x388] sm:$0xff] }
  0x57   :  { %6101 = vmatprep.subr.mxu0 %v7248_v2  ;;  %6136 = vmatprep.subr.mxu1 %v7248_v2  ;;  %v149_v7 = vld [vmem:[%s9850_s1 + $0x300] sm:$0xff]  ;;  %v27_v9 = vld [vmem:[%s9849_s0 + $0xc] sm:$0x3]  ;;  %v28_v10 = vld [vmem:[%s9849_s0 + $0xe] sm:$0x3] }
  0x58   :  { %6102 = vmatpush3.msra.mxu0 %v123_v24  ;;  %6137 = vmatpush3.msra.mxu1 %v139_v25  ;;  %v165_v8 = vld [vmem:[%s9850_s1 + $0x380] sm:$0xff]  ;;  %v196_v11 = vld [vmem:[%s9850_s1 + $0x478] sm:$0xff]  ;;  %v195_v13 = vld [vmem:[%s9850_s1 + $0x470] sm:$0xff] }
  0x59   :  { %6103 = vmatprep.subr.mxu0 %v7248_v2  ;;  %6138 = vmatprep.subr.mxu1 %v7248_v2  ;;  %v212_v12 = vld [vmem:[%s9850_s1 + $0x4f8] sm:$0xff]  ;;  %v211_v14 = vld [vmem:[%s9850_s1 + $0x4f0] sm:$0xff]  ;;  %v194_v15 = vld [vmem:[%s9850_s1 + $0x468] sm:$0xff] }
  0x5a   :  { %6104 = vmatpush3.msra.mxu0 %v122_v26  ;;  %6139 = vmatpush3.msra.mxu1 %v138_v27  ;;  %v210_v16 = vld [vmem:[%s9850_s1 + $0x4e8] sm:$0xff]  ;;  %v193_v17 = vld [vmem:[%s9850_s1 + $0x460] sm:$0xff]  ;;  %v192_v19 = vld [vmem:[%s9850_s1 + $0x458] sm:$0xff] }
  0x5b   :  { %6105 = vmatprep.subr.mxu0 %v7248_v2  ;;  %6140 = vmatprep.subr.mxu1 %v7248_v2  ;;  %v209_v18 = vld [vmem:[%s9850_s1 + $0x4e0] sm:$0xff]  ;;  %v208_v20 = vld [vmem:[%s9850_s1 + $0x4d8] sm:$0xff]  ;;  %v191_v21 = vld [vmem:[%s9850_s1 + $0x450] sm:$0xff] }
  0x5c   :  { %6106 = vmatpush3.msra.mxu0 %v121_v28  ;;  %6141 = vmatpush3.msra.mxu1 %v137_v29  ;;  %v207_v22 = vld [vmem:[%s9850_s1 + $0x4d0] sm:$0xff]  ;;  %v190_v23 = vld [vmem:[%s9850_s1 + $0x448] sm:$0xff]  ;;  %v189_v25 = vld [vmem:[%s9850_s1 + $0x440] sm:$0xff] }
  0x5d   :  { %6107 = vmatprep.subr.mxu0 %v7248_v2  ;;  %6142 = vmatprep.subr.mxu1 %v7248_v2  ;;  %v206_v24 = vld [vmem:[%s9850_s1 + $0x4c8] sm:$0xff]  ;;  %v205_v26 = vld [vmem:[%s9850_s1 + $0x4c0] sm:$0xff]  ;;  %v188_v27 = vld [vmem:[%s9850_s1 + $0x438] sm:$0xff] }
  0x5e   :  { %6108 = vmatpush3.msra.mxu0 %v120_v30  ;;  %6143 = vmatpush3.msra.mxu1 %v136_v31  ;;  %v204_v28 = vld [vmem:[%s9850_s1 + $0x4b8] sm:$0xff]  ;;  %v187_v29 = vld [vmem:[%s9850_s1 + $0x430] sm:$0xff]  ;;  %v186_v31 = vld [vmem:[%s9850_s1 + $0x428] sm:$0xff] }
  0x5f   :  { %6109 = vmatprep.subr.mxu0 %v7248_v2  ;;  %6144 = vmatprep.subr.mxu1 %v7248_v2  ;;  %v203_v30 = vld [vmem:[%s9850_s1 + $0x4b0] sm:$0xff] }
  0x60   :  { %6110 = vmatpush3.msra.mxu0 %v119_v32  ;;  %6145 = vmatpush3.msra.mxu1 %v135_v33  ;;  %v202_v32 = vld [vmem:[%s9850_s1 + $0x4a8] sm:$0xff]  ;;  %v185_v33 = vld [vmem:[%s9850_s1 + $0x420] sm:$0xff] }
  0x61   :  { %6111 = vmatprep.subr.mxu0 %v7248_v2  ;;  %6146 = vmatprep.subr.mxu1 %v7248_v2 }
  0x62   :  { %6112 = vmatpush3.msra.mxu0 %v118_v34  ;;  %6147 = vmatpush3.msra.mxu1 %v134_v35  ;;  %v201_v34 = vld [vmem:[%s9850_s1 + $0x4a0] sm:$0xff]  ;;  %v184_v35 = vld [vmem:[%s9850_s1 + $0x418] sm:$0xff] }
  0x63   :  { %6113 = vmatprep.subr.mxu0 %v7248_v2  ;;  %6148 = vmatprep.subr.mxu1 %v7248_v2 }
  0x64   :  { %6114 = vmatpush3.msra.mxu0 %v117_v36  ;;  %6115 = vmatprep.mubr.msk.f32.mxu0 %vm7249_vm0, %v7248_v2  ;;  %v200_v36 = vld [vmem:[%s9850_s1 + $0x498] sm:$0xff] }
  0x65   :  { %6149 = vmatpush3.msra.mxu1 %v133_v37  ;;  %6116 = vmatmul.mubr.f32.vlgmr.msra.gmra.mxu0 %v25_v38  ;;  %v183_v37 = vld [vmem:[%s9850_s1 + $0x410] sm:$0xff] }
  0x66   :  { %6150 = vmatprep.mubr.msk.f32.mxu1 %vm7249_vm0, %v7248_v2  ;;  %6153 = vmatprep.subr.mxu0 %v7248_v2  ;;  %v199_v38 = vld [vmem:[%s9850_s1 + $0x490] sm:$0xff] }
  0x67   :  { %6188 = vmatprep.subr.mxu1 %v7248_v2  ;;  %6151 = vmatmul.mubr.f32.vlgmr.msra.gmra.mxu1 %v26_v39  ;;  %v182_v39 = vld [vmem:[%s9850_s1 + $0x408] sm:$0xff] }
  0x68   :  { %6154 = vmatpush3.msra.mxu0 %v164_v40  ;;  %6189 = vmatpush3.msra.mxu1 %v180_v41  ;;  %v198_v40 = vld [vmem:[%s9850_s1 + $0x488] sm:$0xff]  ;;  %v181_v41 = vld [vmem:[%s9850_s1 + $0x400] sm:$0xff] }
  0x69   :  { %6155 = vmatprep.subr.mxu0 %v7248_v2  ;;  %6190 = vmatprep.subr.mxu1 %v7248_v2 }
  0x6a   :  { %6156 = vmatpush3.msra.mxu0 %v163_v42  ;;  %6191 = vmatpush3.msra.mxu1 %v179_v43  ;;  %v197_v42 = vld [vmem:[%s9850_s1 + $0x480] sm:$0xff]  ;;  %v29_v43 = vld [vmem:[%s9849_s0 + $0x10] sm:$0x3] }
  0x6b   :  { %6157 = vmatprep.subr.mxu0 %v7248_v2  ;;  %6192 = vmatprep.subr.mxu1 %v7248_v2 }
  0x6c   :  { %6158 = vmatpush3.msra.mxu0 %v162_v44  ;;  %6193 = vmatpush3.msra.mxu1 %v178_v45  ;;  %v30_v44 = vld [vmem:[%s9849_s0 + $0x12] sm:$0x3]  ;;  %v228_v45 = vld [vmem:[%s9850_s1 + $0x578] sm:$0xff] }
  0x6d   :  { %6159 = vmatprep.subr.mxu0 %v7248_v2  ;;  %6194 = vmatprep.subr.mxu1 %v7248_v2 }
  0x6e   :  { %6160 = vmatpush3.msra.mxu0 %v161_v46  ;;  %6195 = vmatpush3.msra.mxu1 %v177_v47  ;;  %v244_v46 = vld [vmem:[%s9850_s1 + $0x5f8] sm:$0xff]  ;;  %v227_v47 = vld [vmem:[%s9850_s1 + $0x570] sm:$0xff] }
  0x6f   :  { %6161 = vmatprep.subr.mxu0 %v7248_v2  ;;  %6196 = vmatprep.subr.mxu1 %v7248_v2 }
  0x70   :  { %6162 = vmatpush3.msra.mxu0 %v160_v48  ;;  %6197 = vmatpush3.msra.mxu1 %v176_v49  ;;  %v243_v48 = vld [vmem:[%s9850_s1 + $0x5f0] sm:$0xff]  ;;  %v226_v49 = vld [vmem:[%s9850_s1 + $0x568] sm:$0xff] }
  0x71   :  { %6163 = vmatprep.subr.mxu0 %v7248_v2  ;;  %6198 = vmatprep.subr.mxu1 %v7248_v2 }
  0x72   :  { %6164 = vmatpush3.msra.mxu0 %v159_v50  ;;  %6199 = vmatpush3.msra.mxu1 %v175_v51  ;;  %v242_v50 = vld [vmem:[%s9850_s1 + $0x5e8] sm:$0xff]  ;;  %v225_v51 = vld [vmem:[%s9850_s1 + $0x560] sm:$0xff] }
  0x73   :  { %6165 = vmatprep.subr.mxu0 %v7248_v2  ;;  %6200 = vmatprep.subr.mxu1 %v7248_v2 }
  0x74   :  { %6166 = vmatpush3.msra.mxu0 %v158_v52  ;;  %6201 = vmatpush3.msra.mxu1 %v174_v53  ;;  %v241_v52 = vld [vmem:[%s9850_s1 + $0x5e0] sm:$0xff]  ;;  %v224_v53 = vld [vmem:[%s9850_s1 + $0x558] sm:$0xff] }
  0x75   :  { %6167 = vmatprep.subr.mxu0 %v7248_v2  ;;  %6202 = vmatprep.subr.mxu1 %v7248_v2 }
  0x76   :  { %6168 = vmatpush3.msra.mxu0 %v157_v54  ;;  %6203 = vmatpush3.msra.mxu1 %v173_v55  ;;  %v240_v54 = vld [vmem:[%s9850_s1 + $0x5d8] sm:$0xff]  ;;  %v223_v55 = vld [vmem:[%s9850_s1 + $0x550] sm:$0xff] }
  0x77   :  { %6169 = vmatprep.subr.mxu0 %v7248_v2  ;;  %6204 = vmatprep.subr.mxu1 %v7248_v2 }
  0x78   :  { %6170 = vmatpush3.msra.mxu0 %v156_v56  ;;  %6205 = vmatpush3.msra.mxu1 %v172_v57  ;;  %v239_v56 = vld [vmem:[%s9850_s1 + $0x5d0] sm:$0xff]  ;;  %v222_v57 = vld [vmem:[%s9850_s1 + $0x548] sm:$0xff] }
  0x79   :  { %6171 = vmatprep.subr.mxu0 %v7248_v2  ;;  %6206 = vmatprep.subr.mxu1 %v7248_v2 }
  0x7a   :  { %6172 = vmatpush3.msra.mxu0 %v155_v58  ;;  %6207 = vmatpush3.msra.mxu1 %v171_v59  ;;  %v238_v58 = vld [vmem:[%s9850_s1 + $0x5c8] sm:$0xff]  ;;  %v221_v59 = vld [vmem:[%s9850_s1 + $0x540] sm:$0xff] }
  0x7b   :  { %6173 = vmatprep.subr.mxu0 %v7248_v2  ;;  %6208 = vmatprep.subr.mxu1 %v7248_v2 }
  0x7c   :  { %6174 = vmatpush3.msra.mxu0 %v154_v60  ;;  %6209 = vmatpush3.msra.mxu1 %v170_v61  ;;  %v237_v60 = vld [vmem:[%s9850_s1 + $0x5c0] sm:$0xff]  ;;  %v220_v61 = vld [vmem:[%s9850_s1 + $0x538] sm:$0xff] }
  0x7d   :  { %6175 = vmatprep.subr.mxu0 %v7248_v2  ;;  %6210 = vmatprep.subr.mxu1 %v7248_v2 }
  0x7e   :  { %6176 = vmatpush3.msra.mxu0 %v153_v62  ;;  %6211 = vmatpush3.msra.mxu1 %v169_v63  ;;  %v236_v62 = vld [vmem:[%s9850_s1 + $0x5b8] sm:$0xff]  ;;  %v219_v63 = vld [vmem:[%s9850_s1 + $0x530] sm:$0xff] }
  0x7f   :  { %6177 = vmatprep.subr.mxu0 %v7248_v2  ;;  %6212 = vmatprep.subr.mxu1 %v7248_v2 }
  0x80   :  { %6178 = vmatpush3.msra.mxu0 %v152_v0  ;;  %6213 = vmatpush3.msra.mxu1 %v168_v1  ;;  %v235_v0 = vld [vmem:[%s9850_s1 + $0x5b0] sm:$0xff]  ;;  %v218_v1 = vld [vmem:[%s9850_s1 + $0x528] sm:$0xff] }
  0x81   :  { %6179 = vmatprep.subr.mxu0 %v7248_v2  ;;  %6214 = vmatprep.subr.mxu1 %v7248_v2 }
  0x82   :  { %6180 = vmatpush3.msra.mxu0 %v151_v3  ;;  %6215 = vmatpush3.msra.mxu1 %v167_v4  ;;  %v234_v3 = vld [vmem:[%s9850_s1 + $0x5a8] sm:$0xff]  ;;  %v217_v4 = vld [vmem:[%s9850_s1 + $0x520] sm:$0xff] }
  0x83   :  { %6181 = vmatprep.subr.mxu0 %v7248_v2  ;;  %6216 = vmatprep.subr.mxu1 %v7248_v2 }
  0x84   :  { %6182 = vmatpush3.msra.mxu0 %v150_v5  ;;  %6217 = vmatpush3.msra.mxu1 %v166_v6  ;;  %v233_v5 = vld [vmem:[%s9850_s1 + $0x5a0] sm:$0xff]  ;;  %v216_v6 = vld [vmem:[%s9850_s1 + $0x518] sm:$0xff] }
  0x85   :  { %6183 = vmatprep.subr.mxu0 %v7248_v2  ;;  %6218 = vmatprep.subr.mxu1 %v7248_v2 }
  0x86   :  { %6184 = vmatpush3.msra.mxu0 %v149_v7  ;;  %6185 = vmatprep.mubr.msk.f32.mxu0 %vm7249_vm0, %v7248_v2  ;;  %v232_v7 = vld [vmem:[%s9850_s1 + $0x598] sm:$0xff] }
  0x87   :  { %6219 = vmatpush3.msra.mxu1 %v165_v8  ;;  %6186 = vmatmul.mubr.f32.vlgmr.msra.gmra.mxu0 %v27_v9  ;;  %v215_v8 = vld [vmem:[%s9850_s1 + $0x510] sm:$0xff] }
  0x88   :  { %6220 = vmatprep.mubr.msk.f32.mxu1 %vm7249_vm0, %v7248_v2  ;;  %6223 = vmatprep.subr.mxu0 %v7248_v2  ;;  %v231_v9 = vld [vmem:[%s9850_s1 + $0x590] sm:$0xff] }
  0x89   :  { %6258 = vmatprep.subr.mxu1 %v7248_v2  ;;  %6221 = vmatmul.mubr.f32.vlgmr.msra.gmra.mxu1 %v28_v10  ;;  %v214_v10 = vld [vmem:[%s9850_s1 + $0x508] sm:$0xff] }
  0x8a   :  { %6224 = vmatpush3.msra.mxu0 %v196_v11  ;;  %6259 = vmatpush3.msra.mxu1 %v212_v12  ;;  %v230_v11 = vld [vmem:[%s9850_s1 + $0x588] sm:$0xff]  ;;  %v213_v12 = vld [vmem:[%s9850_s1 + $0x500] sm:$0xff] }
  0x8b   :  { %6225 = vmatprep.subr.mxu0 %v7248_v2  ;;  %6260 = vmatprep.subr.mxu1 %v7248_v2 }
  0x8c   :  { %6226 = vmatpush3.msra.mxu0 %v195_v13  ;;  %6261 = vmatpush3.msra.mxu1 %v211_v14  ;;  %v229_v13 = vld [vmem:[%s9850_s1 + $0x580] sm:$0xff]  ;;  %v31_v14 = vld [vmem:[%s9849_s0 + $0x14] sm:$0x3] }
  0x8d   :  { %6227 = vmatprep.subr.mxu0 %v7248_v2  ;;  %6262 = vmatprep.subr.mxu1 %v7248_v2 }
  0x8e   :  { %6228 = vmatpush3.msra.mxu0 %v194_v15  ;;  %6263 = vmatpush3.msra.mxu1 %v210_v16  ;;  %v32_v15 = vld [vmem:[%s9849_s0 + $0x16] sm:$0x3]  ;;  %v260_v16 = vld [vmem:[%s9850_s1 + $0x678] sm:$0xff] }
  0x8f   :  { %6229 = vmatprep.subr.mxu0 %v7248_v2  ;;  %6264 = vmatprep.subr.mxu1 %v7248_v2 }
  0x90   :  { %6230 = vmatpush3.msra.mxu0 %v193_v17  ;;  %6265 = vmatpush3.msra.mxu1 %v209_v18  ;;  %v276_v17 = vld [vmem:[%s9850_s1 + $0x6f8] sm:$0xff]  ;;  %v259_v18 = vld [vmem:[%s9850_s1 + $0x670] sm:$0xff] }
  0x91   :  { %6231 = vmatprep.subr.mxu0 %v7248_v2  ;;  %6266 = vmatprep.subr.mxu1 %v7248_v2 }
  0x92   :  { %6232 = vmatpush3.msra.mxu0 %v192_v19  ;;  %6267 = vmatpush3.msra.mxu1 %v208_v20  ;;  %v275_v19 = vld [vmem:[%s9850_s1 + $0x6f0] sm:$0xff]  ;;  %v258_v20 = vld [vmem:[%s9850_s1 + $0x668] sm:$0xff] }
  0x93   :  { %6233 = vmatprep.subr.mxu0 %v7248_v2  ;;  %6268 = vmatprep.subr.mxu1 %v7248_v2 }
  0x94   :  { %6234 = vmatpush3.msra.mxu0 %v191_v21  ;;  %6269 = vmatpush3.msra.mxu1 %v207_v22  ;;  %v274_v21 = vld [vmem:[%s9850_s1 + $0x6e8] sm:$0xff]  ;;  %v257_v22 = vld [vmem:[%s9850_s1 + $0x660] sm:$0xff] }
  0x95   :  { %6235 = vmatprep.subr.mxu0 %v7248_v2  ;;  %6270 = vmatprep.subr.mxu1 %v7248_v2 }
  0x96   :  { %6236 = vmatpush3.msra.mxu0 %v190_v23  ;;  %6271 = vmatpush3.msra.mxu1 %v206_v24  ;;  %v273_v23 = vld [vmem:[%s9850_s1 + $0x6e0] sm:$0xff]  ;;  %v256_v24 = vld [vmem:[%s9850_s1 + $0x658] sm:$0xff] }
  0x97   :  { %6237 = vmatprep.subr.mxu0 %v7248_v2  ;;  %6272 = vmatprep.subr.mxu1 %v7248_v2 }
  0x98   :  { %6238 = vmatpush3.msra.mxu0 %v189_v25  ;;  %6273 = vmatpush3.msra.mxu1 %v205_v26  ;;  %v272_v25 = vld [vmem:[%s9850_s1 + $0x6d8] sm:$0xff]  ;;  %v255_v26 = vld [vmem:[%s9850_s1 + $0x650] sm:$0xff] }
  0x99   :  { %6239 = vmatprep.subr.mxu0 %v7248_v2  ;;  %6274 = vmatprep.subr.mxu1 %v7248_v2 }
  0x9a   :  { %6240 = vmatpush3.msra.mxu0 %v188_v27  ;;  %6275 = vmatpush3.msra.mxu1 %v204_v28  ;;  %v271_v27 = vld [vmem:[%s9850_s1 + $0x6d0] sm:$0xff]  ;;  %v254_v28 = vld [vmem:[%s9850_s1 + $0x648] sm:$0xff] }
  0x9b   :  { %6241 = vmatprep.subr.mxu0 %v7248_v2  ;;  %6276 = vmatprep.subr.mxu1 %v7248_v2 }
  0x9c   :  { %6242 = vmatpush3.msra.mxu0 %v187_v29  ;;  %6277 = vmatpush3.msra.mxu1 %v203_v30  ;;  %v270_v29 = vld [vmem:[%s9850_s1 + $0x6c8] sm:$0xff]  ;;  %v253_v30 = vld [vmem:[%s9850_s1 + $0x640] sm:$0xff] }
  0x9d   :  { %6243 = vmatprep.subr.mxu0 %v7248_v2  ;;  %6278 = vmatprep.subr.mxu1 %v7248_v2 }
  0x9e   :  { %6244 = vmatpush3.msra.mxu0 %v186_v31  ;;  %6279 = vmatpush3.msra.mxu1 %v202_v32  ;;  %v269_v31 = vld [vmem:[%s9850_s1 + $0x6c0] sm:$0xff]  ;;  %v252_v32 = vld [vmem:[%s9850_s1 + $0x638] sm:$0xff] }
  0x9f   :  { %6245 = vmatprep.subr.mxu0 %v7248_v2  ;;  %6280 = vmatprep.subr.mxu1 %v7248_v2 }
  0xa0   :  { %6246 = vmatpush3.msra.mxu0 %v185_v33  ;;  %6281 = vmatpush3.msra.mxu1 %v201_v34  ;;  %v268_v33 = vld [vmem:[%s9850_s1 + $0x6b8] sm:$0xff]  ;;  %v251_v34 = vld [vmem:[%s9850_s1 + $0x630] sm:$0xff] }
  0xa1   :  { %6247 = vmatprep.subr.mxu0 %v7248_v2  ;;  %6282 = vmatprep.subr.mxu1 %v7248_v2 }
  0xa2   :  { %6248 = vmatpush3.msra.mxu0 %v184_v35  ;;  %6283 = vmatpush3.msra.mxu1 %v200_v36  ;;  %v267_v35 = vld [vmem:[%s9850_s1 + $0x6b0] sm:$0xff]  ;;  %v250_v36 = vld [vmem:[%s9850_s1 + $0x628] sm:$0xff] }
  0xa3   :  { %6249 = vmatprep.subr.mxu0 %v7248_v2  ;;  %6284 = vmatprep.subr.mxu1 %v7248_v2 }
  0xa4   :  { %6250 = vmatpush3.msra.mxu0 %v183_v37  ;;  %6285 = vmatpush3.msra.mxu1 %v199_v38  ;;  %v266_v37 = vld [vmem:[%s9850_s1 + $0x6a8] sm:$0xff]  ;;  %v249_v38 = vld [vmem:[%s9850_s1 + $0x620] sm:$0xff] }
  0xa5   :  { %6251 = vmatprep.subr.mxu0 %v7248_v2  ;;  %6286 = vmatprep.subr.mxu1 %v7248_v2 }
  0xa6   :  { %6252 = vmatpush3.msra.mxu0 %v182_v39  ;;  %6287 = vmatpush3.msra.mxu1 %v198_v40  ;;  %v265_v39 = vld [vmem:[%s9850_s1 + $0x6a0] sm:$0xff] }
  0xa7   :  { %6253 = vmatprep.subr.mxu0 %v7248_v2  ;;  %6288 = vmatprep.subr.mxu1 %v7248_v2 }
  0xa8   :  { %6254 = vmatpush3.msra.mxu0 %v181_v41  ;;  %6255 = vmatprep.mubr.msk.f32.mxu0 %vm7249_vm0, %v7248_v2  ;;  %v248_v41 = vld [vmem:[%s9850_s1 + $0x618] sm:$0xff] }
  0xa9   :  { %6289 = vmatpush3.msra.mxu1 %v197_v42  ;;  %6256 = vmatmul.mubr.f32.vlgmr.msra.gmra.mxu0 %v29_v43  ;;  %v264_v42 = vld [vmem:[%s9850_s1 + $0x698] sm:$0xff] }
  0xaa   :  { %6290 = vmatprep.mubr.msk.f32.mxu1 %vm7249_vm0, %v7248_v2  ;;  %6293 = vmatprep.subr.mxu0 %v7248_v2 }
  0xab   :  { %6328 = vmatprep.subr.mxu1 %v7248_v2  ;;  %6291 = vmatmul.mubr.f32.vlgmr.msra.gmra.mxu1 %v30_v44 }
  0xac   :  { %6294 = vmatpush3.msra.mxu0 %v228_v45  ;;  %6329 = vmatpush3.msra.mxu1 %v244_v46  ;;  %v247_v45 = vld [vmem:[%s9850_s1 + $0x610] sm:$0xff] }
  0xad   :  { %6295 = vmatprep.subr.mxu0 %v7248_v2  ;;  %6330 = vmatprep.subr.mxu1 %v7248_v2  ;;  %v263_v46 = vld [vmem:[%s9850_s1 + $0x690] sm:$0xff] }
  0xae   :  { %6296 = vmatpush3.msra.mxu0 %v227_v47  ;;  %6331 = vmatpush3.msra.mxu1 %v243_v48  ;;  %v246_v48 = vld [vmem:[%s9850_s1 + $0x608] sm:$0xff] }
  0xaf   :  { %6297 = vmatprep.subr.mxu0 %v7248_v2  ;;  %6332 = vmatprep.subr.mxu1 %v7248_v2 }
  0xb0   :  { %6298 = vmatpush3.msra.mxu0 %v226_v49  ;;  %6333 = vmatpush3.msra.mxu1 %v242_v50  ;;  %v262_v49 = vld [vmem:[%s9850_s1 + $0x688] sm:$0xff]  ;;  %v245_v50 = vld [vmem:[%s9850_s1 + $0x600] sm:$0xff] }
  0xb1   :  { %6299 = vmatprep.subr.mxu0 %v7248_v2  ;;  %6334 = vmatprep.subr.mxu1 %v7248_v2 }
  0xb2   :  { %6300 = vmatpush3.msra.mxu0 %v225_v51  ;;  %6335 = vmatpush3.msra.mxu1 %v241_v52  ;;  %v261_v51 = vld [vmem:[%s9850_s1 + $0x680] sm:$0xff]  ;;  %v33_v52 = vld [vmem:[%s9849_s0 + $0x18] sm:$0x3] }
  0xb3   :  { %6301 = vmatprep.subr.mxu0 %v7248_v2  ;;  %6336 = vmatprep.subr.mxu1 %v7248_v2 }
  0xb4   :  { %6302 = vmatpush3.msra.mxu0 %v224_v53  ;;  %6337 = vmatpush3.msra.mxu1 %v240_v54  ;;  %v34_v53 = vld [vmem:[%s9849_s0 + $0x1a] sm:$0x3] }
  0xb5   :  { %6303 = vmatprep.subr.mxu0 %v7248_v2  ;;  %6338 = vmatprep.subr.mxu1 %v7248_v2  ;;  %v292_v54 = vld [vmem:[%s9850_s1 + $0x778] sm:$0xff] }
  0xb6   :  { %6304 = vmatpush3.msra.mxu0 %v223_v55  ;;  %6339 = vmatpush3.msra.mxu1 %v239_v56  ;;  %v308_v55 = vld [vmem:[%s9850_s1 + $0x7f8] sm:$0xff]  ;;  %v291_v56 = vld [vmem:[%s9850_s1 + $0x770] sm:$0xff] }
  0xb7   :  { %6305 = vmatprep.subr.mxu0 %v7248_v2  ;;  %6340 = vmatprep.subr.mxu1 %v7248_v2 }
  0xb8   :  { %6306 = vmatpush3.msra.mxu0 %v222_v57  ;;  %6341 = vmatpush3.msra.mxu1 %v238_v58  ;;  %v307_v57 = vld [vmem:[%s9850_s1 + $0x7f0] sm:$0xff]  ;;  %v290_v58 = vld [vmem:[%s9850_s1 + $0x768] sm:$0xff] }
  0xb9   :  { %6307 = vmatprep.subr.mxu0 %v7248_v2  ;;  %6342 = vmatprep.subr.mxu1 %v7248_v2 }
  0xba   :  { %6308 = vmatpush3.msra.mxu0 %v221_v59  ;;  %6343 = vmatpush3.msra.mxu1 %v237_v60  ;;  %v306_v59 = vld [vmem:[%s9850_s1 + $0x7e8] sm:$0xff]  ;;  %v289_v60 = vld [vmem:[%s9850_s1 + $0x760] sm:$0xff] }
  0xbb   :  { %6309 = vmatprep.subr.mxu0 %v7248_v2  ;;  %6344 = vmatprep.subr.mxu1 %v7248_v2 }
  0xbc   :  { %6310 = vmatpush3.msra.mxu0 %v220_v61  ;;  %6345 = vmatpush3.msra.mxu1 %v236_v62  ;;  %v305_v61 = vld [vmem:[%s9850_s1 + $0x7e0] sm:$0xff]  ;;  %v288_v62 = vld [vmem:[%s9850_s1 + $0x758] sm:$0xff] }
  0xbd   :  { %6311 = vmatprep.subr.mxu0 %v7248_v2  ;;  %6346 = vmatprep.subr.mxu1 %v7248_v2 }
  0xbe   :  { %6312 = vmatpush3.msra.mxu0 %v219_v63  ;;  %6347 = vmatpush3.msra.mxu1 %v235_v0  ;;  %v304_v63 = vld [vmem:[%s9850_s1 + $0x7d8] sm:$0xff]  ;;  %v287_v0 = vld [vmem:[%s9850_s1 + $0x750] sm:$0xff] }
  0xbf   :  { %6313 = vmatprep.subr.mxu0 %v7248_v2  ;;  %6348 = vmatprep.subr.mxu1 %v7248_v2 }
  0xc0   :  { %6314 = vmatpush3.msra.mxu0 %v218_v1  ;;  %6349 = vmatpush3.msra.mxu1 %v234_v3  ;;  %v303_v1 = vld [vmem:[%s9850_s1 + $0x7d0] sm:$0xff]  ;;  %v286_v3 = vld [vmem:[%s9850_s1 + $0x748] sm:$0xff] }
  0xc1   :  { %6315 = vmatprep.subr.mxu0 %v7248_v2  ;;  %6350 = vmatprep.subr.mxu1 %v7248_v2 }
  0xc2   :  { %6316 = vmatpush3.msra.mxu0 %v217_v4  ;;  %6351 = vmatpush3.msra.mxu1 %v233_v5  ;;  %v302_v4 = vld [vmem:[%s9850_s1 + $0x7c8] sm:$0xff]  ;;  %v285_v5 = vld [vmem:[%s9850_s1 + $0x740] sm:$0xff] }
  0xc3   :  { %6317 = vmatprep.subr.mxu0 %v7248_v2  ;;  %6352 = vmatprep.subr.mxu1 %v7248_v2 }
  0xc4   :  { %6318 = vmatpush3.msra.mxu0 %v216_v6  ;;  %6353 = vmatpush3.msra.mxu1 %v232_v7  ;;  %v301_v6 = vld [vmem:[%s9850_s1 + $0x7c0] sm:$0xff]  ;;  %v284_v7 = vld [vmem:[%s9850_s1 + $0x738] sm:$0xff] }
  0xc5   :  { %6319 = vmatprep.subr.mxu0 %v7248_v2  ;;  %6354 = vmatprep.subr.mxu1 %v7248_v2 }
  0xc6   :  { %6320 = vmatpush3.msra.mxu0 %v215_v8  ;;  %6355 = vmatpush3.msra.mxu1 %v231_v9  ;;  %v300_v8 = vld [vmem:[%s9850_s1 + $0x7b8] sm:$0xff]  ;;  %v283_v9 = vld [vmem:[%s9850_s1 + $0x730] sm:$0xff] }
  0xc7   :  { %6321 = vmatprep.subr.mxu0 %v7248_v2  ;;  %6356 = vmatprep.subr.mxu1 %v7248_v2 }
  0xc8   :  { %6322 = vmatpush3.msra.mxu0 %v214_v10  ;;  %6357 = vmatpush3.msra.mxu1 %v230_v11  ;;  %v299_v10 = vld [vmem:[%s9850_s1 + $0x7b0] sm:$0xff]  ;;  %v282_v11 = vld [vmem:[%s9850_s1 + $0x728] sm:$0xff] }
  0xc9   :  { %6323 = vmatprep.subr.mxu0 %v7248_v2  ;;  %6358 = vmatprep.subr.mxu1 %v7248_v2 }
  0xca   :  { %6324 = vmatpush3.msra.mxu0 %v213_v12  ;;  %6325 = vmatprep.mubr.msk.f32.mxu0 %vm7249_vm0, %v7248_v2  ;;  %v298_v12 = vld [vmem:[%s9850_s1 + $0x7a8] sm:$0xff] }
  0xcb   :  { %6359 = vmatpush3.msra.mxu1 %v229_v13  ;;  %6326 = vmatmul.mubr.f32.vlgmr.msra.gmra.mxu0 %v31_v14  ;;  %v281_v13 = vld [vmem:[%s9850_s1 + $0x720] sm:$0xff] }
  0xcc   :  { %6360 = vmatprep.mubr.msk.f32.mxu1 %vm7249_vm0, %v7248_v2  ;;  %6363 = vmatprep.subr.mxu0 %v7248_v2  ;;  %v297_v14 = vld [vmem:[%s9850_s1 + $0x7a0] sm:$0xff] }
  0xcd   :  { %6398 = vmatprep.subr.mxu1 %v7248_v2  ;;  %6361 = vmatmul.mubr.f32.vlgmr.msra.gmra.mxu1 %v32_v15 }
  0xce   :  { %6364 = vmatpush3.msra.mxu0 %v260_v16  ;;  %6399 = vmatpush3.msra.mxu1 %v276_v17  ;;  %v280_v16 = vld [vmem:[%s9850_s1 + $0x718] sm:$0xff] }
  0xcf   :  { %6365 = vmatprep.subr.mxu0 %v7248_v2  ;;  %6400 = vmatprep.subr.mxu1 %v7248_v2  ;;  %v296_v17 = vld [vmem:[%s9850_s1 + $0x798] sm:$0xff] }
  0xd0   :  { %6366 = vmatpush3.msra.mxu0 %v259_v18  ;;  %6401 = vmatpush3.msra.mxu1 %v275_v19 }
  0xd1   :  { %6367 = vmatprep.subr.mxu0 %v7248_v2  ;;  %6402 = vmatprep.subr.mxu1 %v7248_v2 }
  0xd2   :  { %6368 = vmatpush3.msra.mxu0 %v258_v20  ;;  %6403 = vmatpush3.msra.mxu1 %v274_v21  ;;  %v279_v20 = vld [vmem:[%s9850_s1 + $0x710] sm:$0xff] }
  0xd3   :  { %6369 = vmatprep.subr.mxu0 %v7248_v2  ;;  %6404 = vmatprep.subr.mxu1 %v7248_v2  ;;  %v295_v21 = vld [vmem:[%s9850_s1 + $0x790] sm:$0xff] }
  0xd4   :  { %6370 = vmatpush3.msra.mxu0 %v257_v22  ;;  %6405 = vmatpush3.msra.mxu1 %v273_v23  ;;  %v278_v23 = vld [vmem:[%s9850_s1 + $0x708] sm:$0xff] }
  0xd5   :  { %6371 = vmatprep.subr.mxu0 %v7248_v2  ;;  %6406 = vmatprep.subr.mxu1 %v7248_v2 }
  0xd6   :  { %6372 = vmatpush3.msra.mxu0 %v256_v24  ;;  %6407 = vmatpush3.msra.mxu1 %v272_v25  ;;  %v294_v24 = vld [vmem:[%s9850_s1 + $0x788] sm:$0xff]  ;;  %v277_v25 = vld [vmem:[%s9850_s1 + $0x700] sm:$0xff] }
  0xd7   :  { %6373 = vmatprep.subr.mxu0 %v7248_v2  ;;  %6408 = vmatprep.subr.mxu1 %v7248_v2 }
  0xd8   :  { %6374 = vmatpush3.msra.mxu0 %v255_v26  ;;  %6409 = vmatpush3.msra.mxu1 %v271_v27  ;;  %v293_v26 = vld [vmem:[%s9850_s1 + $0x780] sm:$0xff]  ;;  %v35_v27 = vld [vmem:[%s9849_s0 + $0x1c] sm:$0x3] }
  0xd9   :  { %6375 = vmatprep.subr.mxu0 %v7248_v2  ;;  %6410 = vmatprep.subr.mxu1 %v7248_v2 }
  0xda   :  { %6376 = vmatpush3.msra.mxu0 %v254_v28  ;;  %6411 = vmatpush3.msra.mxu1 %v270_v29  ;;  %v36_v28 = vld [vmem:[%s9849_s0 + $0x1e] sm:$0x3] }
  0xdb   :  { %6377 = vmatprep.subr.mxu0 %v7248_v2  ;;  %6412 = vmatprep.subr.mxu1 %v7248_v2  ;;  %v324_v29 = vld [vmem:[%s9850_s1 + $0x878] sm:$0xff] }
  0xdc   :  { %6378 = vmatpush3.msra.mxu0 %v253_v30  ;;  %6413 = vmatpush3.msra.mxu1 %v269_v31  ;;  %v340_v30 = vld [vmem:[%s9850_s1 + $0x8f8] sm:$0xff]  ;;  %v323_v31 = vld [vmem:[%s9850_s1 + $0x870] sm:$0xff] }
  0xdd   :  { %6379 = vmatprep.subr.mxu0 %v7248_v2  ;;  %6414 = vmatprep.subr.mxu1 %v7248_v2 }
  0xde   :  { %6380 = vmatpush3.msra.mxu0 %v252_v32  ;;  %6415 = vmatpush3.msra.mxu1 %v268_v33  ;;  %v339_v32 = vld [vmem:[%s9850_s1 + $0x8f0] sm:$0xff]  ;;  %v322_v33 = vld [vmem:[%s9850_s1 + $0x868] sm:$0xff] }
  0xdf   :  { %6381 = vmatprep.subr.mxu0 %v7248_v2  ;;  %6416 = vmatprep.subr.mxu1 %v7248_v2 }
  0xe0   :  { %6382 = vmatpush3.msra.mxu0 %v251_v34  ;;  %6417 = vmatpush3.msra.mxu1 %v267_v35  ;;  %v338_v34 = vld [vmem:[%s9850_s1 + $0x8e8] sm:$0xff]  ;;  %v321_v35 = vld [vmem:[%s9850_s1 + $0x860] sm:$0xff] }
  0xe1   :  { %6383 = vmatprep.subr.mxu0 %v7248_v2  ;;  %6418 = vmatprep.subr.mxu1 %v7248_v2  ;;  %v8203_v40 = vpop.f32.mrf.mxu0 }
  0xe2   :  { %6384 = vmatpush3.msra.mxu0 %v250_v36  ;;  %6419 = vmatpush3.msra.mxu1 %v266_v37  ;;  %v337_v36 = vld [vmem:[%s9850_s1 + $0x8e0] sm:$0xff]  ;;  %v320_v37 = vld [vmem:[%s9850_s1 + $0x858] sm:$0xff] }
  0xe3   :  { %6385 = vmatprep.subr.mxu0 %v7248_v2  ;;  %6420 = vmatprep.subr.mxu1 %v7248_v2  ;;  %v8213_v43 = vpop.f32.mrf.mxu1  ;;  %v5977_v44 = vpop.f32.mrf.mxu0 }
  0xe4   :  { %6386 = vmatpush3.msra.mxu0 %v249_v38  ;;  %6421 = vmatpush3.msra.mxu1 %v265_v39  ;;  %v336_v38 = vld [vmem:[%s9850_s1 + $0x8d8] sm:$0xff]  ;;  %v319_v39 = vld [vmem:[%s9850_s1 + $0x850] sm:$0xff]  ;;  %v334_v44 = vld [vmem:[%s9850_s1 + $0x8c8] sm:$0xff] }
  0xe5   :  { %6387 = vmatprep.subr.mxu0 %v7248_v2  ;;  %6422 = vmatprep.subr.mxu1 %v7248_v2  ;;  %v6012_v47 = vpop.f32.mrf.mxu1 }
  0xe6   :  { %6388 = vmatpush3.msra.mxu0 %v248_v41  ;;  %6423 = vmatpush3.msra.mxu1 %v264_v42  ;;  %v335_v41 = vld [vmem:[%s9850_s1 + $0x8d0] sm:$0xff]  ;;  %v318_v42 = vld [vmem:[%s9850_s1 + $0x848] sm:$0xff]  ;;  %v316_v47 = vld [vmem:[%s9850_s1 + $0x838] sm:$0xff] }
  0xe7   :  { %6389 = vmatprep.subr.mxu0 %v7248_v2  ;;  %6424 = vmatprep.subr.mxu1 %v7248_v2 }
  0xe8   :  { %6390 = vmatpush3.msra.mxu0 %v247_v45  ;;  %6425 = vmatpush3.msra.mxu1 %v263_v46  ;;  %v317_v45 = vld [vmem:[%s9850_s1 + $0x840] sm:$0xff] }
  0xe9   :  { %6391 = vmatprep.subr.mxu0 %v7248_v2  ;;  %6426 = vmatprep.subr.mxu1 %v7248_v2  ;;  %v333_v46 = vld [vmem:[%s9850_s1 + $0x8c0] sm:$0xff] }
  0xea   :  { %6392 = vmatpush3.msra.mxu0 %v246_v48  ;;  %6427 = vmatpush3.msra.mxu1 %v262_v49  ;;  %v332_v48 = vld [vmem:[%s9850_s1 + $0x8b8] sm:$0xff]  ;;  %v315_v49 = vld [vmem:[%s9850_s1 + $0x830] sm:$0xff] }
  0xeb   :  { %6393 = vmatprep.subr.mxu0 %v7248_v2  ;;  %6428 = vmatprep.subr.mxu1 %v7248_v2 }
  0xec   :  { %6394 = vmatpush3.msra.mxu0 %v245_v50  ;;  %6395 = vmatprep.mubr.msk.f32.mxu0 %vm7249_vm0, %v7248_v2  ;;  %v331_v50 = vld [vmem:[%s9850_s1 + $0x8b0] sm:$0xff] }
  0xed   :  { %6429 = vmatpush3.msra.mxu1 %v261_v51  ;;  %6396 = vmatmul.mubr.f32.vlgmr.msra.gmra.mxu0 %v33_v52  ;;  %v314_v51 = vld [vmem:[%s9850_s1 + $0x828] sm:$0xff] }
  0xee   :  { %6430 = vmatprep.mubr.msk.f32.mxu1 %vm7249_vm0, %v7248_v2  ;;  %6433 = vmatprep.subr.mxu0 %v7248_v2  ;;  %v330_v52 = vld [vmem:[%s9850_s1 + $0x8a8] sm:$0xff] }
  0xef   :  { %6468 = vmatprep.subr.mxu1 %v7248_v2  ;;  %6431 = vmatmul.mubr.f32.vlgmr.msra.gmra.mxu1 %v34_v53  ;;  %v313_v53 = vld [vmem:[%s9850_s1 + $0x820] sm:$0xff] }
  0xf0   :  { %6434 = vmatpush3.msra.mxu0 %v292_v54  ;;  %6469 = vmatpush3.msra.mxu1 %v308_v55  ;;  %v329_v54 = vld [vmem:[%s9850_s1 + $0x8a0] sm:$0xff] }
  0xf1   :  { %6435 = vmatprep.subr.mxu0 %v7248_v2  ;;  %6470 = vmatprep.subr.mxu1 %v7248_v2 }
  0xf2   :  { %6436 = vmatpush3.msra.mxu0 %v291_v56  ;;  %6471 = vmatpush3.msra.mxu1 %v307_v57  ;;  %v312_v56 = vld [vmem:[%s9850_s1 + $0x818] sm:$0xff] }
  0xf3   :  { %6437 = vmatprep.subr.mxu0 %v7248_v2  ;;  %6472 = vmatprep.subr.mxu1 %v7248_v2  ;;  %v328_v57 = vld [vmem:[%s9850_s1 + $0x898] sm:$0xff] }
  0xf4   :  { %6438 = vmatpush3.msra.mxu0 %v290_v58  ;;  %6473 = vmatpush3.msra.mxu1 %v306_v59 }
  0xf5   :  { %6439 = vmatprep.subr.mxu0 %v7248_v2  ;;  %6474 = vmatprep.subr.mxu1 %v7248_v2 }
  0xf6   :  { %6440 = vmatpush3.msra.mxu0 %v289_v60  ;;  %6475 = vmatpush3.msra.mxu1 %v305_v61  ;;  %v311_v60 = vld [vmem:[%s9850_s1 + $0x810] sm:$0xff] }
  0xf7   :  { %6441 = vmatprep.subr.mxu0 %v7248_v2  ;;  %6476 = vmatprep.subr.mxu1 %v7248_v2  ;;  %v327_v61 = vld [vmem:[%s9850_s1 + $0x890] sm:$0xff] }
  0xf8   :  { %6442 = vmatpush3.msra.mxu0 %v288_v62  ;;  %6477 = vmatpush3.msra.mxu1 %v304_v63  ;;  %v310_v63 = vld [vmem:[%s9850_s1 + $0x808] sm:$0xff] }
  0xf9   :  { %6443 = vmatprep.subr.mxu0 %v7248_v2  ;;  %6478 = vmatprep.subr.mxu1 %v7248_v2 }
  0xfa   :  { %6444 = vmatpush3.msra.mxu0 %v287_v0  ;;  %6479 = vmatpush3.msra.mxu1 %v303_v1  ;;  %v326_v0 = vld [vmem:[%s9850_s1 + $0x888] sm:$0xff]  ;;  %v309_v1 = vld [vmem:[%s9850_s1 + $0x800] sm:$0xff] }
  0xfb   :  { %6445 = vmatprep.subr.mxu0 %v7248_v2  ;;  %6480 = vmatprep.subr.mxu1 %v7248_v2 }
  0xfc   :  { %6446 = vmatpush3.msra.mxu0 %v286_v3  ;;  %6481 = vmatpush3.msra.mxu1 %v302_v4  ;;  %v325_v3 = vld [vmem:[%s9850_s1 + $0x880] sm:$0xff] }
  0xfd   :  { %6447 = vmatprep.subr.mxu0 %v7248_v2  ;;  %6482 = vmatprep.subr.mxu1 %v7248_v2  ;;  %v37_v4 = vld [vmem:[%s9849_s0 + $0x20] sm:$0x3] }
  0xfe   :  { %6448 = vmatpush3.msra.mxu0 %v285_v5  ;;  %6483 = vmatpush3.msra.mxu1 %v301_v6  ;;  %v38_v5 = vld [vmem:[%s9849_s0 + $0x22] sm:$0x3]  ;;  %v356_v6 = vld [vmem:[%s9850_s1 + $0x978] sm:$0xff] }
  0xff   :  { %6449 = vmatprep.subr.mxu0 %v7248_v2  ;;  %6484 = vmatprep.subr.mxu1 %v7248_v2 }
 0x100   :  { %6450 = vmatpush3.msra.mxu0 %v284_v7  ;;  %6485 = vmatpush3.msra.mxu1 %v300_v8  ;;  %v372_v7 = vld [vmem:[%s9850_s1 + $0x9f8] sm:$0xff]  ;;  %v355_v8 = vld [vmem:[%s9850_s1 + $0x970] sm:$0xff] }
 0x101   :  { %6451 = vmatprep.subr.mxu0 %v7248_v2  ;;  %6486 = vmatprep.subr.mxu1 %v7248_v2 }
 0x102   :  { %6452 = vmatpush3.msra.mxu0 %v283_v9  ;;  %6487 = vmatpush3.msra.mxu1 %v299_v10  ;;  %v371_v9 = vld [vmem:[%s9850_s1 + $0x9f0] sm:$0xff]  ;;  %v354_v10 = vld [vmem:[%s9850_s1 + $0x968] sm:$0xff] }
 0x103   :  { %6453 = vmatprep.subr.mxu0 %v7248_v2  ;;  %6488 = vmatprep.subr.mxu1 %v7248_v2  ;;  %v8345_v15 = vpop.f32.mrf.mxu0 }
 0x104   :  { %6454 = vmatpush3.msra.mxu0 %v282_v11  ;;  %6489 = vmatpush3.msra.mxu1 %v298_v12  ;;  %v370_v11 = vld [vmem:[%s9850_s1 + $0x9e8] sm:$0xff]  ;;  %v353_v12 = vld [vmem:[%s9850_s1 + $0x960] sm:$0xff] }
 0x105   :  { %6455 = vmatprep.subr.mxu0 %v7248_v2  ;;  %6490 = vmatprep.subr.mxu1 %v7248_v2  ;;  %v8355_v18 = vpop.f32.mrf.mxu1  ;;  %v6047_v19 = vpop.f32.mrf.mxu0 }
 0x106   :  { %6456 = vmatpush3.msra.mxu0 %v281_v13  ;;  %6491 = vmatpush3.msra.mxu1 %v297_v14  ;;  %v369_v13 = vld [vmem:[%s9850_s1 + $0x9e0] sm:$0xff]  ;;  %v352_v14 = vld [vmem:[%s9850_s1 + $0x958] sm:$0xff]  ;;  %v367_v19 = vld [vmem:[%s9850_s1 + $0x9d0] sm:$0xff] }
 0x107   :  { %6457 = vmatprep.subr.mxu0 %v7248_v2  ;;  %6492 = vmatprep.subr.mxu1 %v7248_v2  ;;  %v6082_v22 = vpop.f32.mrf.mxu1 }
 0x108   :  { %6458 = vmatpush3.msra.mxu0 %v280_v16  ;;  %6493 = vmatpush3.msra.mxu1 %v296_v17  ;;  %v368_v16 = vld [vmem:[%s9850_s1 + $0x9d8] sm:$0xff]  ;;  %v351_v17 = vld [vmem:[%s9850_s1 + $0x950] sm:$0xff]  ;;  %v349_v22 = vld [vmem:[%s9850_s1 + $0x940] sm:$0xff] }
 0x109   :  { %6459 = vmatprep.subr.mxu0 %v7248_v2  ;;  %6494 = vmatprep.subr.mxu1 %v7248_v2 }
 0x10a   :  { %6460 = vmatpush3.msra.mxu0 %v279_v20  ;;  %6495 = vmatpush3.msra.mxu1 %v295_v21  ;;  %v350_v20 = vld [vmem:[%s9850_s1 + $0x948] sm:$0xff] }
 0x10b   :  { %6461 = vmatprep.subr.mxu0 %v7248_v2  ;;  %6496 = vmatprep.subr.mxu1 %v7248_v2  ;;  %v366_v21 = vld [vmem:[%s9850_s1 + $0x9c8] sm:$0xff] }
 0x10c   :  { %6462 = vmatpush3.msra.mxu0 %v278_v23  ;;  %6497 = vmatpush3.msra.mxu1 %v294_v24  ;;  %v365_v23 = vld [vmem:[%s9850_s1 + $0x9c0] sm:$0xff]  ;;  %v348_v24 = vld [vmem:[%s9850_s1 + $0x938] sm:$0xff] }
 0x10d   :  { %6463 = vmatprep.subr.mxu0 %v7248_v2  ;;  %6498 = vmatprep.subr.mxu1 %v7248_v2 }
 0x10e   :  { %6464 = vmatpush3.msra.mxu0 %v277_v25  ;;  %6465 = vmatprep.mubr.msk.f32.mxu0 %vm7249_vm0, %v7248_v2  ;;  %v364_v25 = vld [vmem:[%s9850_s1 + $0x9b8] sm:$0xff] }
 0x10f   :  { %6499 = vmatpush3.msra.mxu1 %v293_v26  ;;  %6466 = vmatmul.mubr.f32.vlgmr.msra.gmra.mxu0 %v35_v27  ;;  %v347_v26 = vld [vmem:[%s9850_s1 + $0x930] sm:$0xff] }
 0x110   :  { %6500 = vmatprep.mubr.msk.f32.mxu1 %vm7249_vm0, %v7248_v2  ;;  %6503 = vmatprep.subr.mxu0 %v7248_v2  ;;  %v363_v27 = vld [vmem:[%s9850_s1 + $0x9b0] sm:$0xff] }
 0x111   :  { %6538 = vmatprep.subr.mxu1 %v7248_v2  ;;  %6501 = vmatmul.mubr.f32.vlgmr.msra.gmra.mxu1 %v36_v28  ;;  %v346_v28 = vld [vmem:[%s9850_s1 + $0x928] sm:$0xff] }
 0x112   :  { %6504 = vmatpush3.msra.mxu0 %v324_v29  ;;  %6539 = vmatpush3.msra.mxu1 %v340_v30  ;;  %v362_v29 = vld [vmem:[%s9850_s1 + $0x9a8] sm:$0xff]  ;;  %v345_v30 = vld [vmem:[%s9850_s1 + $0x920] sm:$0xff] }
 0x113   :  { %6505 = vmatprep.subr.mxu0 %v7248_v2  ;;  %6540 = vmatprep.subr.mxu1 %v7248_v2 }
 0x114   :  { %6506 = vmatpush3.msra.mxu0 %v323_v31  ;;  %6541 = vmatpush3.msra.mxu1 %v339_v32  ;;  %v361_v31 = vld [vmem:[%s9850_s1 + $0x9a0] sm:$0xff] }
 0x115   :  { %6507 = vmatprep.subr.mxu0 %v7248_v2  ;;  %6542 = vmatprep.subr.mxu1 %v7248_v2 }
 0x116   :  { %6508 = vmatpush3.msra.mxu0 %v322_v33  ;;  %6543 = vmatpush3.msra.mxu1 %v338_v34  ;;  %v344_v33 = vld [vmem:[%s9850_s1 + $0x918] sm:$0xff] }
 0x117   :  { %6509 = vmatprep.subr.mxu0 %v7248_v2  ;;  %6544 = vmatprep.subr.mxu1 %v7248_v2  ;;  %v360_v34 = vld [vmem:[%s9850_s1 + $0x998] sm:$0xff] }
 0x118   :  { %6510 = vmatpush3.msra.mxu0 %v321_v35  ;;  %6545 = vmatpush3.msra.mxu1 %v337_v36 }
 0x119   :  { %6511 = vmatprep.subr.mxu0 %v7248_v2  ;;  %6546 = vmatprep.subr.mxu1 %v7248_v2 }
 0x11a   :  { %6512 = vmatpush3.msra.mxu0 %v320_v37  ;;  %6547 = vmatpush3.msra.mxu1 %v336_v38  ;;  %v343_v37 = vld [vmem:[%s9850_s1 + $0x910] sm:$0xff] }
 0x11b   :  { %6513 = vmatprep.subr.mxu0 %v7248_v2  ;;  %6548 = vmatprep.subr.mxu1 %v7248_v2  ;;  %v359_v38 = vld [vmem:[%s9850_s1 + $0x990] sm:$0xff] }
 0x11c   :  { %6514 = vmatpush3.msra.mxu0 %v319_v39  ;;  %6549 = vmatpush3.msra.mxu1 %v335_v41  ;;  %v342_v41 = vld [vmem:[%s9850_s1 + $0x908] sm:$0xff] }
 0x11d   :  { %6515 = vmatprep.subr.mxu0 %v7248_v2  ;;  %6550 = vmatprep.subr.mxu1 %v7248_v2 }
 0x11e   :  { %6516 = vmatpush3.msra.mxu0 %v318_v42  ;;  %6551 = vmatpush3.msra.mxu1 %v334_v44  ;;  %v358_v42 = vld [vmem:[%s9850_s1 + $0x988] sm:$0xff]  ;;  %v341_v44 = vld [vmem:[%s9850_s1 + $0x900] sm:$0xff] }
 0x11f   :  { %6517 = vmatprep.subr.mxu0 %v7248_v2  ;;  %6552 = vmatprep.subr.mxu1 %v7248_v2 }
 0x120   :  { %6518 = vmatpush3.msra.mxu0 %v317_v45  ;;  %6553 = vmatpush3.msra.mxu1 %v333_v46  ;;  %v357_v45 = vld [vmem:[%s9850_s1 + $0x980] sm:$0xff] }
 0x121   :  { %6519 = vmatprep.subr.mxu0 %v7248_v2  ;;  %6554 = vmatprep.subr.mxu1 %v7248_v2  ;;  %v39_v46 = vld [vmem:[%s9849_s0 + $0x24] sm:$0x3] }
 0x122   :  { %6520 = vmatpush3.msra.mxu0 %v316_v47  ;;  %6555 = vmatpush3.msra.mxu1 %v332_v48  ;;  %v40_v47 = vld [vmem:[%s9849_s0 + $0x26] sm:$0x3]  ;;  %v388_v48 = vld [vmem:[%s9850_s1 + $0xa78] sm:$0xff] }
 0x123   :  { %6521 = vmatprep.subr.mxu0 %v7248_v2  ;;  %6556 = vmatprep.subr.mxu1 %v7248_v2 }
 0x124   :  { %6522 = vmatpush3.msra.mxu0 %v315_v49  ;;  %6557 = vmatpush3.msra.mxu1 %v331_v50  ;;  %v404_v49 = vld [vmem:[%s9850_s1 + $0xaf8] sm:$0xff]  ;;  %v387_v50 = vld [vmem:[%s9850_s1 + $0xa70] sm:$0xff] }
 0x125   :  { %6523 = vmatprep.subr.mxu0 %v7248_v2  ;;  %6558 = vmatprep.subr.mxu1 %v7248_v2  ;;  %v8487_v55 = vpop.f32.mrf.mxu0 }
 0x126   :  { %6524 = vmatpush3.msra.mxu0 %v314_v51  ;;  %6559 = vmatpush3.msra.mxu1 %v330_v52  ;;  %v403_v51 = vld [vmem:[%s9850_s1 + $0xaf0] sm:$0xff]  ;;  %v386_v52 = vld [vmem:[%s9850_s1 + $0xa68] sm:$0xff] }
 0x127   :  { %6525 = vmatprep.subr.mxu0 %v7248_v2  ;;  %6560 = vmatprep.subr.mxu1 %v7248_v2  ;;  %v8497_v58 = vpop.f32.mrf.mxu1  ;;  %v6117_v59 = vpop.f32.mrf.mxu0 }
 0x128   :  { %6526 = vmatpush3.msra.mxu0 %v313_v53  ;;  %6561 = vmatpush3.msra.mxu1 %v329_v54  ;;  %v402_v53 = vld [vmem:[%s9850_s1 + $0xae8] sm:$0xff]  ;;  %v385_v54 = vld [vmem:[%s9850_s1 + $0xa60] sm:$0xff]  ;;  %v400_v59 = vld [vmem:[%s9850_s1 + $0xad8] sm:$0xff] }
 0x129   :  { %6527 = vmatprep.subr.mxu0 %v7248_v2  ;;  %6562 = vmatprep.subr.mxu1 %v7248_v2  ;;  %v6152_v62 = vpop.f32.mrf.mxu1 }
 0x12a   :  { %6528 = vmatpush3.msra.mxu0 %v312_v56  ;;  %6563 = vmatpush3.msra.mxu1 %v328_v57  ;;  %v401_v56 = vld [vmem:[%s9850_s1 + $0xae0] sm:$0xff]  ;;  %v384_v57 = vld [vmem:[%s9850_s1 + $0xa58] sm:$0xff]  ;;  %v382_v62 = vld [vmem:[%s9850_s1 + $0xa48] sm:$0xff] }
 0x12b   :  { %6529 = vmatprep.subr.mxu0 %v7248_v2  ;;  %6564 = vmatprep.subr.mxu1 %v7248_v2 }
 0x12c   :  { %6530 = vmatpush3.msra.mxu0 %v311_v60  ;;  %6565 = vmatpush3.msra.mxu1 %v327_v61  ;;  %v383_v60 = vld [vmem:[%s9850_s1 + $0xa50] sm:$0xff] }
 0x12d   :  { %6531 = vmatprep.subr.mxu0 %v7248_v2  ;;  %6566 = vmatprep.subr.mxu1 %v7248_v2  ;;  %v399_v61 = vld [vmem:[%s9850_s1 + $0xad0] sm:$0xff] }
 0x12e   :  { %6532 = vmatpush3.msra.mxu0 %v310_v63  ;;  %6567 = vmatpush3.msra.mxu1 %v326_v0  ;;  %v398_v63 = vld [vmem:[%s9850_s1 + $0xac8] sm:$0xff]  ;;  %v381_v0 = vld [vmem:[%s9850_s1 + $0xa40] sm:$0xff] }
 0x12f   :  { %6533 = vmatprep.subr.mxu0 %v7248_v2  ;;  %6568 = vmatprep.subr.mxu1 %v7248_v2 }
 0x130   :  { %6534 = vmatpush3.msra.mxu0 %v309_v1  ;;  %6535 = vmatprep.mubr.msk.f32.mxu0 %vm7249_vm0, %v7248_v2  ;;  %v397_v1 = vld [vmem:[%s9850_s1 + $0xac0] sm:$0xff] }
 0x131   :  { %6569 = vmatpush3.msra.mxu1 %v325_v3  ;;  %6536 = vmatmul.mubr.f32.vlgmr.msra.gmra.mxu0 %v37_v4  ;;  %v380_v3 = vld [vmem:[%s9850_s1 + $0xa38] sm:$0xff] }
 0x132   :  { %6570 = vmatprep.mubr.msk.f32.mxu1 %vm7249_vm0, %v7248_v2  ;;  %6573 = vmatprep.subr.mxu0 %v7248_v2  ;;  %v396_v4 = vld [vmem:[%s9850_s1 + $0xab8] sm:$0xff] }
 0x133   :  { %6608 = vmatprep.subr.mxu1 %v7248_v2  ;;  %6571 = vmatmul.mubr.f32.vlgmr.msra.gmra.mxu1 %v38_v5  ;;  %v379_v5 = vld [vmem:[%s9850_s1 + $0xa30] sm:$0xff] }
 0x134   :  { %6574 = vmatpush3.msra.mxu0 %v356_v6  ;;  %6609 = vmatpush3.msra.mxu1 %v372_v7  ;;  %v395_v6 = vld [vmem:[%s9850_s1 + $0xab0] sm:$0xff]  ;;  %v378_v7 = vld [vmem:[%s9850_s1 + $0xa28] sm:$0xff] }
 0x135   :  { %6575 = vmatprep.subr.mxu0 %v7248_v2  ;;  %6610 = vmatprep.subr.mxu1 %v7248_v2 }
 0x136   :  { %6576 = vmatpush3.msra.mxu0 %v355_v8  ;;  %6611 = vmatpush3.msra.mxu1 %v371_v9  ;;  %v394_v8 = vld [vmem:[%s9850_s1 + $0xaa8] sm:$0xff]  ;;  %v377_v9 = vld [vmem:[%s9850_s1 + $0xa20] sm:$0xff] }
 0x137   :  { %6577 = vmatprep.subr.mxu0 %v7248_v2  ;;  %6612 = vmatprep.subr.mxu1 %v7248_v2 }
 0x138   :  { %6578 = vmatpush3.msra.mxu0 %v354_v10  ;;  %6613 = vmatpush3.msra.mxu1 %v370_v11  ;;  %v393_v10 = vld [vmem:[%s9850_s1 + $0xaa0] sm:$0xff] }
 0x139   :  { %6579 = vmatprep.subr.mxu0 %v7248_v2  ;;  %6614 = vmatprep.subr.mxu1 %v7248_v2 }
 0x13a   :  { %6580 = vmatpush3.msra.mxu0 %v353_v12  ;;  %6615 = vmatpush3.msra.mxu1 %v369_v13  ;;  %v376_v12 = vld [vmem:[%s9850_s1 + $0xa18] sm:$0xff] }
 0x13b   :  { %6581 = vmatprep.subr.mxu0 %v7248_v2  ;;  %6616 = vmatprep.subr.mxu1 %v7248_v2  ;;  %v392_v13 = vld [vmem:[%s9850_s1 + $0xa98] sm:$0xff] }
 0x13c   :  { %6582 = vmatpush3.msra.mxu0 %v352_v14  ;;  %6617 = vmatpush3.msra.mxu1 %v368_v16 }
 0x13d   :  { %6583 = vmatprep.subr.mxu0 %v7248_v2  ;;  %6618 = vmatprep.subr.mxu1 %v7248_v2 }
 0x13e   :  { %6584 = vmatpush3.msra.mxu0 %v351_v17  ;;  %6619 = vmatpush3.msra.mxu1 %v367_v19  ;;  %v375_v17 = vld [vmem:[%s9850_s1 + $0xa10] sm:$0xff] }
 0x13f   :  { %6585 = vmatprep.subr.mxu0 %v7248_v2  ;;  %6620 = vmatprep.subr.mxu1 %v7248_v2  ;;  %v391_v19 = vld [vmem:[%s9850_s1 + $0xa90] sm:$0xff] }
 0x140   :  { %6586 = vmatpush3.msra.mxu0 %v350_v20  ;;  %6621 = vmatpush3.msra.mxu1 %v366_v21  ;;  %v374_v21 = vld [vmem:[%s9850_s1 + $0xa08] sm:$0xff] }
 0x141   :  { %6587 = vmatprep.subr.mxu0 %v7248_v2  ;;  %6622 = vmatprep.subr.mxu1 %v7248_v2 }
 0x142   :  { %6588 = vmatpush3.msra.mxu0 %v349_v22  ;;  %6623 = vmatpush3.msra.mxu1 %v365_v23  ;;  %v390_v22 = vld [vmem:[%s9850_s1 + $0xa88] sm:$0xff]  ;;  %v373_v23 = vld [vmem:[%s9850_s1 + $0xa00] sm:$0xff] }
 0x143   :  { %6589 = vmatprep.subr.mxu0 %v7248_v2  ;;  %6624 = vmatprep.subr.mxu1 %v7248_v2 }
 0x144   :  { %6590 = vmatpush3.msra.mxu0 %v348_v24  ;;  %6625 = vmatpush3.msra.mxu1 %v364_v25  ;;  %v389_v24 = vld [vmem:[%s9850_s1 + $0xa80] sm:$0xff]  ;;  %v41_v25 = vld [vmem:[%s9849_s0 + $0x28] sm:$0x3] }
 0x145   :  { %6591 = vmatprep.subr.mxu0 %v7248_v2  ;;  %6626 = vmatprep.subr.mxu1 %v7248_v2 }
 0x146   :  { %6592 = vmatpush3.msra.mxu0 %v347_v26  ;;  %6627 = vmatpush3.msra.mxu1 %v363_v27  ;;  %v42_v26 = vld [vmem:[%s9849_s0 + $0x2a] sm:$0x3]  ;;  %v420_v27 = vld [vmem:[%s9850_s1 + $0xb78] sm:$0xff] }
 0x147   :  { %6593 = vmatprep.subr.mxu0 %v7248_v2  ;;  %6628 = vmatprep.subr.mxu1 %v7248_v2  ;;  %v8629_v32 = vpop.f32.mrf.mxu0 }
 0x148   :  { %6594 = vmatpush3.msra.mxu0 %v346_v28  ;;  %6629 = vmatpush3.msra.mxu1 %v362_v29  ;;  %v436_v28 = vld [vmem:[%s9850_s1 + $0xbf8] sm:$0xff]  ;;  %v419_v29 = vld [vmem:[%s9850_s1 + $0xb70] sm:$0xff] }
 0x149   :  { %6595 = vmatprep.subr.mxu0 %v7248_v2  ;;  %6630 = vmatprep.subr.mxu1 %v7248_v2  ;;  %v8639_v35 = vpop.f32.mrf.mxu1  ;;  %v6187_v36 = vpop.f32.mrf.mxu0 }
 0x14a   :  { %6596 = vmatpush3.msra.mxu0 %v345_v30  ;;  %6631 = vmatpush3.msra.mxu1 %v361_v31  ;;  %v435_v30 = vld [vmem:[%s9850_s1 + $0xbf0] sm:$0xff]  ;;  %v418_v31 = vld [vmem:[%s9850_s1 + $0xb68] sm:$0xff]  ;;  %v433_v36 = vld [vmem:[%s9850_s1 + $0xbe0] sm:$0xff] }
 0x14b   :  { %6597 = vmatprep.subr.mxu0 %v7248_v2  ;;  %6632 = vmatprep.subr.mxu1 %v7248_v2  ;;  %v6222_v39 = vpop.f32.mrf.mxu1 }
 0x14c   :  { %6598 = vmatpush3.msra.mxu0 %v344_v33  ;;  %6633 = vmatpush3.msra.mxu1 %v360_v34  ;;  %v434_v33 = vld [vmem:[%s9850_s1 + $0xbe8] sm:$0xff]  ;;  %v417_v34 = vld [vmem:[%s9850_s1 + $0xb60] sm:$0xff]  ;;  %v415_v39 = vld [vmem:[%s9850_s1 + $0xb50] sm:$0xff] }
 0x14d   :  { %6599 = vmatprep.subr.mxu0 %v7248_v2  ;;  %6634 = vmatprep.subr.mxu1 %v7248_v2 }
 0x14e   :  { %6600 = vmatpush3.msra.mxu0 %v343_v37  ;;  %6635 = vmatpush3.msra.mxu1 %v359_v38  ;;  %v416_v37 = vld [vmem:[%s9850_s1 + $0xb58] sm:$0xff] }
 0x14f   :  { %6601 = vmatprep.subr.mxu0 %v7248_v2  ;;  %6636 = vmatprep.subr.mxu1 %v7248_v2  ;;  %v432_v38 = vld [vmem:[%s9850_s1 + $0xbd8] sm:$0xff] }
 0x150   :  { %6602 = vmatpush3.msra.mxu0 %v342_v41  ;;  %6637 = vmatpush3.msra.mxu1 %v358_v42  ;;  %v431_v41 = vld [vmem:[%s9850_s1 + $0xbd0] sm:$0xff]  ;;  %v414_v42 = vld [vmem:[%s9850_s1 + $0xb48] sm:$0xff] }
 0x151   :  { %6603 = vmatprep.subr.mxu0 %v7248_v2  ;;  %6638 = vmatprep.subr.mxu1 %v7248_v2 }
 0x152   :  { %6604 = vmatpush3.msra.mxu0 %v341_v44  ;;  %6605 = vmatprep.mubr.msk.f32.mxu0 %vm7249_vm0, %v7248_v2  ;;  %v430_v44 = vld [vmem:[%s9850_s1 + $0xbc8] sm:$0xff] }
 0x153   :  { %6639 = vmatpush3.msra.mxu1 %v357_v45  ;;  %6606 = vmatmul.mubr.f32.vlgmr.msra.gmra.mxu0 %v39_v46  ;;  %v413_v45 = vld [vmem:[%s9850_s1 + $0xb40] sm:$0xff] }
 0x154   :  { %6640 = vmatprep.mubr.msk.f32.mxu1 %vm7249_vm0, %v7248_v2  ;;  %6643 = vmatprep.subr.mxu0 %v7248_v2  ;;  %v429_v46 = vld [vmem:[%s9850_s1 + $0xbc0] sm:$0xff] }
 0x155   :  { %6678 = vmatprep.subr.mxu1 %v7248_v2  ;;  %6641 = vmatmul.mubr.f32.vlgmr.msra.gmra.mxu1 %v40_v47  ;;  %v412_v47 = vld [vmem:[%s9850_s1 + $0xb38] sm:$0xff] }
 0x156   :  { %6644 = vmatpush3.msra.mxu0 %v388_v48  ;;  %6679 = vmatpush3.msra.mxu1 %v404_v49  ;;  %v428_v48 = vld [vmem:[%s9850_s1 + $0xbb8] sm:$0xff]  ;;  %v411_v49 = vld [vmem:[%s9850_s1 + $0xb30] sm:$0xff] }
 0x157   :  { %6645 = vmatprep.subr.mxu0 %v7248_v2  ;;  %6680 = vmatprep.subr.mxu1 %v7248_v2 }
 0x158   :  { %6646 = vmatpush3.msra.mxu0 %v387_v50  ;;  %6681 = vmatpush3.msra.mxu1 %v403_v51  ;;  %v427_v50 = vld [vmem:[%s9850_s1 + $0xbb0] sm:$0xff]  ;;  %v410_v51 = vld [vmem:[%s9850_s1 + $0xb28] sm:$0xff] }
 0x159   :  { %6647 = vmatprep.subr.mxu0 %v7248_v2  ;;  %6682 = vmatprep.subr.mxu1 %v7248_v2 }
 0x15a   :  { %6648 = vmatpush3.msra.mxu0 %v386_v52  ;;  %6683 = vmatpush3.msra.mxu1 %v402_v53  ;;  %v426_v52 = vld [vmem:[%s9850_s1 + $0xba8] sm:$0xff]  ;;  %v409_v53 = vld [vmem:[%s9850_s1 + $0xb20] sm:$0xff] }
 0x15b   :  { %6649 = vmatprep.subr.mxu0 %v7248_v2  ;;  %6684 = vmatprep.subr.mxu1 %v7248_v2 }
 0x15c   :  { %6650 = vmatpush3.msra.mxu0 %v385_v54  ;;  %6685 = vmatpush3.msra.mxu1 %v401_v56  ;;  %v425_v54 = vld [vmem:[%s9850_s1 + $0xba0] sm:$0xff] }
 0x15d   :  { %6651 = vmatprep.subr.mxu0 %v7248_v2  ;;  %6686 = vmatprep.subr.mxu1 %v7248_v2 }
 0x15e   :  { %6652 = vmatpush3.msra.mxu0 %v384_v57  ;;  %6687 = vmatpush3.msra.mxu1 %v400_v59  ;;  %v408_v57 = vld [vmem:[%s9850_s1 + $0xb18] sm:$0xff] }
 0x15f   :  { %6653 = vmatprep.subr.mxu0 %v7248_v2  ;;  %6688 = vmatprep.subr.mxu1 %v7248_v2  ;;  %v424_v59 = vld [vmem:[%s9850_s1 + $0xb98] sm:$0xff] }
 0x160   :  { %6654 = vmatpush3.msra.mxu0 %v383_v60  ;;  %6689 = vmatpush3.msra.mxu1 %v399_v61 }
 0x161   :  { %6655 = vmatprep.subr.mxu0 %v7248_v2  ;;  %6690 = vmatprep.subr.mxu1 %v7248_v2 }
 0x162   :  { %6656 = vmatpush3.msra.mxu0 %v382_v62  ;;  %6691 = vmatpush3.msra.mxu1 %v398_v63  ;;  %v407_v62 = vld [vmem:[%s9850_s1 + $0xb10] sm:$0xff] }
 0x163   :  { %6657 = vmatprep.subr.mxu0 %v7248_v2  ;;  %6692 = vmatprep.subr.mxu1 %v7248_v2  ;;  %v423_v63 = vld [vmem:[%s9850_s1 + $0xb90] sm:$0xff] }
 0x164   :  { %6658 = vmatpush3.msra.mxu0 %v381_v0  ;;  %6693 = vmatpush3.msra.mxu1 %v397_v1  ;;  %v406_v1 = vld [vmem:[%s9850_s1 + $0xb08] sm:$0xff] }
 0x165   :  { %6659 = vmatprep.subr.mxu0 %v7248_v2  ;;  %6694 = vmatprep.subr.mxu1 %v7248_v2 }
 0x166   :  { %6660 = vmatpush3.msra.mxu0 %v380_v3  ;;  %6695 = vmatpush3.msra.mxu1 %v396_v4  ;;  %v422_v3 = vld [vmem:[%s9850_s1 + $0xb88] sm:$0xff]  ;;  %v405_v4 = vld [vmem:[%s9850_s1 + $0xb00] sm:$0xff] }
 0x167   :  { %6661 = vmatprep.subr.mxu0 %v7248_v2  ;;  %6696 = vmatprep.subr.mxu1 %v7248_v2 }
 0x168   :  { %6662 = vmatpush3.msra.mxu0 %v379_v5  ;;  %6697 = vmatpush3.msra.mxu1 %v395_v6  ;;  %v421_v5 = vld [vmem:[%s9850_s1 + $0xb80] sm:$0xff]  ;;  %v43_v6 = vld [vmem:[%s9849_s0 + $0x2c] sm:$0x3] }
 0x169   :  { %6663 = vmatprep.subr.mxu0 %v7248_v2  ;;  %6698 = vmatprep.subr.mxu1 %v7248_v2  ;;  %v8771_v11 = vpop.f32.mrf.mxu0 }
 0x16a   :  { %6664 = vmatpush3.msra.mxu0 %v378_v7  ;;  %6699 = vmatpush3.msra.mxu1 %v394_v8  ;;  %v44_v7 = vld [vmem:[%s9849_s0 + $0x2e] sm:$0x3]  ;;  %v452_v8 = vld [vmem:[%s9850_s1 + $0xc78] sm:$0xff] }
 0x16b   :  { %6665 = vmatprep.subr.mxu0 %v7248_v2  ;;  %6700 = vmatprep.subr.mxu1 %v7248_v2  ;;  %v8781_v14 = vpop.f32.mrf.mxu1  ;;  %v6257_v16 = vpop.f32.mrf.mxu0 }
 0x16c   :  { %6666 = vmatpush3.msra.mxu0 %v377_v9  ;;  %6701 = vmatpush3.msra.mxu1 %v393_v10  ;;  %v468_v9 = vld [vmem:[%s9850_s1 + $0xcf8] sm:$0xff]  ;;  %v451_v10 = vld [vmem:[%s9850_s1 + $0xc70] sm:$0xff]  ;;  %v466_v16 = vld [vmem:[%s9850_s1 + $0xce8] sm:$0xff] }
 0x16d   :  { %6667 = vmatprep.subr.mxu0 %v7248_v2  ;;  %6702 = vmatprep.subr.mxu1 %v7248_v2  ;;  %v6292_v20 = vpop.f32.mrf.mxu1 }
 0x16e   :  { %6668 = vmatpush3.msra.mxu0 %v376_v12  ;;  %6703 = vmatpush3.msra.mxu1 %v392_v13  ;;  %v467_v12 = vld [vmem:[%s9850_s1 + $0xcf0] sm:$0xff]  ;;  %v450_v13 = vld [vmem:[%s9850_s1 + $0xc68] sm:$0xff]  ;;  %v448_v20 = vld [vmem:[%s9850_s1 + $0xc58] sm:$0xff] }
 0x16f   :  { %6669 = vmatprep.subr.mxu0 %v7248_v2  ;;  %6704 = vmatprep.subr.mxu1 %v7248_v2 }
 0x170   :  { %6670 = vmatpush3.msra.mxu0 %v375_v17  ;;  %6705 = vmatpush3.msra.mxu1 %v391_v19  ;;  %v449_v17 = vld [vmem:[%s9850_s1 + $0xc60] sm:$0xff] }
 0x171   :  { %6671 = vmatprep.subr.mxu0 %v7248_v2  ;;  %6706 = vmatprep.subr.mxu1 %v7248_v2  ;;  %v465_v19 = vld [vmem:[%s9850_s1 + $0xce0] sm:$0xff] }
 0x172   :  { %6672 = vmatpush3.msra.mxu0 %v374_v21  ;;  %6707 = vmatpush3.msra.mxu1 %v390_v22  ;;  %v464_v21 = vld [vmem:[%s9850_s1 + $0xcd8] sm:$0xff]  ;;  %v447_v22 = vld [vmem:[%s9850_s1 + $0xc50] sm:$0xff] }
 0x173   :  { %6673 = vmatprep.subr.mxu0 %v7248_v2  ;;  %6708 = vmatprep.subr.mxu1 %v7248_v2 }
 0x174   :  { %6674 = vmatpush3.msra.mxu0 %v373_v23  ;;  %6675 = vmatprep.mubr.msk.f32.mxu0 %vm7249_vm0, %v7248_v2  ;;  %v463_v23 = vld [vmem:[%s9850_s1 + $0xcd0] sm:$0xff] }
 0x175   :  { %6709 = vmatpush3.msra.mxu1 %v389_v24  ;;  %6676 = vmatmul.mubr.f32.vlgmr.msra.gmra.mxu0 %v41_v25  ;;  %v446_v24 = vld [vmem:[%s9850_s1 + $0xc48] sm:$0xff] }
 0x176   :  { %6710 = vmatprep.mubr.msk.f32.mxu1 %vm7249_vm0, %v7248_v2  ;;  %6713 = vmatprep.subr.mxu0 %v7248_v2  ;;  %v462_v25 = vld [vmem:[%s9850_s1 + $0xcc8] sm:$0xff] }
 0x177   :  { %6748 = vmatprep.subr.mxu1 %v7248_v2  ;;  %6711 = vmatmul.mubr.f32.vlgmr.msra.gmra.mxu1 %v42_v26  ;;  %v445_v26 = vld [vmem:[%s9850_s1 + $0xc40] sm:$0xff] }
 0x178   :  { %6714 = vmatpush3.msra.mxu0 %v420_v27  ;;  %6749 = vmatpush3.msra.mxu1 %v436_v28  ;;  %v461_v27 = vld [vmem:[%s9850_s1 + $0xcc0] sm:$0xff]  ;;  %v444_v28 = vld [vmem:[%s9850_s1 + $0xc38] sm:$0xff] }
 0x179   :  { %6715 = vmatprep.subr.mxu0 %v7248_v2  ;;  %6750 = vmatprep.subr.mxu1 %v7248_v2 }
 0x17a   :  { %6716 = vmatpush3.msra.mxu0 %v419_v29  ;;  %6751 = vmatpush3.msra.mxu1 %v435_v30  ;;  %v460_v29 = vld [vmem:[%s9850_s1 + $0xcb8] sm:$0xff]  ;;  %v443_v30 = vld [vmem:[%s9850_s1 + $0xc30] sm:$0xff] }
 0x17b   :  { %6717 = vmatprep.subr.mxu0 %v7248_v2  ;;  %6752 = vmatprep.subr.mxu1 %v7248_v2 }
 0x17c   :  { %6718 = vmatpush3.msra.mxu0 %v418_v31  ;;  %6753 = vmatpush3.msra.mxu1 %v434_v33  ;;  %v459_v31 = vld [vmem:[%s9850_s1 + $0xcb0] sm:$0xff]  ;;  %v442_v33 = vld [vmem:[%s9850_s1 + $0xc28] sm:$0xff] }
 0x17d   :  { %6719 = vmatprep.subr.mxu0 %v7248_v2  ;;  %6754 = vmatprep.subr.mxu1 %v7248_v2 }
 0x17e   :  { %6720 = vmatpush3.msra.mxu0 %v417_v34  ;;  %6755 = vmatpush3.msra.mxu1 %v433_v36  ;;  %v458_v34 = vld [vmem:[%s9850_s1 + $0xca8] sm:$0xff]  ;;  %v441_v36 = vld [vmem:[%s9850_s1 + $0xc20] sm:$0xff] }
 0x17f   :  { %6721 = vmatprep.subr.mxu0 %v7248_v2  ;;  %6756 = vmatprep.subr.mxu1 %v7248_v2 }
 0x180   :  { %6722 = vmatpush3.msra.mxu0 %v416_v37  ;;  %6757 = vmatpush3.msra.mxu1 %v432_v38  ;;  %v457_v37 = vld [vmem:[%s9850_s1 + $0xca0] sm:$0xff] }
 0x181   :  { %6723 = vmatprep.subr.mxu0 %v7248_v2  ;;  %6758 = vmatprep.subr.mxu1 %v7248_v2 }
 0x182   :  { %6724 = vmatpush3.msra.mxu0 %v415_v39  ;;  %6759 = vmatpush3.msra.mxu1 %v431_v41  ;;  %v440_v39 = vld [vmem:[%s9850_s1 + $0xc18] sm:$0xff] }
 0x183   :  { %6725 = vmatprep.subr.mxu0 %v7248_v2  ;;  %6760 = vmatprep.subr.mxu1 %v7248_v2  ;;  %v456_v41 = vld [vmem:[%s9850_s1 + $0xc98] sm:$0xff] }
 0x184   :  { %6726 = vmatpush3.msra.mxu0 %v414_v42  ;;  %6761 = vmatpush3.msra.mxu1 %v430_v44 }
 0x185   :  { %6727 = vmatprep.subr.mxu0 %v7248_v2  ;;  %6762 = vmatprep.subr.mxu1 %v7248_v2 }
 0x186   :  { %6728 = vmatpush3.msra.mxu0 %v413_v45  ;;  %6763 = vmatpush3.msra.mxu1 %v429_v46  ;;  %v439_v45 = vld [vmem:[%s9850_s1 + $0xc10] sm:$0xff] }
 0x187   :  { %6729 = vmatprep.subr.mxu0 %v7248_v2  ;;  %6764 = vmatprep.subr.mxu1 %v7248_v2  ;;  %v455_v46 = vld [vmem:[%s9850_s1 + $0xc90] sm:$0xff] }
 0x188   :  { %6730 = vmatpush3.msra.mxu0 %v412_v47  ;;  %6765 = vmatpush3.msra.mxu1 %v428_v48  ;;  %v438_v48 = vld [vmem:[%s9850_s1 + $0xc08] sm:$0xff] }
 0x189   :  { %6731 = vmatprep.subr.mxu0 %v7248_v2  ;;  %6766 = vmatprep.subr.mxu1 %v7248_v2 }
 0x18a   :  { %6732 = vmatpush3.msra.mxu0 %v411_v49  ;;  %6767 = vmatpush3.msra.mxu1 %v427_v50  ;;  %v454_v49 = vld [vmem:[%s9850_s1 + $0xc88] sm:$0xff]  ;;  %v437_v50 = vld [vmem:[%s9850_s1 + $0xc00] sm:$0xff] }
 0x18b   :  { %6733 = vmatprep.subr.mxu0 %v7248_v2  ;;  %6768 = vmatprep.subr.mxu1 %v7248_v2  ;;  %v8913_v56 = vpop.f32.mrf.mxu0 }
 0x18c   :  { %6734 = vmatpush3.msra.mxu0 %v410_v51  ;;  %6769 = vmatpush3.msra.mxu1 %v426_v52  ;;  %v453_v51 = vld [vmem:[%s9850_s1 + $0xc80] sm:$0xff]  ;;  %v45_v52 = vld [vmem:[%s9849_s0 + $0x30] sm:$0x3] }
 0x18d   :  { %6735 = vmatprep.subr.mxu0 %v7248_v2  ;;  %6770 = vmatprep.subr.mxu1 %v7248_v2  ;;  %v8923_v60 = vpop.f32.mrf.mxu1  ;;  %v6327_v61 = vpop.f32.mrf.mxu0 }
 0x18e   :  { %6736 = vmatpush3.msra.mxu0 %v409_v53  ;;  %6771 = vmatpush3.msra.mxu1 %v425_v54  ;;  %v46_v53 = vld [vmem:[%s9849_s0 + $0x32] sm:$0x3]  ;;  %v484_v54 = vld [vmem:[%s9850_s1 + $0xd78] sm:$0xff] }
 0x18f   :  { %6737 = vmatprep.subr.mxu0 %v7248_v2  ;;  %6772 = vmatprep.subr.mxu1 %v7248_v2  ;;  %v6362_v0 = vpop.f32.mrf.mxu1  ;;  %v499_v61 = vld [vmem:[%s9850_s1 + $0xdf0] sm:$0xff] }
 0x190   :  { %6738 = vmatpush3.msra.mxu0 %v408_v57  ;;  %6773 = vmatpush3.msra.mxu1 %v424_v59  ;;  %v500_v57 = vld [vmem:[%s9850_s1 + $0xdf8] sm:$0xff]  ;;  %v483_v59 = vld [vmem:[%s9850_s1 + $0xd70] sm:$0xff]  ;;  %v481_v0 = vld [vmem:[%s9850_s1 + $0xd60] sm:$0xff] }
 0x191   :  { %6739 = vmatprep.subr.mxu0 %v7248_v2  ;;  %6774 = vmatprep.subr.mxu1 %v7248_v2 }
 0x192   :  { %6740 = vmatpush3.msra.mxu0 %v407_v62  ;;  %6775 = vmatpush3.msra.mxu1 %v423_v63  ;;  %v482_v62 = vld [vmem:[%s9850_s1 + $0xd68] sm:$0xff] }
 0x193   :  { %6741 = vmatprep.subr.mxu0 %v7248_v2  ;;  %6776 = vmatprep.subr.mxu1 %v7248_v2  ;;  %v498_v63 = vld [vmem:[%s9850_s1 + $0xde8] sm:$0xff] }
 0x194   :  { %6742 = vmatpush3.msra.mxu0 %v406_v1  ;;  %6777 = vmatpush3.msra.mxu1 %v422_v3  ;;  %v497_v1 = vld [vmem:[%s9850_s1 + $0xde0] sm:$0xff]  ;;  %v480_v3 = vld [vmem:[%s9850_s1 + $0xd58] sm:$0xff] }
 0x195   :  { %6743 = vmatprep.subr.mxu0 %v7248_v2  ;;  %6778 = vmatprep.subr.mxu1 %v7248_v2 }
 0x196   :  { %6744 = vmatpush3.msra.mxu0 %v405_v4  ;;  %6745 = vmatprep.mubr.msk.f32.mxu0 %vm7249_vm0, %v7248_v2  ;;  %v496_v4 = vld [vmem:[%s9850_s1 + $0xdd8] sm:$0xff] }
 0x197   :  { %6779 = vmatpush3.msra.mxu1 %v421_v5  ;;  %6746 = vmatmul.mubr.f32.vlgmr.msra.gmra.mxu0 %v43_v6  ;;  %v479_v5 = vld [vmem:[%s9850_s1 + $0xd50] sm:$0xff] }
 0x198   :  { %6780 = vmatprep.mubr.msk.f32.mxu1 %vm7249_vm0, %v7248_v2  ;;  %6783 = vmatprep.subr.mxu0 %v7248_v2  ;;  %v495_v6 = vld [vmem:[%s9850_s1 + $0xdd0] sm:$0xff] }
 0x199   :  { %6818 = vmatprep.subr.mxu1 %v7248_v2  ;;  %6781 = vmatmul.mubr.f32.vlgmr.msra.gmra.mxu1 %v44_v7  ;;  %v478_v7 = vld [vmem:[%s9850_s1 + $0xd48] sm:$0xff] }
 0x19a   :  { %6784 = vmatpush3.msra.mxu0 %v452_v8  ;;  %6819 = vmatpush3.msra.mxu1 %v468_v9  ;;  %v494_v8 = vld [vmem:[%s9850_s1 + $0xdc8] sm:$0xff]  ;;  %v477_v9 = vld [vmem:[%s9850_s1 + $0xd40] sm:$0xff] }
 0x19b   :  { %6785 = vmatprep.subr.mxu0 %v7248_v2  ;;  %6820 = vmatprep.subr.mxu1 %v7248_v2 }
 0x19c   :  { %6786 = vmatpush3.msra.mxu0 %v451_v10  ;;  %6821 = vmatpush3.msra.mxu1 %v467_v12  ;;  %v493_v10 = vld [vmem:[%s9850_s1 + $0xdc0] sm:$0xff]  ;;  %v476_v12 = vld [vmem:[%s9850_s1 + $0xd38] sm:$0xff] }
 0x19d   :  { %6787 = vmatprep.subr.mxu0 %v7248_v2  ;;  %6822 = vmatprep.subr.mxu1 %v7248_v2 }
 0x19e   :  { %6788 = vmatpush3.msra.mxu0 %v450_v13  ;;  %6823 = vmatpush3.msra.mxu1 %v466_v16  ;;  %v492_v13 = vld [vmem:[%s9850_s1 + $0xdb8] sm:$0xff]  ;;  %v475_v16 = vld [vmem:[%s9850_s1 + $0xd30] sm:$0xff] }
 0x19f   :  { %6789 = vmatprep.subr.mxu0 %v7248_v2  ;;  %6824 = vmatprep.subr.mxu1 %v7248_v2 }
 0x1a0   :  { %6790 = vmatpush3.msra.mxu0 %v449_v17  ;;  %6825 = vmatpush3.msra.mxu1 %v465_v19  ;;  %v491_v17 = vld [vmem:[%s9850_s1 + $0xdb0] sm:$0xff]  ;;  %v474_v19 = vld [vmem:[%s9850_s1 + $0xd28] sm:$0xff] }
 0x1a1   :  { %6791 = vmatprep.subr.mxu0 %v7248_v2  ;;  %6826 = vmatprep.subr.mxu1 %v7248_v2 }
 0x1a2   :  { %6792 = vmatpush3.msra.mxu0 %v448_v20  ;;  %6827 = vmatpush3.msra.mxu1 %v464_v21  ;;  %v490_v20 = vld [vmem:[%s9850_s1 + $0xda8] sm:$0xff]  ;;  %v473_v21 = vld [vmem:[%s9850_s1 + $0xd20] sm:$0xff] }
 0x1a3   :  { %6793 = vmatprep.subr.mxu0 %v7248_v2  ;;  %6828 = vmatprep.subr.mxu1 %v7248_v2 }
 0x1a4   :  { %6794 = vmatpush3.msra.mxu0 %v447_v22  ;;  %6829 = vmatpush3.msra.mxu1 %v463_v23  ;;  %v489_v22 = vld [vmem:[%s9850_s1 + $0xda0] sm:$0xff] }
 0x1a5   :  { %6795 = vmatprep.subr.mxu0 %v7248_v2  ;;  %6830 = vmatprep.subr.mxu1 %v7248_v2 }
 0x1a6   :  { %6796 = vmatpush3.msra.mxu0 %v446_v24  ;;  %6831 = vmatpush3.msra.mxu1 %v462_v25  ;;  %v472_v24 = vld [vmem:[%s9850_s1 + $0xd18] sm:$0xff] }
 0x1a7   :  { %6797 = vmatprep.subr.mxu0 %v7248_v2  ;;  %6832 = vmatprep.subr.mxu1 %v7248_v2  ;;  %v488_v25 = vld [vmem:[%s9850_s1 + $0xd98] sm:$0xff] }
 0x1a8   :  { %6798 = vmatpush3.msra.mxu0 %v445_v26  ;;  %6833 = vmatpush3.msra.mxu1 %v461_v27 }
 0x1a9   :  { %6799 = vmatprep.subr.mxu0 %v7248_v2  ;;  %6834 = vmatprep.subr.mxu1 %v7248_v2 }
 0x1aa   :  { %6800 = vmatpush3.msra.mxu0 %v444_v28  ;;  %6835 = vmatpush3.msra.mxu1 %v460_v29  ;;  %v471_v28 = vld [vmem:[%s9850_s1 + $0xd10] sm:$0xff] }
 0x1ab   :  { %6801 = vmatprep.subr.mxu0 %v7248_v2  ;;  %6836 = vmatprep.subr.mxu1 %v7248_v2  ;;  %v487_v29 = vld [vmem:[%s9850_s1 + $0xd90] sm:$0xff] }
 0x1ac   :  { %6802 = vmatpush3.msra.mxu0 %v443_v30  ;;  %6837 = vmatpush3.msra.mxu1 %v459_v31  ;;  %v470_v31 = vld [vmem:[%s9850_s1 + $0xd08] sm:$0xff] }
 0x1ad   :  { %6803 = vmatprep.subr.mxu0 %v7248_v2  ;;  %6838 = vmatprep.subr.mxu1 %v7248_v2  ;;  %v9055_v38 = vpop.f32.mrf.mxu0 }
 0x1ae   :  { %6804 = vmatpush3.msra.mxu0 %v442_v33  ;;  %6839 = vmatpush3.msra.mxu1 %v458_v34  ;;  %v486_v33 = vld [vmem:[%s9850_s1 + $0xd88] sm:$0xff]  ;;  %v469_v34 = vld [vmem:[%s9850_s1 + $0xd00] sm:$0xff] }
 0x1af   :  { %6805 = vmatprep.subr.mxu0 %v7248_v2  ;;  %6840 = vmatprep.subr.mxu1 %v7248_v2  ;;  %v9065_v42 = vpop.f32.mrf.mxu1  ;;  %v6397_v44 = vpop.f32.mrf.mxu0 }
 0x1b0   :  { %6806 = vmatpush3.msra.mxu0 %v441_v36  ;;  %6841 = vmatpush3.msra.mxu1 %v457_v37  ;;  %v485_v36 = vld [vmem:[%s9850_s1 + $0xd80] sm:$0xff]  ;;  %v47_v37 = vld [vmem:[%s9849_s0 + $0x34] sm:$0x3]  ;;  %v532_v44 = vld [vmem:[%s9850_s1 + $0xef8] sm:$0xff] }
 0x1b1   :  { %6807 = vmatprep.subr.mxu0 %v7248_v2  ;;  %6842 = vmatprep.subr.mxu1 %v7248_v2  ;;  %v6432_v47 = vpop.f32.mrf.mxu1 }
 0x1b2   :  { %6808 = vmatpush3.msra.mxu0 %v440_v39  ;;  %6843 = vmatpush3.msra.mxu1 %v456_v41  ;;  %v48_v39 = vld [vmem:[%s9849_s0 + $0x36] sm:$0x3]  ;;  %v516_v41 = vld [vmem:[%s9850_s1 + $0xe78] sm:$0xff]  ;;  %v514_v47 = vld [vmem:[%s9850_s1 + $0xe68] sm:$0xff] }
 0x1b3   :  { %6809 = vmatprep.subr.mxu0 %v7248_v2  ;;  %6844 = vmatprep.subr.mxu1 %v7248_v2 }
 0x1b4   :  { %6810 = vmatpush3.msra.mxu0 %v439_v45  ;;  %6845 = vmatpush3.msra.mxu1 %v455_v46  ;;  %v515_v45 = vld [vmem:[%s9850_s1 + $0xe70] sm:$0xff] }
 0x1b5   :  { %6811 = vmatprep.subr.mxu0 %v7248_v2  ;;  %6846 = vmatprep.subr.mxu1 %v7248_v2  ;;  %v531_v46 = vld [vmem:[%s9850_s1 + $0xef0] sm:$0xff] }
 0x1b6   :  { %6812 = vmatpush3.msra.mxu0 %v438_v48  ;;  %6847 = vmatpush3.msra.mxu1 %v454_v49  ;;  %v530_v48 = vld [vmem:[%s9850_s1 + $0xee8] sm:$0xff]  ;;  %v513_v49 = vld [vmem:[%s9850_s1 + $0xe60] sm:$0xff] }
 0x1b7   :  { %6813 = vmatprep.subr.mxu0 %v7248_v2  ;;  %6848 = vmatprep.subr.mxu1 %v7248_v2 }
 0x1b8   :  { %6814 = vmatpush3.msra.mxu0 %v437_v50  ;;  %6815 = vmatprep.mubr.msk.f32.mxu0 %vm7249_vm0, %v7248_v2  ;;  %v529_v50 = vld [vmem:[%s9850_s1 + $0xee0] sm:$0xff] }
 0x1b9   :  { %6849 = vmatpush3.msra.mxu1 %v453_v51  ;;  %6816 = vmatmul.mubr.f32.vlgmr.msra.gmra.mxu0 %v45_v52  ;;  %v512_v51 = vld [vmem:[%s9850_s1 + $0xe58] sm:$0xff] }
 0x1ba   :  { %6850 = vmatprep.mubr.msk.f32.mxu1 %vm7249_vm0, %v7248_v2  ;;  %6853 = vmatprep.subr.mxu0 %v7248_v2  ;;  %v528_v52 = vld [vmem:[%s9850_s1 + $0xed8] sm:$0xff] }
 0x1bb   :  { %6888 = vmatprep.subr.mxu1 %v7248_v2  ;;  %6851 = vmatmul.mubr.f32.vlgmr.msra.gmra.mxu1 %v46_v53  ;;  %v511_v53 = vld [vmem:[%s9850_s1 + $0xe50] sm:$0xff] }
 0x1bc   :  { %6854 = vmatpush3.msra.mxu0 %v484_v54  ;;  %6889 = vmatpush3.msra.mxu1 %v500_v57  ;;  %v527_v54 = vld [vmem:[%s9850_s1 + $0xed0] sm:$0xff]  ;;  %v510_v57 = vld [vmem:[%s9850_s1 + $0xe48] sm:$0xff] }
 0x1bd   :  { %6855 = vmatprep.subr.mxu0 %v7248_v2  ;;  %6890 = vmatprep.subr.mxu1 %v7248_v2 }
 0x1be   :  { %6856 = vmatpush3.msra.mxu0 %v483_v59  ;;  %6891 = vmatpush3.msra.mxu1 %v499_v61  ;;  %v526_v59 = vld [vmem:[%s9850_s1 + $0xec8] sm:$0xff]  ;;  %v509_v61 = vld [vmem:[%s9850_s1 + $0xe40] sm:$0xff] }
 0x1bf   :  { %6857 = vmatprep.subr.mxu0 %v7248_v2  ;;  %6892 = vmatprep.subr.mxu1 %v7248_v2 }
 0x1c0   :  { %6858 = vmatpush3.msra.mxu0 %v482_v62  ;;  %6893 = vmatpush3.msra.mxu1 %v498_v63  ;;  %v525_v62 = vld [vmem:[%s9850_s1 + $0xec0] sm:$0xff]  ;;  %v508_v63 = vld [vmem:[%s9850_s1 + $0xe38] sm:$0xff] }
 0x1c1   :  { %6859 = vmatprep.subr.mxu0 %v7248_v2  ;;  %6894 = vmatprep.subr.mxu1 %v7248_v2 }
 0x1c2   :  { %6860 = vmatpush3.msra.mxu0 %v481_v0  ;;  %6895 = vmatpush3.msra.mxu1 %v497_v1  ;;  %v524_v0 = vld [vmem:[%s9850_s1 + $0xeb8] sm:$0xff]  ;;  %v507_v1 = vld [vmem:[%s9850_s1 + $0xe30] sm:$0xff] }
 0x1c3   :  { %6861 = vmatprep.subr.mxu0 %v7248_v2  ;;  %6896 = vmatprep.subr.mxu1 %v7248_v2 }
 0x1c4   :  { %6862 = vmatpush3.msra.mxu0 %v480_v3  ;;  %6897 = vmatpush3.msra.mxu1 %v496_v4  ;;  %v523_v3 = vld [vmem:[%s9850_s1 + $0xeb0] sm:$0xff]  ;;  %v506_v4 = vld [vmem:[%s9850_s1 + $0xe28] sm:$0xff] }
 0x1c5   :  { %6863 = vmatprep.subr.mxu0 %v7248_v2  ;;  %6898 = vmatprep.subr.mxu1 %v7248_v2 }
 0x1c6   :  { %6864 = vmatpush3.msra.mxu0 %v479_v5  ;;  %6899 = vmatpush3.msra.mxu1 %v495_v6  ;;  %v522_v5 = vld [vmem:[%s9850_s1 + $0xea8] sm:$0xff]  ;;  %v505_v6 = vld [vmem:[%s9850_s1 + $0xe20] sm:$0xff] }
 0x1c7   :  { %6865 = vmatprep.subr.mxu0 %v7248_v2  ;;  %6900 = vmatprep.subr.mxu1 %v7248_v2 }
 0x1c8   :  { %6866 = vmatpush3.msra.mxu0 %v478_v7  ;;  %6901 = vmatpush3.msra.mxu1 %v494_v8  ;;  %v521_v7 = vld [vmem:[%s9850_s1 + $0xea0] sm:$0xff] }
 0x1c9   :  { %6867 = vmatprep.subr.mxu0 %v7248_v2  ;;  %6902 = vmatprep.subr.mxu1 %v7248_v2 }
 0x1ca   :  { %6868 = vmatpush3.msra.mxu0 %v477_v9  ;;  %6903 = vmatpush3.msra.mxu1 %v493_v10  ;;  %v504_v9 = vld [vmem:[%s9850_s1 + $0xe18] sm:$0xff] }
 0x1cb   :  { %6869 = vmatprep.subr.mxu0 %v7248_v2  ;;  %6904 = vmatprep.subr.mxu1 %v7248_v2  ;;  %v520_v10 = vld [vmem:[%s9850_s1 + $0xe98] sm:$0xff] }
 0x1cc   :  { %6870 = vmatpush3.msra.mxu0 %v476_v12  ;;  %6905 = vmatpush3.msra.mxu1 %v492_v13 }
 0x1cd   :  { %6871 = vmatprep.subr.mxu0 %v7248_v2  ;;  %6906 = vmatprep.subr.mxu1 %v7248_v2 }
 0x1ce   :  { %6872 = vmatpush3.msra.mxu0 %v475_v16  ;;  %6907 = vmatpush3.msra.mxu1 %v491_v17  ;;  %v503_v16 = vld [vmem:[%s9850_s1 + $0xe10] sm:$0xff] }
 0x1cf   :  { %6873 = vmatprep.subr.mxu0 %v7248_v2  ;;  %6908 = vmatprep.subr.mxu1 %v7248_v2  ;;  %v9197_v23 = vpop.f32.mrf.mxu0  ;;  %v519_v17 = vld [vmem:[%s9850_s1 + $0xe90] sm:$0xff] }
 0x1d0   :  { %6874 = vmatpush3.msra.mxu0 %v474_v19  ;;  %6909 = vmatpush3.msra.mxu1 %v490_v20  ;;  %v502_v20 = vld [vmem:[%s9850_s1 + $0xe08] sm:$0xff] }
 0x1d1   :  { %6875 = vmatprep.subr.mxu0 %v7248_v2  ;;  %6910 = vmatprep.subr.mxu1 %v7248_v2  ;;  %v9207_v26 = vpop.f32.mrf.mxu1  ;;  %v6467_v27 = vpop.f32.mrf.mxu0 }
 0x1d2   :  { %6876 = vmatpush3.msra.mxu0 %v473_v21  ;;  %6911 = vmatpush3.msra.mxu1 %v489_v22  ;;  %v518_v21 = vld [vmem:[%s9850_s1 + $0xe88] sm:$0xff]  ;;  %v501_v22 = vld [vmem:[%s9850_s1 + $0xe00] sm:$0xff]  ;;  %v50_v27 = vld [vmem:[%s9849_s0 + $0x3a] sm:$0x3] }
 0x1d3   :  { %6877 = vmatprep.subr.mxu0 %v7248_v2  ;;  %6912 = vmatprep.subr.mxu1 %v7248_v2  ;;  %v6502_v30 = vpop.f32.mrf.mxu1 }
 0x1d4   :  { %6878 = vmatpush3.msra.mxu0 %v472_v24  ;;  %6913 = vmatpush3.msra.mxu1 %v488_v25  ;;  %v517_v24 = vld [vmem:[%s9850_s1 + $0xe80] sm:$0xff]  ;;  %v49_v25 = vld [vmem:[%s9849_s0 + $0x38] sm:$0x3]  ;;  %v547_v30 = vld [vmem:[%s9850_s1 + $0xf70] sm:$0xff] }
 0x1d5   :  { %6879 = vmatprep.subr.mxu0 %v7248_v2  ;;  %6914 = vmatprep.subr.mxu1 %v7248_v2 }
 0x1d6   :  { %6880 = vmatpush3.msra.mxu0 %v471_v28  ;;  %6915 = vmatpush3.msra.mxu1 %v487_v29  ;;  %v548_v28 = vld [vmem:[%s9850_s1 + $0xf78] sm:$0xff] }
 0x1d7   :  { %6881 = vmatprep.subr.mxu0 %v7248_v2  ;;  %6916 = vmatprep.subr.mxu1 %v7248_v2  ;;  %v564_v29 = vld [vmem:[%s9850_s1 + $0xff8] sm:$0xff] }
 0x1d8   :  { %6882 = vmatpush3.msra.mxu0 %v470_v31  ;;  %6917 = vmatpush3.msra.mxu1 %v486_v33  ;;  %v563_v31 = vld [vmem:[%s9850_s1 + $0xff0] sm:$0xff]  ;;  %v546_v33 = vld [vmem:[%s9850_s1 + $0xf68] sm:$0xff] }
 0x1d9   :  { %6883 = vmatprep.subr.mxu0 %v7248_v2  ;;  %6918 = vmatprep.subr.mxu1 %v7248_v2 }
 0x1da   :  { %6884 = vmatpush3.msra.mxu0 %v469_v34  ;;  %6885 = vmatprep.mubr.msk.f32.mxu0 %vm7249_vm0, %v7248_v2  ;;  %v562_v34 = vld [vmem:[%s9850_s1 + $0xfe8] sm:$0xff] }
 0x1db   :  { %6919 = vmatpush3.msra.mxu1 %v485_v36  ;;  %6886 = vmatmul.mubr.f32.vlgmr.msra.gmra.mxu0 %v47_v37  ;;  %v545_v36 = vld [vmem:[%s9850_s1 + $0xf60] sm:$0xff] }
 0x1dc   :  { %6920 = vmatprep.mubr.msk.f32.mxu1 %vm7249_vm0, %v7248_v2  ;;  %6923 = vmatprep.subr.mxu0 %v7248_v2  ;;  %v561_v37 = vld [vmem:[%s9850_s1 + $0xfe0] sm:$0xff] }
 0x1dd   :  { %6958 = vmatprep.subr.mxu1 %v7248_v2  ;;  %6921 = vmatmul.mubr.f32.vlgmr.msra.gmra.mxu1 %v48_v39  ;;  %v544_v39 = vld [vmem:[%s9850_s1 + $0xf58] sm:$0xff] }
 0x1de   :  { %6924 = vmatpush3.msra.mxu0 %v516_v41  ;;  %6959 = vmatpush3.msra.mxu1 %v532_v44  ;;  %v560_v41 = vld [vmem:[%s9850_s1 + $0xfd8] sm:$0xff]  ;;  %v543_v44 = vld [vmem:[%s9850_s1 + $0xf50] sm:$0xff] }
 0x1df   :  { %6925 = vmatprep.subr.mxu0 %v7248_v2  ;;  %6960 = vmatprep.subr.mxu1 %v7248_v2 }
 0x1e0   :  { %6926 = vmatpush3.msra.mxu0 %v515_v45  ;;  %6961 = vmatpush3.msra.mxu1 %v531_v46  ;;  %v559_v45 = vld [vmem:[%s9850_s1 + $0xfd0] sm:$0xff]  ;;  %v542_v46 = vld [vmem:[%s9850_s1 + $0xf48] sm:$0xff] }
 0x1e1   :  { %6927 = vmatprep.subr.mxu0 %v7248_v2  ;;  %6962 = vmatprep.subr.mxu1 %v7248_v2 }
 0x1e2   :  { %6928 = vmatpush3.msra.mxu0 %v514_v47  ;;  %6963 = vmatpush3.msra.mxu1 %v530_v48  ;;  %v558_v47 = vld [vmem:[%s9850_s1 + $0xfc8] sm:$0xff]  ;;  %v541_v48 = vld [vmem:[%s9850_s1 + $0xf40] sm:$0xff] }
 0x1e3   :  { %6929 = vmatprep.subr.mxu0 %v7248_v2  ;;  %6964 = vmatprep.subr.mxu1 %v7248_v2 }
 0x1e4   :  { %6930 = vmatpush3.msra.mxu0 %v513_v49  ;;  %6965 = vmatpush3.msra.mxu1 %v529_v50  ;;  %v557_v49 = vld [vmem:[%s9850_s1 + $0xfc0] sm:$0xff]  ;;  %v540_v50 = vld [vmem:[%s9850_s1 + $0xf38] sm:$0xff] }
 0x1e5   :  { %6931 = vmatprep.subr.mxu0 %v7248_v2  ;;  %6966 = vmatprep.subr.mxu1 %v7248_v2 }
 0x1e6   :  { %6932 = vmatpush3.msra.mxu0 %v512_v51  ;;  %6967 = vmatpush3.msra.mxu1 %v528_v52  ;;  %v556_v51 = vld [vmem:[%s9850_s1 + $0xfb8] sm:$0xff]  ;;  %v539_v52 = vld [vmem:[%s9850_s1 + $0xf30] sm:$0xff] }
 0x1e7   :  { %6933 = vmatprep.subr.mxu0 %v7248_v2  ;;  %6968 = vmatprep.subr.mxu1 %v7248_v2 }
 0x1e8   :  { %6934 = vmatpush3.msra.mxu0 %v511_v53  ;;  %6969 = vmatpush3.msra.mxu1 %v527_v54  ;;  %v555_v53 = vld [vmem:[%s9850_s1 + $0xfb0] sm:$0xff]  ;;  %v538_v54 = vld [vmem:[%s9850_s1 + $0xf28] sm:$0xff] }
 0x1e9   :  { %6935 = vmatprep.subr.mxu0 %v7248_v2  ;;  %6970 = vmatprep.subr.mxu1 %v7248_v2 }
 0x1ea   :  { %6936 = vmatpush3.msra.mxu0 %v510_v57  ;;  %6971 = vmatpush3.msra.mxu1 %v526_v59  ;;  %v554_v57 = vld [vmem:[%s9850_s1 + $0xfa8] sm:$0xff]  ;;  %v537_v59 = vld [vmem:[%s9850_s1 + $0xf20] sm:$0xff] }
 0x1eb   :  { %6937 = vmatprep.subr.mxu0 %v7248_v2  ;;  %6972 = vmatprep.subr.mxu1 %v7248_v2 }
 0x1ec   :  { %6938 = vmatpush3.msra.mxu0 %v509_v61  ;;  %6973 = vmatpush3.msra.mxu1 %v525_v62  ;;  %v553_v61 = vld [vmem:[%s9850_s1 + $0xfa0] sm:$0xff] }
 0x1ed   :  { %6939 = vmatprep.subr.mxu0 %v7248_v2  ;;  %6974 = vmatprep.subr.mxu1 %v7248_v2 }
 0x1ee   :  { %6940 = vmatpush3.msra.mxu0 %v508_v63  ;;  %6975 = vmatpush3.msra.mxu1 %v524_v0  ;;  %v536_v63 = vld [vmem:[%s9850_s1 + $0xf18] sm:$0xff] }
 0x1ef   :  { %6941 = vmatprep.subr.mxu0 %v7248_v2  ;;  %6976 = vmatprep.subr.mxu1 %v7248_v2  ;;  %v552_v0 = vld [vmem:[%s9850_s1 + $0xf98] sm:$0xff] }
 0x1f0   :  { %6942 = vmatpush3.msra.mxu0 %v507_v1  ;;  %6977 = vmatpush3.msra.mxu1 %v523_v3 }
 0x1f1   :  { %6943 = vmatprep.subr.mxu0 %v7248_v2  ;;  %6978 = vmatprep.subr.mxu1 %v7248_v2  ;;  %v9339_v8 = vpop.f32.mrf.mxu0 }
 0x1f2   :  { %6944 = vmatpush3.msra.mxu0 %v506_v4  ;;  %6979 = vmatpush3.msra.mxu1 %v522_v5  ;;  %v535_v4 = vld [vmem:[%s9850_s1 + $0xf10] sm:$0xff] }
 0x1f3   :  { %6945 = vmatprep.subr.mxu0 %v7248_v2  ;;  %6980 = vmatprep.subr.mxu1 %v7248_v2  ;;  %v9349_v12 = vpop.f32.mrf.mxu1  ;;  %v6537_v13 = vpop.f32.mrf.mxu0  ;;  %v551_v5 = vld [vmem:[%s9850_s1 + $0xf90] sm:$0xff] }
 0x1f4   :  { %6946 = vmatpush3.msra.mxu0 %v505_v6  ;;  %6981 = vmatpush3.msra.mxu1 %v521_v7  ;;  %v534_v7 = vld [vmem:[%s9850_s1 + $0xf08] sm:$0xff]  ;;  %v533_v13 = vld [vmem:[%s9850_s1 + $0xf00] sm:$0xff] }
 0x1f5   :  { %6947 = vmatprep.subr.mxu0 %v7248_v2  ;;  %6982 = vmatprep.subr.mxu1 %v7248_v2  ;;  %v6572_v19 = vpop.f32.mrf.mxu1 }
 0x1f6   :  { %6948 = vmatpush3.msra.mxu0 %v504_v9  ;;  %6983 = vmatpush3.msra.mxu1 %v520_v10  ;;  %v550_v9 = vld [vmem:[%s9850_s1 + $0xf88] sm:$0xff]  ;;  %v9512_v10 = vld [vmem:[%s9851_s2] ss:$0 sm:$0xff]  ;;  %v52_v19 = vld [vmem:[%s9849_s0 + $0x3e] sm:$0x3] }
 0x1f7   :  { %6949 = vmatprep.subr.mxu0 %v7248_v2  ;;  %6984 = vmatprep.subr.mxu1 %v7248_v2 }
 0x1f8   :  { %6950 = vmatpush3.msra.mxu0 %v503_v16  ;;  %6985 = vmatpush3.msra.mxu1 %v519_v17  ;;  %v549_v16 = vld [vmem:[%s9850_s1 + $0xf80] sm:$0xff]  ;;  %v51_v17 = vld [vmem:[%s9849_s0 + $0x3c] sm:$0x3] }
 0x1f9   :  { %6951 = vmatprep.subr.mxu0 %v7248_v2  ;;  %6986 = vmatprep.subr.mxu1 %v7248_v2 }
 0x1fa   :  { %6952 = vmatpush3.msra.mxu0 %v502_v20  ;;  %6987 = vmatpush3.msra.mxu1 %v518_v21  ;;  %v639_v20 = vadd.f32 %v9512_v10, %v8203_v40  ;;  %v709_v21 = vadd.f32 %v9512_v10, %v8213_v43  ;;  %v2845_v40 = vld [vmem:[%s9852_s3 + $0x8] sm:$0xff] }
 0x1fb   :  { %6953 = vmatprep.subr.mxu0 %v7248_v2  ;;  %6988 = vmatprep.subr.mxu1 %v7248_v2 }
 0x1fc   :  { %6954 = vmatpush3.msra.mxu0 %v501_v22  ;;  %6955 = vmatprep.mubr.msk.f32.mxu0 %vm7249_vm0, %v7248_v2  ;;  %v2844_v22 = vld [vmem:[%s9852_s3] sm:$0xff]  ;;  %v2812_v43 = vmax.f32 %v639_v20, 0.0  ;;  %v2862_v20 = vld [vmem:[%s9852_s3 + $0x90] sm:$0xff] }
 0x1fd   :  { %6989 = vmatpush3.msra.mxu1 %v517_v24  ;;  %6956 = vmatmul.mubr.f32.vlgmr.msra.gmra.mxu0 %v49_v25  ;;  %v2813_v24 = vmax.f32 %v709_v21, 0.0  ;;  %v779_v25 = vadd.f32 %v9512_v10, %v8345_v15  ;;  %v2847_v15 = vld [vmem:[%s9852_s3 + $0x18] sm:$0xff] }
 0x1fe   :  { %6990 = vmatprep.mubr.msk.f32.mxu1 %vm7249_vm0, %v7248_v2  ;;  %6993 = vmatprep.subr.mxu0 %v7248_v2 }
 0x1ff   :  { %7028 = vmatprep.subr.mxu1 %v7248_v2  ;;  %6991 = vmatmul.mubr.f32.vlgmr.msra.gmra.mxu1 %v50_v27  ;;  %v849_v27 = vadd.f32 %v9512_v10, %v8355_v18  ;;  %v2814_v18 = vmax.f32 %v779_v25, 0.0 }
 0x200   :  { %6994 = vmatpush3.msra.mxu0 %v548_v28  ;;  %7029 = vmatpush3.msra.mxu1 %v564_v29  ;;  %v2846_v28 = vld [vmem:[%s9852_s3 + $0x10] sm:$0xff] }
 0x201   :  { %6995 = vmatprep.subr.mxu0 %v7248_v2  ;;  %7030 = vmatprep.subr.mxu1 %v7248_v2  ;;  %v2815_v29 = vmax.f32 %v849_v27, 0.0 }
 0x202   :  { %6996 = vmatpush3.msra.mxu0 %v547_v30  ;;  %7031 = vmatpush3.msra.mxu1 %v563_v31  ;;  %v919_v30 = vadd.f32 %v9512_v10, %v8487_v55  ;;  %v989_v31 = vadd.f32 %v9512_v10, %v8497_v58  ;;  %v2849_v55 = vld [vmem:[%s9852_s3 + $0x28] sm:$0xff] }
 0x203   :  { %6997 = vmatprep.subr.mxu0 %v7248_v2  ;;  %7032 = vmatprep.subr.mxu1 %v7248_v2 }
 0x204   :  { %6998 = vmatpush3.msra.mxu0 %v546_v33  ;;  %7033 = vmatpush3.msra.mxu1 %v562_v34  ;;  %v2848_v33 = vld [vmem:[%s9852_s3 + $0x20] sm:$0xff]  ;;  %v2816_v58 = vmax.f32 %v919_v30, 0.0  ;;  %v2817_v34 = vmax.f32 %v989_v31, 0.0 }
 0x205   :  { %6999 = vmatprep.subr.mxu0 %v7248_v2  ;;  %7034 = vmatprep.subr.mxu1 %v7248_v2 }
 0x206   :  { %7000 = vmatpush3.msra.mxu0 %v545_v36  ;;  %7035 = vmatpush3.msra.mxu1 %v561_v37  ;;  %v1059_v36 = vadd.f32 %v9512_v10, %v8629_v32  ;;  %v1129_v37 = vadd.f32 %v9512_v10, %v8639_v35  ;;  %v2851_v32 = vld [vmem:[%s9852_s3 + $0x38] sm:$0xff] }
 0x207   :  { %7001 = vmatprep.subr.mxu0 %v7248_v2  ;;  %7036 = vmatprep.subr.mxu1 %v7248_v2 }
 0x208   :  { %7002 = vmatpush3.msra.mxu0 %v544_v39  ;;  %7037 = vmatpush3.msra.mxu1 %v560_v41  ;;  %v2850_v39 = vld [vmem:[%s9852_s3 + $0x30] sm:$0xff]  ;;  %v2818_v35 = vmax.f32 %v1059_v36, 0.0  ;;  %v2819_v41 = vmax.f32 %v1129_v37, 0.0  ;;  %v2869_v37 = vld [vmem:[%s9852_s3 + $0xc8] sm:$0xff] }
 0x209   :  { %7003 = vmatprep.subr.mxu0 %v7248_v2  ;;  %7038 = vmatprep.subr.mxu1 %v7248_v2 }
 0x20a   :  { %7004 = vmatpush3.msra.mxu0 %v543_v44  ;;  %7039 = vmatpush3.msra.mxu1 %v559_v45  ;;  %v1199_v44 = vadd.f32 %v9512_v10, %v8771_v11  ;;  %v1269_v45 = vadd.f32 %v9512_v10, %v8781_v14  ;;  %v2853_v11 = vld [vmem:[%s9852_s3 + $0x48] sm:$0xff] }
 0x20b   :  { %7005 = vmatprep.subr.mxu0 %v7248_v2  ;;  %7040 = vmatprep.subr.mxu1 %v7248_v2 }
 0x20c   :  { %7006 = vmatpush3.msra.mxu0 %v542_v46  ;;  %7041 = vmatpush3.msra.mxu1 %v558_v47  ;;  %v2852_v46 = vld [vmem:[%s9852_s3 + $0x40] sm:$0xff]  ;;  %v2820_v14 = vmax.f32 %v1199_v44, 0.0  ;;  %v2821_v47 = vmax.f32 %v1269_v45, 0.0 }
 0x20d   :  { %7007 = vmatprep.subr.mxu0 %v7248_v2  ;;  %7042 = vmatprep.subr.mxu1 %v7248_v2 }
 0x20e   :  { %7008 = vmatpush3.msra.mxu0 %v541_v48  ;;  %7043 = vmatpush3.msra.mxu1 %v557_v49  ;;  %v1339_v48 = vadd.f32 %v9512_v10, %v8913_v56  ;;  %v1409_v49 = vadd.f32 %v9512_v10, %v8923_v60  ;;  %v2855_v56 = vld [vmem:[%s9852_s3 + $0x58] sm:$0xff] }
 0x20f   :  { %7009 = vmatprep.subr.mxu0 %v7248_v2  ;;  %7044 = vmatprep.subr.mxu1 %v7248_v2 }
 0x210   :  { %7010 = vmatpush3.msra.mxu0 %v540_v50  ;;  %7045 = vmatpush3.msra.mxu1 %v556_v51  ;;  %v2854_v50 = vld [vmem:[%s9852_s3 + $0x50] sm:$0xff]  ;;  %v2822_v51 = vmax.f32 %v1339_v48, 0.0 }
 0x211   :  { %7011 = vmatprep.subr.mxu0 %v7248_v2  ;;  %7046 = vmatprep.subr.mxu1 %v7248_v2 }
 0x212   :  { %7012 = vmatpush3.msra.mxu0 %v539_v52  ;;  %7047 = vmatpush3.msra.mxu1 %v555_v53  ;;  %v2823_v52 = vmax.f32 %v1409_v49, 0.0  ;;  %v1479_v53 = vadd.f32 %v9512_v10, %v9055_v38  ;;  %v2857_v38 = vld [vmem:[%s9852_s3 + $0x68] sm:$0xff] }
 0x213   :  { %7013 = vmatprep.subr.mxu0 %v7248_v2  ;;  %7048 = vmatprep.subr.mxu1 %v7248_v2  ;;  %v9481_v62 = vpop.f32.mrf.mxu0 }
 0x214   :  { %7014 = vmatpush3.msra.mxu0 %v538_v54  ;;  %7049 = vmatpush3.msra.mxu1 %v554_v57  ;;  %v1549_v54 = vadd.f32 %v9512_v10, %v9065_v42  ;;  %v2856_v57 = vld [vmem:[%s9852_s3 + $0x60] sm:$0xff] }
 0x215   :  { %7015 = vmatprep.subr.mxu0 %v7248_v2  ;;  %7050 = vmatprep.subr.mxu1 %v7248_v2  ;;  %v9491_v1 = vpop.f32.mrf.mxu1  ;;  %v6607_v3 = vpop.f32.mrf.mxu0 }
 0x216   :  { %7016 = vmatpush3.msra.mxu0 %v537_v59  ;;  %7051 = vmatpush3.msra.mxu1 %v553_v61  ;;  %v1619_v3 = vadd.f32 %v9512_v10, %v9197_v23  ;;  %v2859_v23 = vld [vmem:[%s9852_s3 + $0x78] sm:$0xff] }
 0x217   :  { %7017 = vmatprep.subr.mxu0 %v7248_v2  ;;  %7052 = vmatprep.subr.mxu1 %v7248_v2  ;;  %v6642_v6 = vpop.f32.mrf.mxu1 }
 0x218   :  { %7018 = vmatpush3.msra.mxu0 %v536_v63  ;;  %7053 = vmatpush3.msra.mxu1 %v552_v0  ;;  %v2824_v63 = vmax.f32 %v1479_v53, 0.0  ;;  %v2825_v0 = vmax.f32 %v1549_v54, 0.0 }
 0x219   :  { %7019 = vmatprep.subr.mxu0 %v7248_v2  ;;  %7054 = vmatprep.subr.mxu1 %v7248_v2 }
 0x21a   :  { %7020 = vmatpush3.msra.mxu0 %v535_v4  ;;  %7055 = vmatpush3.msra.mxu1 %v551_v5  ;;  %v1689_v4 = vadd.f32 %v9512_v10, %v9207_v26  ;;  %v2858_v5 = vld [vmem:[%s9852_s3 + $0x70] sm:$0xff]  ;;  %v2826_v26 = vmax.f32 %v1619_v3, 0.0 }
 0x21b   :  { %7021 = vmatprep.subr.mxu0 %v7248_v2  ;;  %7056 = vmatprep.subr.mxu1 %v7248_v2  ;;  %v2874_v3 = vld [vmem:[%s9852_s3 + $0xf0] sm:$0xff] }
 0x21c   :  { %7022 = vmatpush3.msra.mxu0 %v534_v7  ;;  %7057 = vmatpush3.msra.mxu1 %v550_v9  ;;  %v2827_v6 = vmax.f32 %v1689_v4, 0.0  ;;  %v1759_v7 = vadd.f32 %v9512_v10, %v9339_v8  ;;  %v1829_v9 = vadd.f32 %v9512_v10, %v9349_v12  ;;  %v2861_v8 = vld [vmem:[%s9852_s3 + $0x88] sm:$0xff] }
 0x21d   :  { %7023 = vmatprep.subr.mxu0 %v7248_v2  ;;  %7058 = vmatprep.subr.mxu1 %v7248_v2 }
 0x21e   :  { %7024 = vmatpush3.msra.mxu0 %v533_v13  ;;  %7025 = vmatprep.mubr.msk.f32.mxu0 %vm7249_vm0, %v7248_v2  ;;  %v2860_v13 = vld [vmem:[%s9852_s3 + $0x80] sm:$0xff]  ;;  %v2828_v12 = vmax.f32 %v1759_v7, 0.0 }
 0x21f   :  { %7059 = vmatpush3.msra.mxu1 %v549_v16  ;;  %7060 = vmatprep.mubr.msk.f32.mxu1 %vm7249_vm0, %v7248_v2  ;;  %v2829_v16 = vmax.f32 %v1829_v9, 0.0 }
 0x220   :  { %7026 = vmatmul.mubr.f32.vlgmr.msra.gmra.mxu0 %v51_v17  ;;  %7061 = vmatmul.mubr.f32.vlgmr.msra.gmra.mxu1 %v52_v19  ;;  %v1899_v17 = vadd.f32 %v9512_v10, %v9481_v62  ;;  %v1969_v19 = vadd.f32 %v9512_v10, %v9491_v1  ;;  %v2863_v62 = vld [vmem:[%s9852_s3 + $0x98] sm:$0xff] }
 0x221   :  { %7063 = vmatprep.subr.mxu0 %v7248_v2  ;;  %7068 = vmatprep.subr.mxu1 %v7248_v2 }
 0x222   :  { %7064 = vmatpush3.msra.mxu0 %v2844_v22  ;;  %7065 = vmatprep.mubr.msk.f32.mxu0 %vm7249_vm0, %v7248_v2  ;;  %v2830_v1 = vmax.f32 %v1899_v17, 0.0  ;;  %v2831_v21 = vmax.f32 %v1969_v19, 0.0 }
 0x223   :  { %7069 = vmatpush3.msra.mxu1 %v2845_v40  ;;  %7070 = vmatprep.mubr.msk.f32.mxu1 %vm7249_vm0, %v7248_v2 }
 0x224   :  { %7066 = vmatmul.mubr.msk.f32.vlgmr.msra.gmra.mxu0 %vm2876_vm1, %v2812_v43  ;;  %7071 = vmatmul.mubr.msk.f32.vlgmr.msra.gmra.mxu1 %vm2876_vm1, %v2813_v24  ;;  %v2864_v43 = vld [vmem:[%s9852_s3 + $0xa0] sm:$0xff]  ;;  %v2865_v24 = vld [vmem:[%s9852_s3 + $0xa8] sm:$0xff] }
 0x225   :  { %7073 = vmatprep.subr.mxu0 %v7248_v2  ;;  %7078 = vmatprep.subr.mxu1 %v7248_v2 }
 0x226   :  { %7074 = vmatpush3.msra.mxu0 %v2846_v28  ;;  %7075 = vmatprep.mubr.msk.f32.mxu0 %vm7249_vm0, %v7248_v2  ;;  %v2866_v28 = vld [vmem:[%s9852_s3 + $0xb0] sm:$0xff] }
 0x227   :  { %7079 = vmatpush3.msra.mxu1 %v2847_v15  ;;  %7080 = vmatprep.mubr.msk.f32.mxu1 %vm7249_vm0, %v7248_v2  ;;  %v2867_v15 = vld [vmem:[%s9852_s3 + $0xb8] sm:$0xff] }
 0x228   :  { %7076 = vmatmul.mubr.msk.f32.vlgmr.msra.gmra.mxu0 %vm2876_vm1, %v2814_v18  ;;  %7081 = vmatmul.mubr.msk.f32.vlgmr.msra.gmra.mxu1 %vm2876_vm1, %v2815_v29 }
 0x229   :  { %7083 = vmatprep.subr.mxu0 %v7248_v2  ;;  %7088 = vmatprep.subr.mxu1 %v7248_v2 }
 0x22a   :  { %7084 = vmatpush3.msra.mxu0 %v2848_v33  ;;  %7085 = vmatprep.mubr.msk.f32.mxu0 %vm7249_vm0, %v7248_v2 }
 0x22b   :  { %7089 = vmatpush3.msra.mxu1 %v2849_v55  ;;  %7090 = vmatprep.mubr.msk.f32.mxu1 %vm7249_vm0, %v7248_v2 }
 0x22c   :  { %7086 = vmatmul.mubr.msk.f32.vlgmr.msra.gmra.mxu0 %vm2876_vm1, %v2816_v58  ;;  %7091 = vmatmul.mubr.msk.f32.vlgmr.msra.gmra.mxu1 %vm2876_vm1, %v2817_v34  ;;  %v2868_v58 = vld [vmem:[%s9852_s3 + $0xc0] sm:$0xff] }
 0x22d   :  { %7093 = vmatprep.subr.mxu0 %v7248_v2  ;;  %7098 = vmatprep.subr.mxu1 %v7248_v2 }
 0x22e   :  { %7094 = vmatpush3.msra.mxu0 %v2850_v39  ;;  %7095 = vmatprep.mubr.msk.f32.mxu0 %vm7249_vm0, %v7248_v2 }
 0x22f   :  { %7099 = vmatpush3.msra.mxu1 %v2851_v32  ;;  %7100 = vmatprep.mubr.msk.f32.mxu1 %vm7249_vm0, %v7248_v2 }
 0x230   :  { %7096 = vmatmul.mubr.msk.f32.vlgmr.msra.gmra.mxu0 %vm2876_vm1, %v2818_v35  ;;  %7101 = vmatmul.mubr.msk.f32.vlgmr.msra.gmra.mxu1 %vm2876_vm1, %v2819_v41 }
 0x231   :  { %7103 = vmatprep.subr.mxu0 %v7248_v2  ;;  %7108 = vmatprep.subr.mxu1 %v7248_v2 }
 0x232   :  { %7104 = vmatpush3.msra.mxu0 %v2852_v46  ;;  %7105 = vmatprep.mubr.msk.f32.mxu0 %vm7249_vm0, %v7248_v2  ;;  %v2870_v46 = vld [vmem:[%s9852_s3 + $0xd0] sm:$0xff] }
 0x233   :  { %7109 = vmatpush3.msra.mxu1 %v2853_v11  ;;  %7110 = vmatprep.mubr.msk.f32.mxu1 %vm7249_vm0, %v7248_v2 }
 0x234   :  { %7106 = vmatmul.mubr.msk.f32.vlgmr.msra.gmra.mxu0 %vm2876_vm1, %v2820_v14  ;;  %7111 = vmatmul.mubr.msk.f32.vlgmr.msra.gmra.mxu1 %vm2876_vm1, %v2821_v47  ;;  %v2871_v47 = vld [vmem:[%s9852_s3 + $0xd8] sm:$0xff] }
 0x235   :  { %7113 = vmatprep.subr.mxu0 %v7248_v2  ;;  %7118 = vmatprep.subr.mxu1 %v7248_v2  ;;  %v2038_v60 = vpop.f32.mrf.mxu0 }
 0x236   :  { %7114 = vmatpush3.msra.mxu0 %v2854_v50  ;;  %7115 = vmatprep.mubr.msk.f32.mxu0 %vm7249_vm0, %v7248_v2  ;;  %v2039_v22 = vadd.f32 %v9512_v10, %v2038_v60 }
 0x237   :  { %7119 = vmatpush3.msra.mxu1 %v2855_v56  ;;  %7120 = vmatprep.mubr.msk.f32.mxu1 %vm7249_vm0, %v7248_v2  ;;  %v2108_v59 = vpop.f32.mrf.mxu1  ;;  %v6677_v61 = vpop.f32.mrf.mxu0 }
 0x238   :  { %7116 = vmatmul.mubr.msk.f32.vlgmr.msra.gmra.mxu0 %vm2876_vm1, %v2822_v51  ;;  %7121 = vmatmul.mubr.msk.f32.vlgmr.msra.gmra.mxu1 %vm2876_vm1, %v2823_v52  ;;  %v2109_v40 = vadd.f32 %v9512_v10, %v2108_v59  ;;  %v2832_v25 = vmax.f32 %v2039_v22, 0.0  ;;  %v2872_v52 = vld [vmem:[%s9852_s3 + $0xe0] sm:$0xff] }
 0x239   :  { %7123 = vmatprep.subr.mxu0 %v7248_v2  ;;  %7128 = vmatprep.subr.mxu1 %v7248_v2  ;;  %v6712_v42 = vpop.f32.mrf.mxu1 }
 0x23a   :  { %7124 = vmatpush3.msra.mxu0 %v2856_v57  ;;  %7125 = vmatprep.mubr.msk.f32.mxu0 %vm7249_vm0, %v7248_v2  ;;  %v2833_v27 = vmax.f32 %v2109_v40, 0.0  ;;  %v2873_v57 = vld [vmem:[%s9852_s3 + $0xe8] sm:$0xff] }
 0x23b   :  { %7129 = vmatpush3.msra.mxu1 %v2857_v38  ;;  %7130 = vmatprep.mubr.msk.f32.mxu1 %vm7249_vm0, %v7248_v2 }
 0x23c   :  { %7126 = vmatmul.mubr.msk.f32.vlgmr.msra.gmra.mxu0 %vm2876_vm1, %v2824_v63  ;;  %7131 = vmatmul.mubr.msk.f32.vlgmr.msra.gmra.mxu1 %vm2876_vm1, %v2825_v0 }
 0x23d   :  { %7133 = vmatprep.subr.mxu0 %v7248_v2  ;;  %7138 = vmatprep.subr.mxu1 %v7248_v2 }
 0x23e   :  { %7134 = vmatpush3.msra.mxu0 %v2858_v5  ;;  %7135 = vmatprep.mubr.msk.f32.mxu0 %vm7249_vm0, %v7248_v2 }
 0x23f   :  { %7139 = vmatpush3.msra.mxu1 %v2859_v23  ;;  %7140 = vmatprep.mubr.msk.f32.mxu1 %vm7249_vm0, %v7248_v2  ;;  %v2875_v23 = vld [vmem:[%s9852_s3 + $0xf8] sm:$0xff] }
 0x240   :  { %7136 = vmatmul.mubr.msk.f32.vlgmr.msra.gmra.mxu0 %vm2876_vm1, %v2826_v26  ;;  %7141 = vmatmul.mubr.msk.f32.vlgmr.msra.gmra.mxu1 %vm2876_vm1, %v2827_v6 }
 0x241   :  { %7143 = vmatprep.subr.mxu0 %v7248_v2  ;;  %7148 = vmatprep.subr.mxu1 %v7248_v2 }
 0x242   :  { %7144 = vmatpush3.msra.mxu0 %v2860_v13  ;;  %7145 = vmatprep.mubr.msk.f32.mxu0 %vm7249_vm0, %v7248_v2 }
 0x243   :  { %7149 = vmatpush3.msra.mxu1 %v2861_v8  ;;  %7150 = vmatprep.mubr.msk.f32.mxu1 %vm7249_vm0, %v7248_v2 }
 0x244   :  { %7146 = vmatmul.mubr.msk.f32.vlgmr.msra.gmra.mxu0 %vm2876_vm1, %v2828_v12  ;;  %7151 = vmatmul.mubr.msk.f32.vlgmr.msra.gmra.mxu1 %vm2876_vm1, %v2829_v16 }
 0x245   :  { %7153 = vmatprep.subr.mxu0 %v7248_v2  ;;  %7158 = vmatprep.subr.mxu1 %v7248_v2 }
 0x246   :  { %7154 = vmatpush3.msra.mxu0 %v2862_v20  ;;  %7155 = vmatprep.mubr.msk.f32.mxu0 %vm7249_vm0, %v7248_v2 }
 0x247   :  { %7159 = vmatpush3.msra.mxu1 %v2863_v62  ;;  %7160 = vmatprep.mubr.msk.f32.mxu1 %vm7249_vm0, %v7248_v2 }
 0x248   :  { %7156 = vmatmul.mubr.msk.f32.vlgmr.msra.gmra.mxu0 %vm2876_vm1, %v2830_v1  ;;  %7161 = vmatmul.mubr.msk.f32.vlgmr.msra.gmra.mxu1 %vm2876_vm1, %v2831_v21 }
 0x249   :  { %7163 = vmatprep.subr.mxu0 %v7248_v2  ;;  %7168 = vmatprep.subr.mxu1 %v7248_v2 }
 0x24a   :  { %7164 = vmatpush3.msra.mxu0 %v2864_v43  ;;  %7165 = vmatprep.mubr.msk.f32.mxu0 %vm7249_vm0, %v7248_v2 }
 0x24b   :  { %7169 = vmatpush3.msra.mxu1 %v2865_v24  ;;  %7170 = vmatprep.mubr.msk.f32.mxu1 %vm7249_vm0, %v7248_v2 }
 0x24c   :  { %7166 = vmatmul.mubr.msk.f32.vlgmr.msra.gmra.mxu0 %vm2876_vm1, %v2832_v25  ;;  %7171 = vmatmul.mubr.msk.f32.vlgmr.msra.gmra.mxu1 %vm2876_vm1, %v2833_v27 }
 0x24d   :  { %7173 = vmatprep.subr.mxu0 %v7248_v2  ;;  %7175 = vmatprep.mubr.msk.f32.mxu0 %vm7249_vm0, %v7248_v2 }
 0x24e   :  { %7174 = vmatpush3.msra.mxu0 %v2866_v28  ;;  %7178 = vmatprep.subr.mxu1 %v7248_v2 }
 0x24f   :  { %7179 = vmatpush3.msra.mxu1 %v2867_v15  ;;  %7180 = vmatprep.mubr.msk.f32.mxu1 %vm7249_vm0, %v7248_v2 }
 0x250   :  { %7183 = vmatprep.subr.mxu0 %v7248_v2  ;;  %7188 = vmatprep.subr.mxu1 %v7248_v2 }
 0x257   :  { %v2178_v18 = vpop.f32.mrf.mxu0 }
 0x258   :  { %v2179_v29 = vadd.f32 %v9512_v10, %v2178_v18 }
 0x259   :  { %v2248_v30 = vpop.f32.mrf.mxu1  ;;  %v6747_v31 = vpop.f32.mrf.mxu0 }
 0x25a   :  { %v2834_v33 = vmax.f32 %v2179_v29, 0.0  ;;  %v2249_v55 = vadd.f32 %v9512_v10, %v2248_v30 }
 0x25b   :  { %v6782_v34 = vpop.f32.mrf.mxu1 }
 0x25c   :  { %v2835_v36 = vmax.f32 %v2249_v55, 0.0  ;;  %7176 = vmatmul.mubr.msk.f32.vlgmr.msra.gmra.mxu0 %vm2876_vm1, %v2834_v33 }
 0x25d   :  { %7184 = vmatpush3.msra.mxu0 %v2868_v58  ;;  %7185 = vmatprep.mubr.msk.f32.mxu0 %vm7249_vm0, %v7248_v2 }
 0x25e   :  { %7181 = vmatmul.mubr.msk.f32.vlgmr.msra.gmra.mxu1 %vm2876_vm1, %v2835_v36  ;;  %7193 = vmatprep.subr.mxu0 %v7248_v2 }
 0x25f   :  { %7189 = vmatpush3.msra.mxu1 %v2869_v37  ;;  %7190 = vmatprep.mubr.msk.f32.mxu1 %vm7249_vm0, %v7248_v2 }
 0x260   :  { %7198 = vmatprep.subr.mxu1 %v7248_v2 }
 0x279   :  { %v2318_v39 = vpop.f32.mrf.mxu0 }
 0x27a   :  { %v2319_v32 = vadd.f32 %v9512_v10, %v2318_v39 }
 0x27b   :  { %v2388_v35 = vpop.f32.mrf.mxu1  ;;  %v6817_v41 = vpop.f32.mrf.mxu0 }
 0x27c   :  { %v2836_v44 = vmax.f32 %v2319_v32, 0.0  ;;  %v2389_v45 = vadd.f32 %v9512_v10, %v2388_v35 }
 0x27d   :  { %v6852_v11 = vpop.f32.mrf.mxu1 }
 0x27e   :  { %v2837_v14 = vmax.f32 %v2389_v45, 0.0  ;;  %7186 = vmatmul.mubr.msk.f32.vlgmr.msra.gmra.mxu0 %vm2876_vm1, %v2836_v44 }
 0x27f   :  { %7194 = vmatpush3.msra.mxu0 %v2870_v46  ;;  %7195 = vmatprep.mubr.msk.f32.mxu0 %vm7249_vm0, %v7248_v2 }
 0x280   :  { %7191 = vmatmul.mubr.msk.f32.vlgmr.msra.gmra.mxu1 %vm2876_vm1, %v2837_v14  ;;  %7203 = vmatprep.subr.mxu0 %v7248_v2 }
 0x281   :  { %7199 = vmatpush3.msra.mxu1 %v2871_v47  ;;  %7200 = vmatprep.mubr.msk.f32.mxu1 %vm7249_vm0, %v7248_v2 }
 0x282   :  { %7208 = vmatprep.subr.mxu1 %v7248_v2 }
 0x29b   :  { %v2458_v48 = vpop.f32.mrf.mxu0 }
 0x29c   :  { %v2459_v49 = vadd.f32 %v9512_v10, %v2458_v48 }
 0x29d   :  { %v2528_v50 = vpop.f32.mrf.mxu1  ;;  %v6887_v56 = vpop.f32.mrf.mxu0 }
 0x29e   :  { %v2838_v60 = vmax.f32 %v2459_v49, 0.0  ;;  %v2529_v51 = vadd.f32 %v9512_v10, %v2528_v50 }
 0x29f   :  { %v6922_v53 = vpop.f32.mrf.mxu1 }
 0x2a0   :  { %v2839_v54 = vmax.f32 %v2529_v51, 0.0  ;;  %7196 = vmatmul.mubr.msk.f32.vlgmr.msra.gmra.mxu0 %vm2876_vm1, %v2838_v60 }
 0x2a1   :  { %7204 = vmatpush3.msra.mxu0 %v2872_v52  ;;  %7205 = vmatprep.mubr.msk.f32.mxu0 %vm7249_vm0, %v7248_v2 }
 0x2a2   :  { %7201 = vmatmul.mubr.msk.f32.vlgmr.msra.gmra.mxu1 %vm2876_vm1, %v2839_v54  ;;  %7213 = vmatprep.subr.mxu0 %v7248_v2 }
 0x2a3   :  { %7209 = vmatpush3.msra.mxu1 %v2873_v57  ;;  %7210 = vmatprep.mubr.msk.f32.mxu1 %vm7249_vm0, %v7248_v2 }
 0x2a4   :  { %7218 = vmatprep.subr.mxu1 %v7248_v2 }
 0x2bd   :  { %v2598_v59 = vpop.f32.mrf.mxu0 }
 0x2be   :  { %v2599_v61 = vadd.f32 %v9512_v10, %v2598_v59 }
 0x2bf   :  { %v2668_v38 = vpop.f32.mrf.mxu1  ;;  %v6957_v42 = vpop.f32.mrf.mxu0 }
 0x2c0   :  { %v2840_v63 = vmax.f32 %v2599_v61, 0.0  ;;  %v2669_v0 = vadd.f32 %v9512_v10, %v2668_v38 }
 0x2c1   :  { %v6992_v4 = vpop.f32.mrf.mxu1 }
 0x2c2   :  { %v2841_v5 = vmax.f32 %v2669_v0, 0.0  ;;  %7206 = vmatmul.mubr.msk.f32.vlgmr.msra.gmra.mxu0 %vm2876_vm1, %v2840_v63 }
 0x2c3   :  { %7214 = vmatpush3.msra.mxu0 %v2874_v3  ;;  %7215 = vmatprep.mubr.msk.f32.mxu0 %vm7249_vm0, %v7248_v2 }
 0x2c4   :  { %7211 = vmatmul.mubr.msk.f32.vlgmr.msra.gmra.mxu1 %vm2876_vm1, %v2841_v5 }
 0x2c5   :  { %7219 = vmatpush3.msra.mxu1 %v2875_v23  ;;  %7220 = vmatprep.mubr.msk.f32.mxu1 %vm7249_vm0, %v7248_v2 }
 0x2e0   :  { %v2738_v26 = vpop.f32.mrf.mxu0  ;;  %v2808_v6 = vpop.f32.mrf.mxu1 }
 0x2e1   :  { %v2739_v7 = vadd.f32 %v9512_v10, %v2738_v26  ;;  %v2809_v9 = vadd.f32 %v9512_v10, %v2808_v6 }
 0x2e2   :  { %v7027_v13 = vpop.f32.mrf.mxu0  ;;  %v7062_v8 = vpop.f32.mrf.mxu1 }
 0x2e3   :  { %v2842_v12 = vmax.f32 %v2739_v7, 0.0  ;;  %v2843_v16 = vmax.f32 %v2809_v9, 0.0 }
 0x2e4   :  { %v2946_v17 = vpop.f32.mrf.mxu0  ;;  %v3019_v19 = vpop.f32.mrf.mxu1 }
 0x2e5   :  { %v5214_v20 = vsel %vm5213_vm2, %v2946_v17, 0.0  ;;  %v5215_v62 = vsel %vm5213_vm2, %v3019_v19, 0.0  ;;  %7216 = vmatmul.mubr.msk.f32.vlgmr.msra.gmra.mxu0 %vm2876_vm1, %v2842_v12  ;;  %7221 = vmatmul.mubr.msk.f32.vlgmr.msra.gmra.mxu1 %vm2876_vm1, %v2843_v16 }
 0x2e6   :  { %v5216_v2 = vadd.f32 %v5215_v62, %v5214_v20  ;;  %v7067_v1 = vpop.f32.mrf.mxu0  ;;  %v7072_v21 = vpop.f32.mrf.mxu1 }
 0x2e8   :  { %v3092_v22 = vpop.f32.mrf.mxu0  ;;  %v3165_v10 = vpop.f32.mrf.mxu1 }
 0x2e9   :  { %v5217_v40 = vsel %vm5213_vm2, %v3092_v22, 0.0  ;;  %v5219_v27 = vsel %vm5213_vm2, %v3165_v10, 0.0 }
 0x2ea   :  { %v5218_v43 = vadd.f32 %v5217_v40, %v5216_v2  ;;  %v7077_v24 = vpop.f32.mrf.mxu0  ;;  %v7082_v25 = vpop.f32.mrf.mxu1 }
 0x2ec   :  { %v5220_v28 = vadd.f32 %v5219_v27, %v5218_v43  ;;  %v3238_v15 = vpop.f32.mrf.mxu0  ;;  %v3311_v18 = vpop.f32.mrf.mxu1 }
 0x2ed   :  { %v5221_v29 = vsel %vm5213_vm2, %v3238_v15, 0.0  ;;  %v5223_v55 = vsel %vm5213_vm2, %v3311_v18, 0.0 }
 0x2ee   :  { %v5222_v30 = vadd.f32 %v5221_v29, %v5220_v28  ;;  %v7087_v31 = vpop.f32.mrf.mxu0  ;;  %v7092_v33 = vpop.f32.mrf.mxu1 }
 0x2f0   :  { %v5224_v58 = vadd.f32 %v5223_v55, %v5222_v30  ;;  %v3384_v34 = vpop.f32.mrf.mxu0  ;;  %v3457_v36 = vpop.f32.mrf.mxu1 }
 0x2f1   :  { %v5225_v37 = vsel %vm5213_vm2, %v3384_v34, 0.0  ;;  %v5227_v41 = vsel %vm5213_vm2, %v3457_v36, 0.0 }
 0x2f2   :  { %v5226_v39 = vadd.f32 %v5225_v37, %v5224_v58  ;;  %v7097_v32 = vpop.f32.mrf.mxu0  ;;  %v7102_v35 = vpop.f32.mrf.mxu1 }
 0x2f4   :  { %v5228_v44 = vadd.f32 %v5227_v41, %v5226_v39  ;;  %v3530_v45 = vpop.f32.mrf.mxu0  ;;  %v3603_v46 = vpop.f32.mrf.mxu1 }
 0x2f5   :  { %v5229_v11 = vsel %vm5213_vm2, %v3530_v45, 0.0  ;;  %v5231_v49 = vsel %vm5213_vm2, %v3603_v46, 0.0 }
 0x2f6   :  { %v5230_v14 = vadd.f32 %v5229_v11, %v5228_v44  ;;  %v7107_v47 = vpop.f32.mrf.mxu0  ;;  %v7112_v48 = vpop.f32.mrf.mxu1 }
 0x2f8   :  { %v5232_v50 = vadd.f32 %v5231_v49, %v5230_v14  ;;  %v3676_v56 = vpop.f32.mrf.mxu0  ;;  %v3749_v60 = vpop.f32.mrf.mxu1 }
 0x2f9   :  { %v5233_v51 = vsel %vm5213_vm2, %v3676_v56, 0.0  ;;  %v5235_v57 = vsel %vm5213_vm2, %v3749_v60, 0.0 }
 0x2fa   :  { %v5234_v52 = vadd.f32 %v5233_v51, %v5232_v50  ;;  %v7117_v53 = vpop.f32.mrf.mxu0  ;;  %v7122_v54 = vpop.f32.mrf.mxu1 }
 0x2fc   :  { %v5236_v59 = vadd.f32 %v5235_v57, %v5234_v52  ;;  %v3822_v61 = vpop.f32.mrf.mxu0  ;;  %v3895_v38 = vpop.f32.mrf.mxu1 }
 0x2fd   :  { %v5237_v42 = vsel %vm5213_vm2, %v3822_v61, 0.0  ;;  %v5239_v4 = vsel %vm5213_vm2, %v3895_v38, 0.0 }
 0x2fe   :  { %v5238_v63 = vadd.f32 %v5237_v42, %v5236_v59  ;;  %v7127_v0 = vpop.f32.mrf.mxu0  ;;  %v7132_v3 = vpop.f32.mrf.mxu1 }
 0x300   :  { %v5240_v5 = vadd.f32 %v5239_v4, %v5238_v63  ;;  %v3968_v23 = vpop.f32.mrf.mxu0  ;;  %v4041_v26 = vpop.f32.mrf.mxu1 }
 0x301   :  { %v5241_v6 = vsel %vm5213_vm2, %v3968_v23, 0.0  ;;  %v5243_v8 = vsel %vm5213_vm2, %v4041_v26, 0.0 }
 0x302   :  { %v5242_v7 = vadd.f32 %v5241_v6, %v5240_v5  ;;  %v7137_v9 = vpop.f32.mrf.mxu0  ;;  %v7142_v13 = vpop.f32.mrf.mxu1 }
 0x304   :  { %v5244_v12 = vadd.f32 %v5243_v8, %v5242_v7  ;;  %v4114_v16 = vpop.f32.mrf.mxu0  ;;  %v4187_v17 = vpop.f32.mrf.mxu1 }
 0x305   :  { %v5245_v19 = vsel %vm5213_vm2, %v4114_v16, 0.0  ;;  %v5247_v1 = vsel %vm5213_vm2, %v4187_v17, 0.0 }
 0x306   :  { %v5246_v20 = vadd.f32 %v5245_v19, %v5244_v12  ;;  %v7147_v62 = vpop.f32.mrf.mxu0  ;;  %v7152_v2 = vpop.f32.mrf.mxu1  ;;  %v5334_v12 = vld [vmem:[%s9853_s4] ss:$0 sm:$0xff] }
 0x308   :  { %v5248_v21 = vadd.f32 %v5247_v1, %v5246_v20  ;;  %v4260_v22 = vpop.f32.mrf.mxu0  ;;  %v4333_v10 = vpop.f32.mrf.mxu1 }
 0x309   :  { %v5249_v40 = vsel %vm5213_vm2, %v4260_v22, 0.0  ;;  %v5251_v27 = vsel %vm5213_vm2, %v4333_v10, 0.0 }
 0x30a   :  { %v5250_v43 = vadd.f32 %v5249_v40, %v5248_v21  ;;  %v7157_v24 = vpop.f32.mrf.mxu0  ;;  %v7162_v25 = vpop.f32.mrf.mxu1 }
 0x30c   :  { %v5252_v28 = vadd.f32 %v5251_v27, %v5250_v43  ;;  %v4406_v15 = vpop.f32.mrf.mxu0  ;;  %v4479_v18 = vpop.f32.mrf.mxu1 }
 0x30d   :  { %v5253_v29 = vsel %vm5213_vm2, %v4406_v15, 0.0  ;;  %v5255_v55 = vsel %vm5213_vm2, %v4479_v18, 0.0 }
 0x30e   :  { %v5254_v30 = vadd.f32 %v5253_v29, %v5252_v28  ;;  %v7167_v31 = vpop.f32.mrf.mxu0  ;;  %v7172_v33 = vpop.f32.mrf.mxu1 }
 0x310   :  { %v5256_v58 = vadd.f32 %v5255_v55, %v5254_v30 }
 0x31c   :  { %v4552_v34 = vpop.f32.mrf.mxu0 }
 0x31d   :  { %v5257_v36 = vsel %vm5213_vm2, %v4552_v34, 0.0 }
 0x31e   :  { %v5258_v37 = vadd.f32 %v5257_v36, %v5256_v58  ;;  %v4625_v39 = vpop.f32.mrf.mxu1  ;;  %v7177_v32 = vpop.f32.mrf.mxu0 }
 0x31f   :  { %v5259_v35 = vsel %vm5213_vm2, %v4625_v39, 0.0 }
 0x320   :  { %v5260_v41 = vadd.f32 %v5259_v35, %v5258_v37  ;;  %v7182_v44 = vpop.f32.mrf.mxu1 }
 0x33e   :  { %v4698_v45 = vpop.f32.mrf.mxu0 }
 0x33f   :  { %v5261_v46 = vsel %vm5213_vm2, %v4698_v45, 0.0 }
 0x340   :  { %v5262_v11 = vadd.f32 %v5261_v46, %v5260_v41  ;;  %v4771_v14 = vpop.f32.mrf.mxu1  ;;  %v7187_v47 = vpop.f32.mrf.mxu0 }
 0x341   :  { %v5263_v48 = vsel %vm5213_vm2, %v4771_v14, 0.0 }
 0x342   :  { %v5264_v49 = vadd.f32 %v5263_v48, %v5262_v11  ;;  %v7192_v50 = vpop.f32.mrf.mxu1 }
 0x360   :  { %v4844_v56 = vpop.f32.mrf.mxu0 }
 0x361   :  { %v5265_v61 = vsel %vm5213_vm2, %v4844_v56, 0.0 }
 0x362   :  { %v4917_v60 = vpop.f32.mrf.mxu1  ;;  %v7197_v51 = vpop.f32.mrf.mxu0  ;;  %v5266_v38 = vadd.f32 %v5265_v61, %v5264_v49 }
 0x363   :  { %v5267_v42 = vsel %vm5213_vm2, %v4917_v60, 0.0 }
 0x364   :  { %v7202_v52 = vpop.f32.mrf.mxu1  ;;  %v5268_v0 = vadd.f32 %v5267_v42, %v5266_v38 }
 0x382   :  { %v4990_v53 = vpop.f32.mrf.mxu0 }
 0x383   :  { %v5269_v63 = vsel %vm5213_vm2, %v4990_v53, 0.0 }
 0x384   :  { %v5063_v54 = vpop.f32.mrf.mxu1  ;;  %v7207_v57 = vpop.f32.mrf.mxu0  ;;  %v5270_v3 = vadd.f32 %v5269_v63, %v5268_v0 }
 0x385   :  { %v5271_v4 = vsel %vm5213_vm2, %v5063_v54, 0.0 }
 0x386   :  { %v7212_v59 = vpop.f32.mrf.mxu1  ;;  %v5272_v5 = vadd.f32 %v5271_v4, %v5270_v3 }
 0x3a5   :  { %v5136_v23 = vpop.f32.mrf.mxu0  ;;  %v5209_v26 = vpop.f32.mrf.mxu1 }
 0x3a6   :  { %v5273_v6 = vsel %vm5213_vm2, %v5136_v23, 0.0  ;;  %v5275_v7 = vsel %vm5213_vm2, %v5209_v26, 0.0 }
 0x3a7   :  { %v5274_v9 = vadd.f32 %v5273_v6, %v5272_v5  ;;  %v7217_v13 = vpop.f32.mrf.mxu0  ;;  %v7222_v8 = vpop.f32.mrf.mxu1 }
 0x3a9   :  { %v5276_v16 = vadd.f32 %v5275_v7, %v5274_v9 }
 0x3ab   :  { %v5284_v17 = vadd.f32 %v5334_v12, %v5276_v16 }
 0x3ad   :  { %v5285_v19 = vmax.f32 %v5284_v17, 0.0 }
 0x3af   :  { %5286 = vst.msk [vmem:[#allocation2] sm:$0x3] %vm5213_vm2, %v5285_v19 }
 0x3b0   :  { %7237 = shalt.err (!%p7234_p4)
}
 0x3b1   :  { %5296 = dma.vmem_to_hbm [thread:$0]  %s5294_s15, 32, %s9854_s5, [#allocation3]  }
 0x3b2   :  { %7246 = dma.done.wait [#allocation3], 32  }
 0x3b3   :  { %7247 = vsyncadd [#allocation3], 4294967264 }
 0x3b4   :  { %5300 = vsyncpa [#allocation3], 1 }

</bundles_post_ra>
